<compile_context>
chip_gen: v6e
topology: v6e:2x2x1
jax: 0.10.0
libtpu: 0.0.40
codegen_flags: <defaults>
</compile_context>

<pallas_src>
import functools
import math

import jax
import jax.numpy as jnp
from jax.experimental import pallas as pl
from jax.experimental.pallas import tpu as pltpu


_EPS = 1e-5
_MXU_DTYPE = jnp.bfloat16        # conv matmul operand dtype (accumulation f32)


def _round_up(x, m):
    return ((x + m - 1) // m) * m


# ----------------------------- in-kernel helpers ------------------------------

def _erf(x):
    # Abramowitz & Stegun 7.1.26 (|err| < 1.5e-7): matches PyTorch's exact
    # erf-based nn.GELU to f32 tolerance.
    # TODO(synk): swap to the tanh GELU on v5e if the elementwise epilogue
    # becomes the binding VALU slot.
    p = 0.3275911
    a1, a2, a3, a4, a5 = (0.254829592, -0.284496736, 1.421413741,
                          -1.453152027, 1.061405429)
    ax = jnp.abs(x)
    t = 1.0 / (1.0 + p * ax)
    poly = ((((a5 * t + a4) * t + a3) * t + a2) * t + a1) * t
    y = 1.0 - poly * jnp.exp(-ax * ax)
    return jnp.where(x >= 0, y, -y)


def _gelu(x):
    return 0.5 * x * (1.0 + _erf(x * 0.7071067811865476))


# --------------------------------- kernel --------------------------------------

def up_fused_kernel(x_ref, skip_ref, mw_ref,
                    w11_ref, g11_ref, b11_ref, w12_ref, g12_ref, b12_ref,
                    w21_ref, g21_ref, b21_ref, w22_ref, g22_ref, b22_ref,
                    emb_ref, o_ref,
                    xc_scr, h_scr, y_scr, tap_scr, urow_scr, *, hi, wi):
    # One batch sample per grid step:
    #   upsample -> concat -> DoubleConv(residual) -> DoubleConv -> + emb
    h, w = 2 * hi, 2 * wi
    hw = h * w
    hwp = xc_scr.shape[1]
    halo = (hwp - hw) // 2                      # 128-aligned flat zero halo
    cx = x_ref.shape[1]
    c = xc_scr.shape[0]
    cmid = y_scr.shape[0]

    # Per-column validity masks for the dx = -1 / +1 taps (the flat layout
    # wraps row ends onto the neighbouring row). Computed once per step.
    col = jax.lax.broadcasted_iota(jnp.int32, (1, hw), 1) % w
    m_left = jnp.where(col != 0, 1.0, 0.0)      # (1, hw) f32
    m_right = jnp.where(col != w - 1, 1.0, 0.0)

    # ---- zero the flat halos; payload regions are overwritten below.
    # (Unconditional: with a "parallel" batch axis each core owns its scratch.)
    xc_scr[:, 0:halo] = jnp.zeros((c, halo), jnp.float32)
    xc_scr[:, halo + hw:hwp] = jnp.zeros((c, halo), jnp.float32)
    h_scr[:, 0:halo] = jnp.zeros((c, halo), jnp.float32)
    h_scr[:, halo + hw:hwp] = jnp.zeros((c, halo), jnp.float32)
    y_scr[:, 0:halo] = jnp.zeros((cmid, halo), jnp.float32)
    y_scr[:, halo + hw:hwp] = jnp.zeros((cmid, halo), jnp.float32)

    # ---- xc = concat([skip, upsample2x(x)], channels) into the halo slab.
    xc_scr[0:cx, halo:halo + hw] = skip_ref[0]

    # Separable bilinear x2 upsample (align_corners=True): H-lerp with static
    # (trace-time) weights, then one MXU matmul for the W interpolation.
    x_flat = x_ref[0]                                        # (cx, hi*wi) f32
    for r in range(h):
        src = r * (hi - 1) / (h - 1) if h > 1 else 0.0
        i0 = min(int(math.floor(src)), hi - 1)
        i1 = min(i0 + 1, hi - 1)
        f = src - i0
        r0 = x_flat[:, i0 * wi:(i0 + 1) * wi]
        if f == 0.0 or i1 == i0:
            piece = r0
        else:
            piece = (1.0 - f) * r0 + f * x_flat[:, i1 * wi:(i1 + 1) * wi]
        urow_scr[r * cx:(r + 1) * cx, :] = piece
    up_rows = jnp.dot(urow_scr[...], mw_ref[...],
                      preferred_element_type=jnp.float32)    # (h*cx, w)
    for r in range(h):
        xc_scr[cx:c, halo + r * w:halo + (r + 1) * w] = \
            up_rows[r * cx:(r + 1) * cx, :]

    def conv3x3_gn(slab, cin, w_ref, g_ref, b_ref):
        # 3x3 conv (padding=1, bias=False) as ONE K=9*cin bf16 MXU matmul over
        # a tap-stacked window slab, fused with one-pass GroupNorm(1, cout).
        ml = jnp.broadcast_to(m_left, (cin, hw))    # hoisted: 1 bcast / conv
        mr = jnp.broadcast_to(m_right, (cin, hw))
        for dy in range(3):
            for dx in range(3):
                s = halo + (dy - 1) * w + (dx - 1)
                win = slab[:, s:s + hw]
                if dx == 0:
                    win = win * ml                  # zero cols with c-1 < 0
                elif dx == 2:
                    win = win * mr                  # zero cols with c+1 > w-1
                tap = dy * 3 + dx
                tap_scr[tap * cin:(tap + 1) * cin, :] = win
        stacked = tap_scr[0:9 * cin, :].astype(_MXU_DTYPE)   # (9*cin, hw)
        acc = jnp.dot(w_ref[...], stacked,
                      preferred_element_type=jnp.float32)    # (cout_, hw) f32
        # One-pass GroupNorm(1, C): biased variance over all channels & pixels.
        n_el = acc.shape[0] * hw
        mean = jnp.sum(acc) / n_el
        var = jnp.maximum(jnp.sum(acc * acc) / n_el - mean * mean, 0.0)
        y = (acc - mean) * jax.lax.rsqrt(var + _EPS)
        return y * g_ref[...] + b_ref[...]

    # ---- DoubleConv(in, in, residual=True): gelu(xc + GN(conv(gelu(GN(conv(xc))))))
    h_scr[:, halo:halo + hw] = _gelu(
        conv3x3_gn(xc_scr, c, w11_ref, g11_ref, b11_ref))
    y2 = conv3x3_gn(h_scr, c, w12_ref, g12_ref, b12_ref)
    h_scr[:, halo:halo + hw] = _gelu(xc_scr[:, halo:halo + hw] + y2)

    # ---- DoubleConv(in, out, mid=in//2)
    y_scr[:, halo:halo + hw] = _gelu(
        conv3x3_gn(h_scr, c, w21_ref, g21_ref, b21_ref))
    y4 = conv3x3_gn(y_scr, cmid, w22_ref, g22_ref, b22_ref)

    # ---- + emb (Linear(SiLU(t)) precomputed per sample; broadcast over H*W)
    o_ref[0] = y4 + emb_ref[0]


# ------------------------------ host-side glue ---------------------------------

def _winterp_t(in_size, out_size):
    # (in, out) bilinear align_corners=True interpolation weights (transposed).
    o = jnp.arange(out_size, dtype=jnp.float32)
    scale = (in_size - 1) / (out_size - 1) if out_size > 1 else 0.0
    src = o * scale
    i0 = jnp.clip(jnp.floor(src).astype(jnp.int32), 0, in_size - 1)
    i1 = jnp.minimum(i0 + 1, in_size - 1)
    f = src - i0.astype(jnp.float32)
    m = (jax.nn.one_hot(i0, in_size, dtype=jnp.float32) * (1.0 - f)[:, None]
         + jax.nn.one_hot(i1, in_size, dtype=jnp.float32) * f[:, None])
    return m.T                                              # (in, out)


def up_forward(params, x, skip_x, t):
    # x: (N, Cx, Hi, Wi), skip_x: (N, Cx, 2Hi, 2Wi), t: (N, emb_dim)   [NCHW]
    n, cx, hi, wi = x.shape
    ho, wo = 2 * hi, 2 * wi
    hw = ho * wo
    halo = _round_up(wo + 1, 128)         # lane-aligned flat zero halo
    hwp = hw + 2 * halo
    c = 2 * cx
    p1, p2 = params["dc1"], params["dc2"]
    cmid = p2["w1"].shape[0]
    cout = p2["w2"].shape[0]

    x_flat = x.reshape(n, cx, hi * wi)
    skip_flat = skip_x.reshape(n, cx, hw)
    mw = _winterp_t(wi, wo)                                  # (wi, wo) f32

    # emb_layer (SiLU -> Linear) for the whole batch in one XLA matmul; the
    # kernel only does the broadcast add.
    emb = jax.nn.silu(t) @ params["emb_w"].T + params["emb_b"][None, :]
    emb = emb.reshape(n, cout, 1).astype(jnp.float32)

    cast = lambda a: a.astype(_MXU_DTYPE)                    # MXU operands bf16
    per_batch = lambda i: (i, 0, 0)
    whole2 = lambda i: (0, 0)

    out_flat = pl.pallas_call(
        functools.partial(up_fused_kernel, hi=hi, wi=wi),
        out_shape=jax.ShapeDtypeStruct((n, cout, hw), jnp.float32),
        grid=(n,),
        in_specs=[
            pl.BlockSpec((1, cx, hi * wi), per_batch),       # x
            pl.BlockSpec((1, cx, hw), per_batch),            # skip
            pl.BlockSpec((wi, wo), whole2),                  # W-interp matrix
            pl.BlockSpec((c, 9 * c), whole2),                # dc1 w1 (packed)
            pl.BlockSpec((c, 1), whole2),                    # dc1 g1
            pl.BlockSpec((c, 1), whole2),                    # dc1 b1
            pl.BlockSpec((c, 9 * c), whole2),                # dc1 w2
            pl.BlockSpec((c, 1), whole2),                    # dc1 g2
            pl.BlockSpec((c, 1), whole2),                    # dc1 b2
            pl.BlockSpec((cmid, 9 * c), whole2),             # dc2 w1
            pl.BlockSpec((cmid, 1), whole2),                 # dc2 g1
            pl.BlockSpec((cmid, 1), whole2),                 # dc2 b1
            pl.BlockSpec((cout, 9 * cmid), whole2),          # dc2 w2
            pl.BlockSpec((cout, 1), whole2),                 # dc2 g2
            pl.BlockSpec((cout, 1), whole2),                 # dc2 b2
            pl.BlockSpec((1, cout, 1), per_batch),           # emb
        ],
        out_specs=pl.BlockSpec((1, cout, hw), per_batch),
        scratch_shapes=[
            pltpu.VMEM((c, hwp), jnp.float32),       # xc (concat input + halo)
            pltpu.VMEM((c, hwp), jnp.float32),       # dc1 intermediates / h1
            pltpu.VMEM((cmid, hwp), jnp.float32),    # dc2 mid activation
            pltpu.VMEM((9 * c, hw), jnp.float32),    # tap-stacked conv windows
            pltpu.VMEM((ho * cx, wi), jnp.float32),  # H-interpolated rows
        ],
        # TODO(synk): generation-tune vmem_limit_bytes and add an hw-tiling
        # grid axis (two-pass GN) once the per-sample map outgrows one block.
        compiler_params=pltpu.CompilerParams(
            dimension_semantics=("parallel",)),
    )(x_flat, skip_flat, mw,
      cast(p1["w1"]), p1["g1"], p1["b1"], cast(p1["w2"]), p1["g2"], p1["b2"],
      cast(p2["w1"]), p2["g1"], p2["b1"], cast(p2["w2"]), p2["g2"], p2["b2"],
      emb)

    return out_flat.reshape(n, cout, ho, wo)


# ----------------------------- parameter init ---------------------------------

def init_params(key, in_channels, out_channels, emb_dim):
    mid2 = in_channels // 2
    ks = jax.random.split(key, 14)

    def conv_w(k, ci, co):
        # Generated in PyTorch layout (co, ci, 3, 3), then packed tap-major to
        # (co, 9*ci) to match the kernel's stacked-window matmul.
        w = jax.random.normal(k, (co, ci, 3, 3), jnp.float32) / math.sqrt(9 * ci)
        return w.transpose(0, 2, 3, 1).reshape(co, 9 * ci)

    def affine(kg, kb, ch):
        g = 1.0 + 0.1 * jax.random.normal(kg, (ch, 1), jnp.float32)
        b = 0.1 * jax.random.normal(kb, (ch, 1), jnp.float32)
        return g, b

    g11, b11 = affine(ks[1], ks[2], in_channels)
    g12, b12 = affine(ks[4], ks[5], in_channels)
    g21, b21 = affine(ks[7], ks[8], mid2)
    g22, b22 = affine(ks[10], ks[11], out_channels)
    return {
        "dc1": {  # DoubleConv(in, in, residual=True)
            "w1": conv_w(ks[0], in_channels, in_channels), "g1": g11, "b1": b11,
            "w2": conv_w(ks[3], in_channels, in_channels), "g2": g12, "b2": b12,
        },
        "dc2": {  # DoubleConv(in, out, mid=in//2)
            "w1": conv_w(ks[6], in_channels, mid2), "g1": g21, "b1": b21,
            "w2": conv_w(ks[9], mid2, out_channels), "g2": g22, "b2": b22,
        },
        "emb_w": jax.random.normal(ks[12], (out_channels, emb_dim), jnp.float32)
                 / math.sqrt(emb_dim),
        "emb_b": 0.1 * jax.random.normal(ks[13], (out_channels,), jnp.float32),
    }


# ----------------------------------- main --------------------------------------

if __name__ == "__main__":
    in_channels, out_channels, emb_dim = 8, 4, 32
    N, Hin, Win = 2, 8, 8
    cx = in_channels // 2   # x (from below) and skip each carry in_channels // 2

    key = jax.random.PRNGKey(0)
    kx, ksk, kt, kp = jax.random.split(key, 4)
    # PyTorch NCHW tensors: x (2,4,8,8), skip_x (2,4,16,16), t (2,32)
    x = jax.random.normal(kx, (N, cx, Hin, Win), jnp.float32)
    skip_x = jax.random.normal(ksk, (N, cx, 2 * Hin, 2 * Win), jnp.float32)
    t = jax.random.normal(kt, (N, emb_dim), jnp.float32)
    params = init_params(kp, in_channels, out_channels, emb_dim)

    fwd = jax.jit(up_forward)
    out = jax.block_until_ready(fwd(params, x, skip_x, t))

    assert out.shape == (N, out_channels, 2 * Hin, 2 * Win), out.shape
    assert bool(jnp.all(jnp.isfinite(out)))
    print("KERNEL_OK")
</pallas_src>

<mosaic_0001>
module attributes {stable_mosaic.version = 11 : i64} {
  func.func @up_fused_kernel(%arg0: i32, %arg1: memref<1x4x64xf32, #tpu.memory_space<vmem>>, %arg2: memref<1x4x256xf32, #tpu.memory_space<vmem>>, %arg3: memref<8x16xf32, #tpu.memory_space<vmem>>, %arg4: memref<8x72xbf16, #tpu.memory_space<vmem>>, %arg5: memref<8x1xf32, #tpu.memory_space<vmem>>, %arg6: memref<8x1xf32, #tpu.memory_space<vmem>>, %arg7: memref<8x72xbf16, #tpu.memory_space<vmem>>, %arg8: memref<8x1xf32, #tpu.memory_space<vmem>>, %arg9: memref<8x1xf32, #tpu.memory_space<vmem>>, %arg10: memref<4x72xbf16, #tpu.memory_space<vmem>>, %arg11: memref<4x1xf32, #tpu.memory_space<vmem>>, %arg12: memref<4x1xf32, #tpu.memory_space<vmem>>, %arg13: memref<4x36xbf16, #tpu.memory_space<vmem>>, %arg14: memref<4x1xf32, #tpu.memory_space<vmem>>, %arg15: memref<4x1xf32, #tpu.memory_space<vmem>>, %arg16: memref<1x4x1xf32, #tpu.memory_space<vmem>>, %arg17: memref<1x4x256xf32, #tpu.memory_space<vmem>>, %arg18: memref<8x512xf32, #tpu.memory_space<vmem>>, %arg19: memref<8x512xf32, #tpu.memory_space<vmem>>, %arg20: memref<4x512xf32, #tpu.memory_space<vmem>>, %arg21: memref<72x256xf32, #tpu.memory_space<vmem>>, %arg22: memref<64x8xf32, #tpu.memory_space<vmem>>) attributes {dimension_semantics = [#tpu.dimension_semantics<parallel>], iteration_bounds = array<i64: 2>, scalar_prefetch = 0 : i64, scratch_operands = 5 : i64, tpu.core_type = #tpu.core_type<tc>, window_params = [{transform_indices = @transform_0, window_bounds = array<i64: 1, 4, 64>}, {transform_indices = @transform_1, window_bounds = array<i64: 1, 4, 256>}, {pipeline_mode = #tpu.pipeline_mode<synchronous>, transform_indices = @transform_2, window_bounds = array<i64: 8, 16>}, {pipeline_mode = #tpu.pipeline_mode<synchronous>, transform_indices = @transform_3, window_bounds = array<i64: 8, 72>}, {pipeline_mode = #tpu.pipeline_mode<synchronous>, transform_indices = @transform_4, window_bounds = array<i64: 8, 1>}, {pipeline_mode = #tpu.pipeline_mode<synchronous>, transform_indices = @transform_5, window_bounds = array<i64: 8, 1>}, {pipeline_mode = #tpu.pipeline_mode<synchronous>, transform_indices = @transform_6, window_bounds = array<i64: 8, 72>}, {pipeline_mode = #tpu.pipeline_mode<synchronous>, transform_indices = @transform_7, window_bounds = array<i64: 8, 1>}, {pipeline_mode = #tpu.pipeline_mode<synchronous>, transform_indices = @transform_8, window_bounds = array<i64: 8, 1>}, {pipeline_mode = #tpu.pipeline_mode<synchronous>, transform_indices = @transform_9, window_bounds = array<i64: 4, 72>}, {pipeline_mode = #tpu.pipeline_mode<synchronous>, transform_indices = @transform_10, window_bounds = array<i64: 4, 1>}, {pipeline_mode = #tpu.pipeline_mode<synchronous>, transform_indices = @transform_11, window_bounds = array<i64: 4, 1>}, {pipeline_mode = #tpu.pipeline_mode<synchronous>, transform_indices = @transform_12, window_bounds = array<i64: 4, 36>}, {pipeline_mode = #tpu.pipeline_mode<synchronous>, transform_indices = @transform_13, window_bounds = array<i64: 4, 1>}, {pipeline_mode = #tpu.pipeline_mode<synchronous>, transform_indices = @transform_14, window_bounds = array<i64: 4, 1>}, {transform_indices = @transform_15, window_bounds = array<i64: 1, 4, 1>}, {transform_indices = @transform_16, window_bounds = array<i64: 1, 4, 256>}]} {
    %0 = tpu.iota {dimensions = array<i32: 1>} : vector<1x256xi32>
    %c16_i32 = arith.constant 16 : i32
    %c0_i32 = arith.constant 0 : i32
    %1 = arith.cmpi eq, %c16_i32, %c0_i32 : i32
    %c1_i32 = arith.constant 1 : i32
    %2 = arith.select %1, %c1_i32, %c16_i32 : i32
    %3 = vector.broadcast %2 : i32 to vector<1x256xi32>
    %4 = arith.remsi %0, %3 : vector<1x256xi32>
    %c0_i32_0 = arith.constant 0 : i32
    %5 = vector.broadcast %c0_i32_0 : i32 to vector<1x256xi32>
    %6 = arith.cmpi ne, %4, %5 : vector<1x256xi32>
    %c0_i32_1 = arith.constant 0 : i32
    %7 = vector.broadcast %c0_i32_1 : i32 to vector<1x256xi32>
    %8 = arith.cmpi slt, %4, %7 : vector<1x256xi32>
    %c0_i32_2 = arith.constant 0 : i32
    %9 = arith.cmpi slt, %2, %c0_i32_2 : i32
    %10 = vector.broadcast %9 : i1 to vector<1x256xi1>
    %11 = vector.broadcast %10 : vector<1x256xi1> to vector<1x256xi1>
    %12 = arith.xori %8, %11 : vector<1x256xi1>
    %13 = arith.andi %12, %6 : vector<1x256xi1>
    %14 = vector.broadcast %2 : i32 to vector<1x256xi32>
    %15 = arith.addi %4, %14 : vector<1x256xi32>
    %16 = arith.select %13, %15, %4 : vector<1x256xi1>, vector<1x256xi32>
    %c0_i32_3 = arith.constant 0 : i32
    %17 = vector.broadcast %c0_i32_3 : i32 to vector<1x256xi32>
    %18 = arith.cmpi ne, %16, %17 : vector<1x256xi32>
    %cst = arith.constant 1.000000e+00 : f32
    %cst_4 = arith.constant 0.000000e+00 : f32
    %19 = vector.broadcast %cst : f32 to vector<1x256xf32>
    %20 = vector.broadcast %cst_4 : f32 to vector<1x256xf32>
    %21 = arith.select %18, %19, %20 : vector<1x256xi1>, vector<1x256xf32>
    %c15_i32 = arith.constant 15 : i32
    %22 = vector.broadcast %c15_i32 : i32 to vector<1x256xi32>
    %23 = arith.cmpi ne, %16, %22 : vector<1x256xi32>
    %cst_5 = arith.constant 1.000000e+00 : f32
    %cst_6 = arith.constant 0.000000e+00 : f32
    %24 = vector.broadcast %cst_5 : f32 to vector<1x256xf32>
    %25 = vector.broadcast %cst_6 : f32 to vector<1x256xf32>
    %26 = arith.select %23, %24, %25 : vector<1x256xi1>, vector<1x256xf32>
    %cst_7 = arith.constant 0.000000e+00 : f32
    %27 = vector.broadcast %cst_7 : f32 to vector<8x128xf32>
    %c0 = arith.constant 0 : index
    %c0_8 = arith.constant 0 : index
    %28 = vector.load %arg18[%c0, %c0_8] : memref<8x512xf32, #tpu.memory_space<vmem>>, vector<8x128xf32>
    tpu.vector_store %arg18[%c0, %c0_8], %27 {strides = array<i32>} : memref<8x512xf32, #tpu.memory_space<vmem>>, vector<8x128xf32>,
    %cst_9 = arith.constant 0.000000e+00 : f32
    %29 = vector.broadcast %cst_9 : f32 to vector<8x128xf32>
    %c0_10 = arith.constant 0 : index
    %c384 = arith.constant 384 : index
    %30 = vector.load %arg18[%c0_10, %c384] : memref<8x512xf32, #tpu.memory_space<vmem>>, vector<8x128xf32>
    tpu.vector_store %arg18[%c0_10, %c384], %29 {strides = array<i32>} : memref<8x512xf32, #tpu.memory_space<vmem>>, vector<8x128xf32>,
    %cst_11 = arith.constant 0.000000e+00 : f32
    %31 = vector.broadcast %cst_11 : f32 to vector<8x128xf32>
    %c0_12 = arith.constant 0 : index
    %c0_13 = arith.constant 0 : index
    %32 = vector.load %arg19[%c0_12, %c0_13] : memref<8x512xf32, #tpu.memory_space<vmem>>, vector<8x128xf32>
    tpu.vector_store %arg19[%c0_12, %c0_13], %31 {strides = array<i32>} : memref<8x512xf32, #tpu.memory_space<vmem>>, vector<8x128xf32>,
    %cst_14 = arith.constant 0.000000e+00 : f32
    %33 = vector.broadcast %cst_14 : f32 to vector<8x128xf32>
    %c0_15 = arith.constant 0 : index
    %c384_16 = arith.constant 384 : index
    %34 = vector.load %arg19[%c0_15, %c384_16] : memref<8x512xf32, #tpu.memory_space<vmem>>, vector<8x128xf32>
    tpu.vector_store %arg19[%c0_15, %c384_16], %33 {strides = array<i32>} : memref<8x512xf32, #tpu.memory_space<vmem>>, vector<8x128xf32>,
    %cst_17 = arith.constant 0.000000e+00 : f32
    %35 = vector.broadcast %cst_17 : f32 to vector<4x128xf32>
    %c0_18 = arith.constant 0 : index
    %c0_19 = arith.constant 0 : index
    %36 = vector.load %arg20[%c0_18, %c0_19] : memref<4x512xf32, #tpu.memory_space<vmem>>, vector<4x128xf32>
    tpu.vector_store %arg20[%c0_18, %c0_19], %35 {strides = array<i32>} : memref<4x512xf32, #tpu.memory_space<vmem>>, vector<4x128xf32>,
    %cst_20 = arith.constant 0.000000e+00 : f32
    %37 = vector.broadcast %cst_20 : f32 to vector<4x128xf32>
    %c0_21 = arith.constant 0 : index
    %c384_22 = arith.constant 384 : index
    %38 = vector.load %arg20[%c0_21, %c384_22] : memref<4x512xf32, #tpu.memory_space<vmem>>, vector<4x128xf32>
    tpu.vector_store %arg20[%c0_21, %c384_22], %37 {strides = array<i32>} : memref<4x512xf32, #tpu.memory_space<vmem>>, vector<4x128xf32>,
    %c0_23 = arith.constant 0 : index
    %c0_24 = arith.constant 0 : index
    %c0_25 = arith.constant 0 : index
    %39 = vector.load %arg2[%c0_23, %c0_24, %c0_25] : memref<1x4x256xf32, #tpu.memory_space<vmem>>, vector<1x4x256xf32>
    %40 = vector.shape_cast %39 : vector<1x4x256xf32> to vector<4x256xf32>
    %c0_26 = arith.constant 0 : index
    %c128 = arith.constant 128 : index
    %41 = vector.load %arg18[%c0_26, %c128] : memref<8x512xf32, #tpu.memory_space<vmem>>, vector<4x256xf32>
    tpu.vector_store %arg18[%c0_26, %c128], %40 {strides = array<i32>} : memref<8x512xf32, #tpu.memory_space<vmem>>, vector<4x256xf32>,
    %c0_27 = arith.constant 0 : index
    %c0_28 = arith.constant 0 : index
    %c0_29 = arith.constant 0 : index
    %42 = vector.load %arg1[%c0_27, %c0_28, %c0_29] : memref<1x4x64xf32, #tpu.memory_space<vmem>>, vector<1x4x64xf32>
    %43 = vector.shape_cast %42 : vector<1x4x64xf32> to vector<4x64xf32>
    %44 = vector.extract_strided_slice %43 {offsets = [0, 0], sizes = [4, 8], strides = [1, 1]} : vector<4x64xf32> to vector<4x8xf32>
    %c0_30 = arith.constant 0 : index
    %c0_31 = arith.constant 0 : index
    %45 = vector.load %arg22[%c0_30, %c0_31] : memref<64x8xf32, #tpu.memory_space<vmem>>, vector<4x8xf32>
    tpu.vector_store %arg22[%c0_30, %c0_31], %44 {strides = array<i32>} : memref<64x8xf32, #tpu.memory_space<vmem>>, vector<4x8xf32>,
    %46 = vector.extract_strided_slice %43 {offsets = [0, 0], sizes = [4, 8], strides = [1, 1]} : vector<4x64xf32> to vector<4x8xf32>
    %cst_32 = arith.constant 0.533333361 : f32
    %47 = vector.broadcast %cst_32 : f32 to vector<4x8xf32>
    %48 = arith.mulf %47, %46 : vector<4x8xf32>
    %49 = vector.extract_strided_slice %43 {offsets = [0, 8], sizes = [4, 8], strides = [1, 1]} : vector<4x64xf32> to vector<4x8xf32>
    %cst_33 = arith.constant 0.466666669 : f32
    %50 = vector.broadcast %cst_33 : f32 to vector<4x8xf32>
    %51 = arith.mulf %50, %49 : vector<4x8xf32>
    %52 = arith.addf %48, %51 : vector<4x8xf32>
    %c4 = arith.constant 4 : index
    %c0_34 = arith.constant 0 : index
    %53 = vector.load %arg22[%c4, %c0_34] : memref<64x8xf32, #tpu.memory_space<vmem>>, vector<4x8xf32>
    tpu.vector_store %arg22[%c4, %c0_34], %52 {strides = array<i32>} : memref<64x8xf32, #tpu.memory_space<vmem>>, vector<4x8xf32>,
    %54 = vector.extract_strided_slice %43 {offsets = [0, 0], sizes = [4, 8], strides = [1, 1]} : vector<4x64xf32> to vector<4x8xf32>
    %cst_35 = arith.constant 0.0666666701 : f32
    %55 = vector.broadcast %cst_35 : f32 to vector<4x8xf32>
    %56 = arith.mulf %55, %54 : vector<4x8xf32>
    %57 = vector.extract_strided_slice %43 {offsets = [0, 8], sizes = [4, 8], strides = [1, 1]} : vector<4x64xf32> to vector<4x8xf32>
    %cst_36 = arith.constant 0.933333337 : f32
    %58 = vector.broadcast %cst_36 : f32 to vector<4x8xf32>
    %59 = arith.mulf %58, %57 : vector<4x8xf32>
    %60 = arith.addf %56, %59 : vector<4x8xf32>
    %c8 = arith.constant 8 : index
    %c0_37 = arith.constant 0 : index
    %61 = vector.load %arg22[%c8, %c0_37] : memref<64x8xf32, #tpu.memory_space<vmem>>, vector<4x8xf32>
    tpu.vector_store %arg22[%c8, %c0_37], %60 {strides = array<i32>} : memref<64x8xf32, #tpu.memory_space<vmem>>, vector<4x8xf32>,
    %62 = vector.extract_strided_slice %43 {offsets = [0, 8], sizes = [4, 8], strides = [1, 1]} : vector<4x64xf32> to vector<4x8xf32>
    %cst_38 = arith.constant 6.000000e-01 : f32
    %63 = vector.broadcast %cst_38 : f32 to vector<4x8xf32>
    %64 = arith.mulf %63, %62 : vector<4x8xf32>
    %65 = vector.extract_strided_slice %43 {offsets = [0, 16], sizes = [4, 8], strides = [1, 1]} : vector<4x64xf32> to vector<4x8xf32>
    %cst_39 = arith.constant 4.000000e-01 : f32
    %66 = vector.broadcast %cst_39 : f32 to vector<4x8xf32>
    %67 = arith.mulf %66, %65 : vector<4x8xf32>
    %68 = arith.addf %64, %67 : vector<4x8xf32>
    %c12 = arith.constant 12 : index
    %c0_40 = arith.constant 0 : index
    %69 = vector.load %arg22[%c12, %c0_40] : memref<64x8xf32, #tpu.memory_space<vmem>>, vector<4x8xf32>
    tpu.vector_store %arg22[%c12, %c0_40], %68 {strides = array<i32>} : memref<64x8xf32, #tpu.memory_space<vmem>>, vector<4x8xf32>,
    %70 = vector.extract_strided_slice %43 {offsets = [0, 8], sizes = [4, 8], strides = [1, 1]} : vector<4x64xf32> to vector<4x8xf32>
    %cst_41 = arith.constant 0.13333334 : f32
    %71 = vector.broadcast %cst_41 : f32 to vector<4x8xf32>
    %72 = arith.mulf %71, %70 : vector<4x8xf32>
    %73 = vector.extract_strided_slice %43 {offsets = [0, 16], sizes = [4, 8], strides = [1, 1]} : vector<4x64xf32> to vector<4x8xf32>
    %cst_42 = arith.constant 0.866666674 : f32
    %74 = vector.broadcast %cst_42 : f32 to vector<4x8xf32>
    %75 = arith.mulf %74, %73 : vector<4x8xf32>
    %76 = arith.addf %72, %75 : vector<4x8xf32>
    %c16 = arith.constant 16 : index
    %c0_43 = arith.constant 0 : index
    %77 = vector.load %arg22[%c16, %c0_43] : memref<64x8xf32, #tpu.memory_space<vmem>>, vector<4x8xf32>
    tpu.vector_store %arg22[%c16, %c0_43], %76 {strides = array<i32>} : memref<64x8xf32, #tpu.memory_space<vmem>>, vector<4x8xf32>,
    %78 = vector.extract_strided_slice %43 {offsets = [0, 16], sizes = [4, 8], strides = [1, 1]} : vector<4x64xf32> to vector<4x8xf32>
    %cst_44 = arith.constant 0.666666686 : f32
    %79 = vector.broadcast %cst_44 : f32 to vector<4x8xf32>
    %80 = arith.mulf %79, %78 : vector<4x8xf32>
    %81 = vector.extract_strided_slice %43 {offsets = [0, 24], sizes = [4, 8], strides = [1, 1]} : vector<4x64xf32> to vector<4x8xf32>
    %cst_45 = arith.constant 0.333333343 : f32
    %82 = vector.broadcast %cst_45 : f32 to vector<4x8xf32>
    %83 = arith.mulf %82, %81 : vector<4x8xf32>
    %84 = arith.addf %80, %83 : vector<4x8xf32>
    %c20 = arith.constant 20 : index
    %c0_46 = arith.constant 0 : index
    %85 = vector.load %arg22[%c20, %c0_46] : memref<64x8xf32, #tpu.memory_space<vmem>>, vector<4x8xf32>
    tpu.vector_store %arg22[%c20, %c0_46], %84 {strides = array<i32>} : memref<64x8xf32, #tpu.memory_space<vmem>>, vector<4x8xf32>,
    %86 = vector.extract_strided_slice %43 {offsets = [0, 16], sizes = [4, 8], strides = [1, 1]} : vector<4x64xf32> to vector<4x8xf32>
    %cst_47 = arith.constant 2.000000e-01 : f32
    %87 = vector.broadcast %cst_47 : f32 to vector<4x8xf32>
    %88 = arith.mulf %87, %86 : vector<4x8xf32>
    %89 = vector.extract_strided_slice %43 {offsets = [0, 24], sizes = [4, 8], strides = [1, 1]} : vector<4x64xf32> to vector<4x8xf32>
    %cst_48 = arith.constant 8.000000e-01 : f32
    %90 = vector.broadcast %cst_48 : f32 to vector<4x8xf32>
    %91 = arith.mulf %90, %89 : vector<4x8xf32>
    %92 = arith.addf %88, %91 : vector<4x8xf32>
    %c24 = arith.constant 24 : index
    %c0_49 = arith.constant 0 : index
    %93 = vector.load %arg22[%c24, %c0_49] : memref<64x8xf32, #tpu.memory_space<vmem>>, vector<4x8xf32>
    tpu.vector_store %arg22[%c24, %c0_49], %92 {strides = array<i32>} : memref<64x8xf32, #tpu.memory_space<vmem>>, vector<4x8xf32>,
    %94 = vector.extract_strided_slice %43 {offsets = [0, 24], sizes = [4, 8], strides = [1, 1]} : vector<4x64xf32> to vector<4x8xf32>
    %cst_50 = arith.constant 0.733333349 : f32
    %95 = vector.broadcast %cst_50 : f32 to vector<4x8xf32>
    %96 = arith.mulf %95, %94 : vector<4x8xf32>
    %97 = vector.extract_strided_slice %43 {offsets = [0, 32], sizes = [4, 8], strides = [1, 1]} : vector<4x64xf32> to vector<4x8xf32>
    %cst_51 = arith.constant 0.266666681 : f32
    %98 = vector.broadcast %cst_51 : f32 to vector<4x8xf32>
    %99 = arith.mulf %98, %97 : vector<4x8xf32>
    %100 = arith.addf %96, %99 : vector<4x8xf32>
    %c28 = arith.constant 28 : index
    %c0_52 = arith.constant 0 : index
    %101 = vector.load %arg22[%c28, %c0_52] : memref<64x8xf32, #tpu.memory_space<vmem>>, vector<4x8xf32>
    tpu.vector_store %arg22[%c28, %c0_52], %100 {strides = array<i32>} : memref<64x8xf32, #tpu.memory_space<vmem>>, vector<4x8xf32>,
    %102 = vector.extract_strided_slice %43 {offsets = [0, 24], sizes = [4, 8], strides = [1, 1]} : vector<4x64xf32> to vector<4x8xf32>
    %cst_53 = arith.constant 0.266666681 : f32
    %103 = vector.broadcast %cst_53 : f32 to vector<4x8xf32>
    %104 = arith.mulf %103, %102 : vector<4x8xf32>
    %105 = vector.extract_strided_slice %43 {offsets = [0, 32], sizes = [4, 8], strides = [1, 1]} : vector<4x64xf32> to vector<4x8xf32>
    %cst_54 = arith.constant 0.733333349 : f32
    %106 = vector.broadcast %cst_54 : f32 to vector<4x8xf32>
    %107 = arith.mulf %106, %105 : vector<4x8xf32>
    %108 = arith.addf %104, %107 : vector<4x8xf32>
    %c32 = arith.constant 32 : index
    %c0_55 = arith.constant 0 : index
    %109 = vector.load %arg22[%c32, %c0_55] : memref<64x8xf32, #tpu.memory_space<vmem>>, vector<4x8xf32>
    tpu.vector_store %arg22[%c32, %c0_55], %108 {strides = array<i32>} : memref<64x8xf32, #tpu.memory_space<vmem>>, vector<4x8xf32>,
    %110 = vector.extract_strided_slice %43 {offsets = [0, 32], sizes = [4, 8], strides = [1, 1]} : vector<4x64xf32> to vector<4x8xf32>
    %cst_56 = arith.constant 8.000000e-01 : f32
    %111 = vector.broadcast %cst_56 : f32 to vector<4x8xf32>
    %112 = arith.mulf %111, %110 : vector<4x8xf32>
    %113 = vector.extract_strided_slice %43 {offsets = [0, 40], sizes = [4, 8], strides = [1, 1]} : vector<4x64xf32> to vector<4x8xf32>
    %cst_57 = arith.constant 2.000000e-01 : f32
    %114 = vector.broadcast %cst_57 : f32 to vector<4x8xf32>
    %115 = arith.mulf %114, %113 : vector<4x8xf32>
    %116 = arith.addf %112, %115 : vector<4x8xf32>
    %c36 = arith.constant 36 : index
    %c0_58 = arith.constant 0 : index
    %117 = vector.load %arg22[%c36, %c0_58] : memref<64x8xf32, #tpu.memory_space<vmem>>, vector<4x8xf32>
    tpu.vector_store %arg22[%c36, %c0_58], %116 {strides = array<i32>} : memref<64x8xf32, #tpu.memory_space<vmem>>, vector<4x8xf32>,
    %118 = vector.extract_strided_slice %43 {offsets = [0, 32], sizes = [4, 8], strides = [1, 1]} : vector<4x64xf32> to vector<4x8xf32>
    %cst_59 = arith.constant 0.333333343 : f32
    %119 = vector.broadcast %cst_59 : f32 to vector<4x8xf32>
    %120 = arith.mulf %119, %118 : vector<4x8xf32>
    %121 = vector.extract_strided_slice %43 {offsets = [0, 40], sizes = [4, 8], strides = [1, 1]} : vector<4x64xf32> to vector<4x8xf32>
    %cst_60 = arith.constant 0.666666686 : f32
    %122 = vector.broadcast %cst_60 : f32 to vector<4x8xf32>
    %123 = arith.mulf %122, %121 : vector<4x8xf32>
    %124 = arith.addf %120, %123 : vector<4x8xf32>
    %c40 = arith.constant 40 : index
    %c0_61 = arith.constant 0 : index
    %125 = vector.load %arg22[%c40, %c0_61] : memref<64x8xf32, #tpu.memory_space<vmem>>, vector<4x8xf32>
    tpu.vector_store %arg22[%c40, %c0_61], %124 {strides = array<i32>} : memref<64x8xf32, #tpu.memory_space<vmem>>, vector<4x8xf32>,
    %126 = vector.extract_strided_slice %43 {offsets = [0, 40], sizes = [4, 8], strides = [1, 1]} : vector<4x64xf32> to vector<4x8xf32>
    %cst_62 = arith.constant 0.866666674 : f32
    %127 = vector.broadcast %cst_62 : f32 to vector<4x8xf32>
    %128 = arith.mulf %127, %126 : vector<4x8xf32>
    %129 = vector.extract_strided_slice %43 {offsets = [0, 48], sizes = [4, 8], strides = [1, 1]} : vector<4x64xf32> to vector<4x8xf32>
    %cst_63 = arith.constant 0.13333334 : f32
    %130 = vector.broadcast %cst_63 : f32 to vector<4x8xf32>
    %131 = arith.mulf %130, %129 : vector<4x8xf32>
    %132 = arith.addf %128, %131 : vector<4x8xf32>
    %c44 = arith.constant 44 : index
    %c0_64 = arith.constant 0 : index
    %133 = vector.load %arg22[%c44, %c0_64] : memref<64x8xf32, #tpu.memory_space<vmem>>, vector<4x8xf32>
    tpu.vector_store %arg22[%c44, %c0_64], %132 {strides = array<i32>} : memref<64x8xf32, #tpu.memory_space<vmem>>, vector<4x8xf32>,
    %134 = vector.extract_strided_slice %43 {offsets = [0, 40], sizes = [4, 8], strides = [1, 1]} : vector<4x64xf32> to vector<4x8xf32>
    %cst_65 = arith.constant 4.000000e-01 : f32
    %135 = vector.broadcast %cst_65 : f32 to vector<4x8xf32>
    %136 = arith.mulf %135, %134 : vector<4x8xf32>
    %137 = vector.extract_strided_slice %43 {offsets = [0, 48], sizes = [4, 8], strides = [1, 1]} : vector<4x64xf32> to vector<4x8xf32>
    %cst_66 = arith.constant 6.000000e-01 : f32
    %138 = vector.broadcast %cst_66 : f32 to vector<4x8xf32>
    %139 = arith.mulf %138, %137 : vector<4x8xf32>
    %140 = arith.addf %136, %139 : vector<4x8xf32>
    %c48 = arith.constant 48 : index
    %c0_67 = arith.constant 0 : index
    %141 = vector.load %arg22[%c48, %c0_67] : memref<64x8xf32, #tpu.memory_space<vmem>>, vector<4x8xf32>
    tpu.vector_store %arg22[%c48, %c0_67], %140 {strides = array<i32>} : memref<64x8xf32, #tpu.memory_space<vmem>>, vector<4x8xf32>,
    %142 = vector.extract_strided_slice %43 {offsets = [0, 48], sizes = [4, 8], strides = [1, 1]} : vector<4x64xf32> to vector<4x8xf32>
    %cst_68 = arith.constant 0.933333337 : f32
    %143 = vector.broadcast %cst_68 : f32 to vector<4x8xf32>
    %144 = arith.mulf %143, %142 : vector<4x8xf32>
    %145 = vector.extract_strided_slice %43 {offsets = [0, 56], sizes = [4, 8], strides = [1, 1]} : vector<4x64xf32> to vector<4x8xf32>
    %cst_69 = arith.constant 0.0666666701 : f32
    %146 = vector.broadcast %cst_69 : f32 to vector<4x8xf32>
    %147 = arith.mulf %146, %145 : vector<4x8xf32>
    %148 = arith.addf %144, %147 : vector<4x8xf32>
    %c52 = arith.constant 52 : index
    %c0_70 = arith.constant 0 : index
    %149 = vector.load %arg22[%c52, %c0_70] : memref<64x8xf32, #tpu.memory_space<vmem>>, vector<4x8xf32>
    tpu.vector_store %arg22[%c52, %c0_70], %148 {strides = array<i32>} : memref<64x8xf32, #tpu.memory_space<vmem>>, vector<4x8xf32>,
    %150 = vector.extract_strided_slice %43 {offsets = [0, 48], sizes = [4, 8], strides = [1, 1]} : vector<4x64xf32> to vector<4x8xf32>
    %cst_71 = arith.constant 0.466666669 : f32
    %151 = vector.broadcast %cst_71 : f32 to vector<4x8xf32>
    %152 = arith.mulf %151, %150 : vector<4x8xf32>
    %153 = vector.extract_strided_slice %43 {offsets = [0, 56], sizes = [4, 8], strides = [1, 1]} : vector<4x64xf32> to vector<4x8xf32>
    %cst_72 = arith.constant 0.533333361 : f32
    %154 = vector.broadcast %cst_72 : f32 to vector<4x8xf32>
    %155 = arith.mulf %154, %153 : vector<4x8xf32>
    %156 = arith.addf %152, %155 : vector<4x8xf32>
    %c56 = arith.constant 56 : index
    %c0_73 = arith.constant 0 : index
    %157 = vector.load %arg22[%c56, %c0_73] : memref<64x8xf32, #tpu.memory_space<vmem>>, vector<4x8xf32>
    tpu.vector_store %arg22[%c56, %c0_73], %156 {strides = array<i32>} : memref<64x8xf32, #tpu.memory_space<vmem>>, vector<4x8xf32>,
    %158 = vector.extract_strided_slice %43 {offsets = [0, 56], sizes = [4, 8], strides = [1, 1]} : vector<4x64xf32> to vector<4x8xf32>
    %c60 = arith.constant 60 : index
    %c0_74 = arith.constant 0 : index
    %159 = vector.load %arg22[%c60, %c0_74] : memref<64x8xf32, #tpu.memory_space<vmem>>, vector<4x8xf32>
    tpu.vector_store %arg22[%c60, %c0_74], %158 {strides = array<i32>} : memref<64x8xf32, #tpu.memory_space<vmem>>, vector<4x8xf32>,
    %c0_75 = arith.constant 0 : index
    %c0_76 = arith.constant 0 : index
    %160 = vector.load %arg22[%c0_75, %c0_76] : memref<64x8xf32, #tpu.memory_space<vmem>>, vector<64x8xf32>
    %c0_77 = arith.constant 0 : index
    %c0_78 = arith.constant 0 : index
    %161 = vector.load %arg3[%c0_77, %c0_78] : memref<8x16xf32, #tpu.memory_space<vmem>>, vector<8x16xf32>
    %cst_79 = arith.constant dense<0.000000e+00> : vector<64x16xf32>
    %162 = tpu.matmul %160, %161, %cst_79 {dimension_numbers = #tpu.dot_dimension_numbers<[1], [0], [0], [1], [0, 0, 1, 1], [], []>} : vector<64x8xf32>, vector<8x16xf32>, vector<64x16xf32> -> vector<64x16xf32>
    %163 = vector.extract_strided_slice %162 {offsets = [0, 0], sizes = [4, 16], strides = [1, 1]} : vector<64x16xf32> to vector<4x16xf32>
    %c4_80 = arith.constant 4 : index
    %c128_81 = arith.constant 128 : index
    %164 = vector.load %arg18[%c4_80, %c128_81] : memref<8x512xf32, #tpu.memory_space<vmem>>, vector<4x16xf32>
    tpu.vector_store %arg18[%c4_80, %c128_81], %163 {strides = array<i32>} : memref<8x512xf32, #tpu.memory_space<vmem>>, vector<4x16xf32>,
    %165 = vector.extract_strided_slice %162 {offsets = [4, 0], sizes = [4, 16], strides = [1, 1]} : vector<64x16xf32> to vector<4x16xf32>
    %c4_82 = arith.constant 4 : index
    %c144 = arith.constant 144 : index
    %166 = vector.load %arg18[%c4_82, %c144] : memref<8x512xf32, #tpu.memory_space<vmem>>, vector<4x16xf32>
    tpu.vector_store %arg18[%c4_82, %c144], %165 {strides = array<i32>} : memref<8x512xf32, #tpu.memory_space<vmem>>, vector<4x16xf32>,
    %167 = vector.extract_strided_slice %162 {offsets = [8, 0], sizes = [4, 16], strides = [1, 1]} : vector<64x16xf32> to vector<4x16xf32>
    %c4_83 = arith.constant 4 : index
    %c160 = arith.constant 160 : index
    %168 = vector.load %arg18[%c4_83, %c160] : memref<8x512xf32, #tpu.memory_space<vmem>>, vector<4x16xf32>
    tpu.vector_store %arg18[%c4_83, %c160], %167 {strides = array<i32>} : memref<8x512xf32, #tpu.memory_space<vmem>>, vector<4x16xf32>,
    %169 = vector.extract_strided_slice %162 {offsets = [12, 0], sizes = [4, 16], strides = [1, 1]} : vector<64x16xf32> to vector<4x16xf32>
    %c4_84 = arith.constant 4 : index
    %c176 = arith.constant 176 : index
    %170 = vector.load %arg18[%c4_84, %c176] : memref<8x512xf32, #tpu.memory_space<vmem>>, vector<4x16xf32>
    tpu.vector_store %arg18[%c4_84, %c176], %169 {strides = array<i32>} : memref<8x512xf32, #tpu.memory_space<vmem>>, vector<4x16xf32>,
    %171 = vector.extract_strided_slice %162 {offsets = [16, 0], sizes = [4, 16], strides = [1, 1]} : vector<64x16xf32> to vector<4x16xf32>
    %c4_85 = arith.constant 4 : index
    %c192 = arith.constant 192 : index
    %172 = vector.load %arg18[%c4_85, %c192] : memref<8x512xf32, #tpu.memory_space<vmem>>, vector<4x16xf32>
    tpu.vector_store %arg18[%c4_85, %c192], %171 {strides = array<i32>} : memref<8x512xf32, #tpu.memory_space<vmem>>, vector<4x16xf32>,
    %173 = vector.extract_strided_slice %162 {offsets = [20, 0], sizes = [4, 16], strides = [1, 1]} : vector<64x16xf32> to vector<4x16xf32>
    %c4_86 = arith.constant 4 : index
    %c208 = arith.constant 208 : index
    %174 = vector.load %arg18[%c4_86, %c208] : memref<8x512xf32, #tpu.memory_space<vmem>>, vector<4x16xf32>
    tpu.vector_store %arg18[%c4_86, %c208], %173 {strides = array<i32>} : memref<8x512xf32, #tpu.memory_space<vmem>>, vector<4x16xf32>,
    %175 = vector.extract_strided_slice %162 {offsets = [24, 0], sizes = [4, 16], strides = [1, 1]} : vector<64x16xf32> to vector<4x16xf32>
    %c4_87 = arith.constant 4 : index
    %c224 = arith.constant 224 : index
    %176 = vector.load %arg18[%c4_87, %c224] : memref<8x512xf32, #tpu.memory_space<vmem>>, vector<4x16xf32>
    tpu.vector_store %arg18[%c4_87, %c224], %175 {strides = array<i32>} : memref<8x512xf32, #tpu.memory_space<vmem>>, vector<4x16xf32>,
    %177 = vector.extract_strided_slice %162 {offsets = [28, 0], sizes = [4, 16], strides = [1, 1]} : vector<64x16xf32> to vector<4x16xf32>
    %c4_88 = arith.constant 4 : index
    %c240 = arith.constant 240 : index
    %178 = vector.load %arg18[%c4_88, %c240] : memref<8x512xf32, #tpu.memory_space<vmem>>, vector<4x16xf32>
    tpu.vector_store %arg18[%c4_88, %c240], %177 {strides = array<i32>} : memref<8x512xf32, #tpu.memory_space<vmem>>, vector<4x16xf32>,
    %179 = vector.extract_strided_slice %162 {offsets = [32, 0], sizes = [4, 16], strides = [1, 1]} : vector<64x16xf32> to vector<4x16xf32>
    %c4_89 = arith.constant 4 : index
    %c256 = arith.constant 256 : index
    %180 = vector.load %arg18[%c4_89, %c256] : memref<8x512xf32, #tpu.memory_space<vmem>>, vector<4x16xf32>
    tpu.vector_store %arg18[%c4_89, %c256], %179 {strides = array<i32>} : memref<8x512xf32, #tpu.memory_space<vmem>>, vector<4x16xf32>,
    %181 = vector.extract_strided_slice %162 {offsets = [36, 0], sizes = [4, 16], strides = [1, 1]} : vector<64x16xf32> to vector<4x16xf32>
    %c4_90 = arith.constant 4 : index
    %c272 = arith.constant 272 : index
    %182 = vector.load %arg18[%c4_90, %c272] : memref<8x512xf32, #tpu.memory_space<vmem>>, vector<4x16xf32>
    tpu.vector_store %arg18[%c4_90, %c272], %181 {strides = array<i32>} : memref<8x512xf32, #tpu.memory_space<vmem>>, vector<4x16xf32>,
    %183 = vector.extract_strided_slice %162 {offsets = [40, 0], sizes = [4, 16], strides = [1, 1]} : vector<64x16xf32> to vector<4x16xf32>
    %c4_91 = arith.constant 4 : index
    %c288 = arith.constant 288 : index
    %184 = vector.load %arg18[%c4_91, %c288] : memref<8x512xf32, #tpu.memory_space<vmem>>, vector<4x16xf32>
    tpu.vector_store %arg18[%c4_91, %c288], %183 {strides = array<i32>} : memref<8x512xf32, #tpu.memory_space<vmem>>, vector<4x16xf32>,
    %185 = vector.extract_strided_slice %162 {offsets = [44, 0], sizes = [4, 16], strides = [1, 1]} : vector<64x16xf32> to vector<4x16xf32>
    %c4_92 = arith.constant 4 : index
    %c304 = arith.constant 304 : index
    %186 = vector.load %arg18[%c4_92, %c304] : memref<8x512xf32, #tpu.memory_space<vmem>>, vector<4x16xf32>
    tpu.vector_store %arg18[%c4_92, %c304], %185 {strides = array<i32>} : memref<8x512xf32, #tpu.memory_space<vmem>>, vector<4x16xf32>,
    %187 = vector.extract_strided_slice %162 {offsets = [48, 0], sizes = [4, 16], strides = [1, 1]} : vector<64x16xf32> to vector<4x16xf32>
    %c4_93 = arith.constant 4 : index
    %c320 = arith.constant 320 : index
    %188 = vector.load %arg18[%c4_93, %c320] : memref<8x512xf32, #tpu.memory_space<vmem>>, vector<4x16xf32>
    tpu.vector_store %arg18[%c4_93, %c320], %187 {strides = array<i32>} : memref<8x512xf32, #tpu.memory_space<vmem>>, vector<4x16xf32>,
    %189 = vector.extract_strided_slice %162 {offsets = [52, 0], sizes = [4, 16], strides = [1, 1]} : vector<64x16xf32> to vector<4x16xf32>
    %c4_94 = arith.constant 4 : index
    %c336 = arith.constant 336 : index
    %190 = vector.load %arg18[%c4_94, %c336] : memref<8x512xf32, #tpu.memory_space<vmem>>, vector<4x16xf32>
    tpu.vector_store %arg18[%c4_94, %c336], %189 {strides = array<i32>} : memref<8x512xf32, #tpu.memory_space<vmem>>, vector<4x16xf32>,
    %191 = vector.extract_strided_slice %162 {offsets = [56, 0], sizes = [4, 16], strides = [1, 1]} : vector<64x16xf32> to vector<4x16xf32>
    %c4_95 = arith.constant 4 : index
    %c352 = arith.constant 352 : index
    %192 = vector.load %arg18[%c4_95, %c352] : memref<8x512xf32, #tpu.memory_space<vmem>>, vector<4x16xf32>
    tpu.vector_store %arg18[%c4_95, %c352], %191 {strides = array<i32>} : memref<8x512xf32, #tpu.memory_space<vmem>>, vector<4x16xf32>,
    %193 = vector.extract_strided_slice %162 {offsets = [60, 0], sizes = [4, 16], strides = [1, 1]} : vector<64x16xf32> to vector<4x16xf32>
    %c4_96 = arith.constant 4 : index
    %c368 = arith.constant 368 : index
    %194 = vector.load %arg18[%c4_96, %c368] : memref<8x512xf32, #tpu.memory_space<vmem>>, vector<4x16xf32>
    tpu.vector_store %arg18[%c4_96, %c368], %193 {strides = array<i32>} : memref<8x512xf32, #tpu.memory_space<vmem>>, vector<4x16xf32>,
    %195 = vector.shape_cast %21 : vector<1x256xf32> to vector<1x256xf32>
    %196 = vector.broadcast %195 : vector<1x256xf32> to vector<8x256xf32>
    %197 = vector.shape_cast %26 : vector<1x256xf32> to vector<1x256xf32>
    %198 = vector.broadcast %197 : vector<1x256xf32> to vector<8x256xf32>
    %c0_97 = arith.constant 0 : index
    %c111 = arith.constant 111 : index
    %199 = vector.load %arg18[%c0_97, %c111] : memref<8x512xf32, #tpu.memory_space<vmem>>, vector<8x256xf32>
    %200 = arith.mulf %199, %196 : vector<8x256xf32>
    %c0_98 = arith.constant 0 : index
    %c0_99 = arith.constant 0 : index
    %201 = vector.load %arg21[%c0_98, %c0_99] : memref<72x256xf32, #tpu.memory_space<vmem>>, vector<8x256xf32>
    tpu.vector_store %arg21[%c0_98, %c0_99], %200 {strides = array<i32>} : memref<72x256xf32, #tpu.memory_space<vmem>>, vector<8x256xf32>,
    %c0_100 = arith.constant 0 : index
    %c112 = arith.constant 112 : index
    %202 = vector.load %arg18[%c0_100, %c112] : memref<8x512xf32, #tpu.memory_space<vmem>>, vector<8x256xf32>
    %c8_101 = arith.constant 8 : index
    %c0_102 = arith.constant 0 : index
    %203 = vector.load %arg21[%c8_101, %c0_102] : memref<72x256xf32, #tpu.memory_space<vmem>>, vector<8x256xf32>
    tpu.vector_store %arg21[%c8_101, %c0_102], %202 {strides = array<i32>} : memref<72x256xf32, #tpu.memory_space<vmem>>, vector<8x256xf32>,
    %c0_103 = arith.constant 0 : index
    %c113 = arith.constant 113 : index
    %204 = vector.load %arg18[%c0_103, %c113] : memref<8x512xf32, #tpu.memory_space<vmem>>, vector<8x256xf32>
    %205 = arith.mulf %204, %198 : vector<8x256xf32>
    %c16_104 = arith.constant 16 : index
    %c0_105 = arith.constant 0 : index
    %206 = vector.load %arg21[%c16_104, %c0_105] : memref<72x256xf32, #tpu.memory_space<vmem>>, vector<8x256xf32>
    tpu.vector_store %arg21[%c16_104, %c0_105], %205 {strides = array<i32>} : memref<72x256xf32, #tpu.memory_space<vmem>>, vector<8x256xf32>,
    %c0_106 = arith.constant 0 : index
    %c127 = arith.constant 127 : index
    %207 = vector.load %arg18[%c0_106, %c127] : memref<8x512xf32, #tpu.memory_space<vmem>>, vector<8x256xf32>
    %208 = arith.mulf %207, %196 : vector<8x256xf32>
    %c24_107 = arith.constant 24 : index
    %c0_108 = arith.constant 0 : index
    %209 = vector.load %arg21[%c24_107, %c0_108] : memref<72x256xf32, #tpu.memory_space<vmem>>, vector<8x256xf32>
    tpu.vector_store %arg21[%c24_107, %c0_108], %208 {strides = array<i32>} : memref<72x256xf32, #tpu.memory_space<vmem>>, vector<8x256xf32>,
    %c0_109 = arith.constant 0 : index
    %c128_110 = arith.constant 128 : index
    %210 = vector.load %arg18[%c0_109, %c128_110] : memref<8x512xf32, #tpu.memory_space<vmem>>, vector<8x256xf32>
    %c32_111 = arith.constant 32 : index
    %c0_112 = arith.constant 0 : index
    %211 = vector.load %arg21[%c32_111, %c0_112] : memref<72x256xf32, #tpu.memory_space<vmem>>, vector<8x256xf32>
    tpu.vector_store %arg21[%c32_111, %c0_112], %210 {strides = array<i32>} : memref<72x256xf32, #tpu.memory_space<vmem>>, vector<8x256xf32>,
    %c0_113 = arith.constant 0 : index
    %c129 = arith.constant 129 : index
    %212 = vector.load %arg18[%c0_113, %c129] : memref<8x512xf32, #tpu.memory_space<vmem>>, vector<8x256xf32>
    %213 = arith.mulf %212, %198 : vector<8x256xf32>
    %c40_114 = arith.constant 40 : index
    %c0_115 = arith.constant 0 : index
    %214 = vector.load %arg21[%c40_114, %c0_115] : memref<72x256xf32, #tpu.memory_space<vmem>>, vector<8x256xf32>
    tpu.vector_store %arg21[%c40_114, %c0_115], %213 {strides = array<i32>} : memref<72x256xf32, #tpu.memory_space<vmem>>, vector<8x256xf32>,
    %c0_116 = arith.constant 0 : index
    %c143 = arith.constant 143 : index
    %215 = vector.load %arg18[%c0_116, %c143] : memref<8x512xf32, #tpu.memory_space<vmem>>, vector<8x256xf32>
    %216 = arith.mulf %215, %196 : vector<8x256xf32>
    %c48_117 = arith.constant 48 : index
    %c0_118 = arith.constant 0 : index
    %217 = vector.load %arg21[%c48_117, %c0_118] : memref<72x256xf32, #tpu.memory_space<vmem>>, vector<8x256xf32>
    tpu.vector_store %arg21[%c48_117, %c0_118], %216 {strides = array<i32>} : memref<72x256xf32, #tpu.memory_space<vmem>>, vector<8x256xf32>,
    %c0_119 = arith.constant 0 : index
    %c144_120 = arith.constant 144 : index
    %218 = vector.load %arg18[%c0_119, %c144_120] : memref<8x512xf32, #tpu.memory_space<vmem>>, vector<8x256xf32>
    %c56_121 = arith.constant 56 : index
    %c0_122 = arith.constant 0 : index
    %219 = vector.load %arg21[%c56_121, %c0_122] : memref<72x256xf32, #tpu.memory_space<vmem>>, vector<8x256xf32>
    tpu.vector_store %arg21[%c56_121, %c0_122], %218 {strides = array<i32>} : memref<72x256xf32, #tpu.memory_space<vmem>>, vector<8x256xf32>,
    %c0_123 = arith.constant 0 : index
    %c145 = arith.constant 145 : index
    %220 = vector.load %arg18[%c0_123, %c145] : memref<8x512xf32, #tpu.memory_space<vmem>>, vector<8x256xf32>
    %221 = arith.mulf %220, %198 : vector<8x256xf32>
    %c64 = arith.constant 64 : index
    %c0_124 = arith.constant 0 : index
    %222 = vector.load %arg21[%c64, %c0_124] : memref<72x256xf32, #tpu.memory_space<vmem>>, vector<8x256xf32>
    tpu.vector_store %arg21[%c64, %c0_124], %221 {strides = array<i32>} : memref<72x256xf32, #tpu.memory_space<vmem>>, vector<8x256xf32>,
    %c0_125 = arith.constant 0 : index
    %c0_126 = arith.constant 0 : index
    %223 = vector.load %arg21[%c0_125, %c0_126] : memref<72x256xf32, #tpu.memory_space<vmem>>, vector<72x256xf32>
    %224 = arith.truncf %223 : vector<72x256xf32> to vector<72x256xbf16>
    %c0_127 = arith.constant 0 : index
    %c0_128 = arith.constant 0 : index
    %225 = vector.load %arg4[%c0_127, %c0_128] : memref<8x72xbf16, #tpu.memory_space<vmem>>, vector<8x72xbf16>
    %cst_129 = arith.constant dense<0.000000e+00> : vector<8x256xf32>
    %226 = tpu.matmul %225, %224, %cst_129 {dimension_numbers = #tpu.dot_dimension_numbers<[1], [0], [0], [1], [0, 0, 1, 1], [], []>} : vector<8x72xbf16>, vector<72x256xbf16>, vector<8x256xf32> -> vector<8x256xf32>
    %227 = vector.shape_cast %226 : vector<8x256xf32> to vector<1x8x256xf32>
    %cst_130 = arith.constant dense<0.000000e+00> : vector<1xf32>
    %228 = vector.multi_reduction <add>, %227, %cst_130 [1, 2] : vector<1x8x256xf32> to vector<1xf32>
    %229 = vector.shape_cast %228 : vector<1xf32> to vector<1x1x1xf32>
    %230 = vector.extract %229[0, 0, 0] : f32 from vector<1x1x1xf32>
    %cst_131 = arith.constant 2.048000e+03 : f32
    %231 = arith.divf %230, %cst_131 : f32
    %232 = arith.mulf %226, %226 : vector<8x256xf32>
    %233 = vector.shape_cast %232 : vector<8x256xf32> to vector<1x8x256xf32>
    %cst_132 = arith.constant dense<0.000000e+00> : vector<1xf32>
    %234 = vector.multi_reduction <add>, %233, %cst_132 [1, 2] : vector<1x8x256xf32> to vector<1xf32>
    %235 = vector.shape_cast %234 : vector<1xf32> to vector<1x1x1xf32>
    %236 = vector.extract %235[0, 0, 0] : f32 from vector<1x1x1xf32>
    %cst_133 = arith.constant 2.048000e+03 : f32
    %237 = arith.divf %236, %cst_133 : f32
    %238 = arith.mulf %231, %231 : f32
    %239 = arith.subf %237, %238 : f32
    %cst_134 = arith.constant 0.000000e+00 : f32
    %240 = arith.maximumf %239, %cst_134 : f32
    %241 = vector.broadcast %231 : f32 to vector<8x256xf32>
    %242 = arith.subf %226, %241 : vector<8x256xf32>
    %cst_135 = arith.constant 9.99999974E-6 : f32
    %243 = arith.addf %240, %cst_135 : f32
    %244 = math.rsqrt %243 : f32
    %245 = vector.broadcast %244 : f32 to vector<8x256xf32>
    %246 = arith.mulf %242, %245 : vector<8x256xf32>
    %c0_136 = arith.constant 0 : index
    %c0_137 = arith.constant 0 : index
    %247 = vector.load %arg5[%c0_136, %c0_137] : memref<8x1xf32, #tpu.memory_space<vmem>>, vector<8x1xf32>
    %248 = vector.broadcast %247 : vector<8x1xf32> to vector<8x256xf32>
    %249 = arith.mulf %246, %248 : vector<8x256xf32>
    %c0_138 = arith.constant 0 : index
    %c0_139 = arith.constant 0 : index
    %250 = vector.load %arg6[%c0_138, %c0_139] : memref<8x1xf32, #tpu.memory_space<vmem>>, vector<8x1xf32>
    %251 = vector.broadcast %250 : vector<8x1xf32> to vector<8x256xf32>
    %252 = arith.addf %249, %251 : vector<8x256xf32>
    %cst_140 = arith.constant 5.000000e-01 : f32
    %253 = vector.broadcast %cst_140 : f32 to vector<8x256xf32>
    %254 = arith.mulf %253, %252 : vector<8x256xf32>
    %cst_141 = arith.constant 0.707106769 : f32
    %255 = vector.broadcast %cst_141 : f32 to vector<8x256xf32>
    %256 = arith.mulf %252, %255 : vector<8x256xf32>
    %257 = math.absf %256 : vector<8x256xf32>
    %cst_142 = arith.constant 0.327591091 : f32
    %258 = vector.broadcast %cst_142 : f32 to vector<8x256xf32>
    %259 = arith.mulf %258, %257 : vector<8x256xf32>
    %cst_143 = arith.constant 1.000000e+00 : f32
    %260 = vector.broadcast %cst_143 : f32 to vector<8x256xf32>
    %261 = arith.addf %260, %259 : vector<8x256xf32>
    %cst_144 = arith.constant 1.000000e+00 : f32
    %262 = vector.broadcast %cst_144 : f32 to vector<8x256xf32>
    %263 = arith.divf %262, %261 : vector<8x256xf32>
    %cst_145 = arith.constant 1.06140542 : f32
    %264 = vector.broadcast %cst_145 : f32 to vector<8x256xf32>
    %265 = arith.mulf %264, %263 : vector<8x256xf32>
    %cst_146 = arith.constant -1.45315206 : f32
    %266 = vector.broadcast %cst_146 : f32 to vector<8x256xf32>
    %267 = arith.addf %265, %266 : vector<8x256xf32>
    %268 = arith.mulf %267, %263 : vector<8x256xf32>
    %cst_147 = arith.constant 1.42141378 : f32
    %269 = vector.broadcast %cst_147 : f32 to vector<8x256xf32>
    %270 = arith.addf %268, %269 : vector<8x256xf32>
    %271 = arith.mulf %270, %263 : vector<8x256xf32>
    %cst_148 = arith.constant -0.284496725 : f32
    %272 = vector.broadcast %cst_148 : f32 to vector<8x256xf32>
    %273 = arith.addf %271, %272 : vector<8x256xf32>
    %274 = arith.mulf %273, %263 : vector<8x256xf32>
    %cst_149 = arith.constant 0.254829586 : f32
    %275 = vector.broadcast %cst_149 : f32 to vector<8x256xf32>
    %276 = arith.addf %274, %275 : vector<8x256xf32>
    %277 = arith.mulf %276, %263 : vector<8x256xf32>
    %cst_150 = arith.constant 0.000000e+00 : f32
    %278 = vector.broadcast %cst_150 : f32 to vector<8x256xf32>
    %279 = arith.subf %278, %257 : vector<8x256xf32>
    %280 = arith.mulf %279, %257 : vector<8x256xf32>
    %281 = math.exp %280 : vector<8x256xf32>
    %282 = arith.mulf %277, %281 : vector<8x256xf32>
    %cst_151 = arith.constant 1.000000e+00 : f32
    %283 = vector.broadcast %cst_151 : f32 to vector<8x256xf32>
    %284 = arith.subf %283, %282 : vector<8x256xf32>
    %cst_152 = arith.constant 0.000000e+00 : f32
    %285 = vector.broadcast %cst_152 : f32 to vector<8x256xf32>
    %286 = arith.cmpf oge, %256, %285 : vector<8x256xf32>
    %cst_153 = arith.constant 0.000000e+00 : f32
    %287 = vector.broadcast %cst_153 : f32 to vector<8x256xf32>
    %288 = arith.subf %287, %284 : vector<8x256xf32>
    %289 = arith.select %286, %284, %288 : vector<8x256xi1>, vector<8x256xf32>
    %cst_154 = arith.constant 1.000000e+00 : f32
    %290 = vector.broadcast %cst_154 : f32 to vector<8x256xf32>
    %291 = arith.addf %290, %289 : vector<8x256xf32>
    %292 = arith.mulf %254, %291 : vector<8x256xf32>
    %c0_155 = arith.constant 0 : index
    %c128_156 = arith.constant 128 : index
    %293 = vector.load %arg19[%c0_155, %c128_156] : memref<8x512xf32, #tpu.memory_space<vmem>>, vector<8x256xf32>
    tpu.vector_store %arg19[%c0_155, %c128_156], %292 {strides = array<i32>} : memref<8x512xf32, #tpu.memory_space<vmem>>, vector<8x256xf32>,
    %294 = vector.shape_cast %21 : vector<1x256xf32> to vector<1x256xf32>
    %295 = vector.broadcast %294 : vector<1x256xf32> to vector<8x256xf32>
    %296 = vector.shape_cast %26 : vector<1x256xf32> to vector<1x256xf32>
    %297 = vector.broadcast %296 : vector<1x256xf32> to vector<8x256xf32>
    %c0_157 = arith.constant 0 : index
    %c111_158 = arith.constant 111 : index
    %298 = vector.load %arg19[%c0_157, %c111_158] : memref<8x512xf32, #tpu.memory_space<vmem>>, vector<8x256xf32>
    %299 = arith.mulf %298, %295 : vector<8x256xf32>
    %c0_159 = arith.constant 0 : index
    %c0_160 = arith.constant 0 : index
    %300 = vector.load %arg21[%c0_159, %c0_160] : memref<72x256xf32, #tpu.memory_space<vmem>>, vector<8x256xf32>
    tpu.vector_store %arg21[%c0_159, %c0_160], %299 {strides = array<i32>} : memref<72x256xf32, #tpu.memory_space<vmem>>, vector<8x256xf32>,
    %c0_161 = arith.constant 0 : index
    %c112_162 = arith.constant 112 : index
    %301 = vector.load %arg19[%c0_161, %c112_162] : memref<8x512xf32, #tpu.memory_space<vmem>>, vector<8x256xf32>
    %c8_163 = arith.constant 8 : index
    %c0_164 = arith.constant 0 : index
    %302 = vector.load %arg21[%c8_163, %c0_164] : memref<72x256xf32, #tpu.memory_space<vmem>>, vector<8x256xf32>
    tpu.vector_store %arg21[%c8_163, %c0_164], %301 {strides = array<i32>} : memref<72x256xf32, #tpu.memory_space<vmem>>, vector<8x256xf32>,
    %c0_165 = arith.constant 0 : index
    %c113_166 = arith.constant 113 : index
    %303 = vector.load %arg19[%c0_165, %c113_166] : memref<8x512xf32, #tpu.memory_space<vmem>>, vector<8x256xf32>
    %304 = arith.mulf %303, %297 : vector<8x256xf32>
    %c16_167 = arith.constant 16 : index
    %c0_168 = arith.constant 0 : index
    %305 = vector.load %arg21[%c16_167, %c0_168] : memref<72x256xf32, #tpu.memory_space<vmem>>, vector<8x256xf32>
    tpu.vector_store %arg21[%c16_167, %c0_168], %304 {strides = array<i32>} : memref<72x256xf32, #tpu.memory_space<vmem>>, vector<8x256xf32>,
    %c0_169 = arith.constant 0 : index
    %c127_170 = arith.constant 127 : index
    %306 = vector.load %arg19[%c0_169, %c127_170] : memref<8x512xf32, #tpu.memory_space<vmem>>, vector<8x256xf32>
    %307 = arith.mulf %306, %295 : vector<8x256xf32>
    %c24_171 = arith.constant 24 : index
    %c0_172 = arith.constant 0 : index
    %308 = vector.load %arg21[%c24_171, %c0_172] : memref<72x256xf32, #tpu.memory_space<vmem>>, vector<8x256xf32>
    tpu.vector_store %arg21[%c24_171, %c0_172], %307 {strides = array<i32>} : memref<72x256xf32, #tpu.memory_space<vmem>>, vector<8x256xf32>,
    %c0_173 = arith.constant 0 : index
    %c128_174 = arith.constant 128 : index
    %309 = vector.load %arg19[%c0_173, %c128_174] : memref<8x512xf32, #tpu.memory_space<vmem>>, vector<8x256xf32>
    %c32_175 = arith.constant 32 : index
    %c0_176 = arith.constant 0 : index
    %310 = vector.load %arg21[%c32_175, %c0_176] : memref<72x256xf32, #tpu.memory_space<vmem>>, vector<8x256xf32>
    tpu.vector_store %arg21[%c32_175, %c0_176], %309 {strides = array<i32>} : memref<72x256xf32, #tpu.memory_space<vmem>>, vector<8x256xf32>,
    %c0_177 = arith.constant 0 : index
    %c129_178 = arith.constant 129 : index
    %311 = vector.load %arg19[%c0_177, %c129_178] : memref<8x512xf32, #tpu.memory_space<vmem>>, vector<8x256xf32>
    %312 = arith.mulf %311, %297 : vector<8x256xf32>
    %c40_179 = arith.constant 40 : index
    %c0_180 = arith.constant 0 : index
    %313 = vector.load %arg21[%c40_179, %c0_180] : memref<72x256xf32, #tpu.memory_space<vmem>>, vector<8x256xf32>
    tpu.vector_store %arg21[%c40_179, %c0_180], %312 {strides = array<i32>} : memref<72x256xf32, #tpu.memory_space<vmem>>, vector<8x256xf32>,
    %c0_181 = arith.constant 0 : index
    %c143_182 = arith.constant 143 : index
    %314 = vector.load %arg19[%c0_181, %c143_182] : memref<8x512xf32, #tpu.memory_space<vmem>>, vector<8x256xf32>
    %315 = arith.mulf %314, %295 : vector<8x256xf32>
    %c48_183 = arith.constant 48 : index
    %c0_184 = arith.constant 0 : index
    %316 = vector.load %arg21[%c48_183, %c0_184] : memref<72x256xf32, #tpu.memory_space<vmem>>, vector<8x256xf32>
    tpu.vector_store %arg21[%c48_183, %c0_184], %315 {strides = array<i32>} : memref<72x256xf32, #tpu.memory_space<vmem>>, vector<8x256xf32>,
    %c0_185 = arith.constant 0 : index
    %c144_186 = arith.constant 144 : index
    %317 = vector.load %arg19[%c0_185, %c144_186] : memref<8x512xf32, #tpu.memory_space<vmem>>, vector<8x256xf32>
    %c56_187 = arith.constant 56 : index
    %c0_188 = arith.constant 0 : index
    %318 = vector.load %arg21[%c56_187, %c0_188] : memref<72x256xf32, #tpu.memory_space<vmem>>, vector<8x256xf32>
    tpu.vector_store %arg21[%c56_187, %c0_188], %317 {strides = array<i32>} : memref<72x256xf32, #tpu.memory_space<vmem>>, vector<8x256xf32>,
    %c0_189 = arith.constant 0 : index
    %c145_190 = arith.constant 145 : index
    %319 = vector.load %arg19[%c0_189, %c145_190] : memref<8x512xf32, #tpu.memory_space<vmem>>, vector<8x256xf32>
    %320 = arith.mulf %319, %297 : vector<8x256xf32>
    %c64_191 = arith.constant 64 : index
    %c0_192 = arith.constant 0 : index
    %321 = vector.load %arg21[%c64_191, %c0_192] : memref<72x256xf32, #tpu.memory_space<vmem>>, vector<8x256xf32>
    tpu.vector_store %arg21[%c64_191, %c0_192], %320 {strides = array<i32>} : memref<72x256xf32, #tpu.memory_space<vmem>>, vector<8x256xf32>,
    %c0_193 = arith.constant 0 : index
    %c0_194 = arith.constant 0 : index
    %322 = vector.load %arg21[%c0_193, %c0_194] : memref<72x256xf32, #tpu.memory_space<vmem>>, vector<72x256xf32>
    %323 = arith.truncf %322 : vector<72x256xf32> to vector<72x256xbf16>
    %c0_195 = arith.constant 0 : index
    %c0_196 = arith.constant 0 : index
    %324 = vector.load %arg7[%c0_195, %c0_196] : memref<8x72xbf16, #tpu.memory_space<vmem>>, vector<8x72xbf16>
    %cst_197 = arith.constant dense<0.000000e+00> : vector<8x256xf32>
    %325 = tpu.matmul %324, %323, %cst_197 {dimension_numbers = #tpu.dot_dimension_numbers<[1], [0], [0], [1], [0, 0, 1, 1], [], []>} : vector<8x72xbf16>, vector<72x256xbf16>, vector<8x256xf32> -> vector<8x256xf32>
    %326 = vector.shape_cast %325 : vector<8x256xf32> to vector<1x8x256xf32>
    %cst_198 = arith.constant dense<0.000000e+00> : vector<1xf32>
    %327 = vector.multi_reduction <add>, %326, %cst_198 [1, 2] : vector<1x8x256xf32> to vector<1xf32>
    %328 = vector.shape_cast %327 : vector<1xf32> to vector<1x1x1xf32>
    %329 = vector.extract %328[0, 0, 0] : f32 from vector<1x1x1xf32>
    %cst_199 = arith.constant 2.048000e+03 : f32
    %330 = arith.divf %329, %cst_199 : f32
    %331 = arith.mulf %325, %325 : vector<8x256xf32>
    %332 = vector.shape_cast %331 : vector<8x256xf32> to vector<1x8x256xf32>
    %cst_200 = arith.constant dense<0.000000e+00> : vector<1xf32>
    %333 = vector.multi_reduction <add>, %332, %cst_200 [1, 2] : vector<1x8x256xf32> to vector<1xf32>
    %334 = vector.shape_cast %333 : vector<1xf32> to vector<1x1x1xf32>
    %335 = vector.extract %334[0, 0, 0] : f32 from vector<1x1x1xf32>
    %cst_201 = arith.constant 2.048000e+03 : f32
    %336 = arith.divf %335, %cst_201 : f32
    %337 = arith.mulf %330, %330 : f32
    %338 = arith.subf %336, %337 : f32
    %cst_202 = arith.constant 0.000000e+00 : f32
    %339 = arith.maximumf %338, %cst_202 : f32
    %340 = vector.broadcast %330 : f32 to vector<8x256xf32>
    %341 = arith.subf %325, %340 : vector<8x256xf32>
    %cst_203 = arith.constant 9.99999974E-6 : f32
    %342 = arith.addf %339, %cst_203 : f32
    %343 = math.rsqrt %342 : f32
    %344 = vector.broadcast %343 : f32 to vector<8x256xf32>
    %345 = arith.mulf %341, %344 : vector<8x256xf32>
    %c0_204 = arith.constant 0 : index
    %c0_205 = arith.constant 0 : index
    %346 = vector.load %arg8[%c0_204, %c0_205] : memref<8x1xf32, #tpu.memory_space<vmem>>, vector<8x1xf32>
    %347 = vector.broadcast %346 : vector<8x1xf32> to vector<8x256xf32>
    %348 = arith.mulf %345, %347 : vector<8x256xf32>
    %c0_206 = arith.constant 0 : index
    %c0_207 = arith.constant 0 : index
    %349 = vector.load %arg9[%c0_206, %c0_207] : memref<8x1xf32, #tpu.memory_space<vmem>>, vector<8x1xf32>
    %350 = vector.broadcast %349 : vector<8x1xf32> to vector<8x256xf32>
    %351 = arith.addf %348, %350 : vector<8x256xf32>
    %c0_208 = arith.constant 0 : index
    %c128_209 = arith.constant 128 : index
    %352 = vector.load %arg18[%c0_208, %c128_209] : memref<8x512xf32, #tpu.memory_space<vmem>>, vector<8x256xf32>
    %353 = arith.addf %352, %351 : vector<8x256xf32>
    %cst_210 = arith.constant 5.000000e-01 : f32
    %354 = vector.broadcast %cst_210 : f32 to vector<8x256xf32>
    %355 = arith.mulf %354, %353 : vector<8x256xf32>
    %cst_211 = arith.constant 0.707106769 : f32
    %356 = vector.broadcast %cst_211 : f32 to vector<8x256xf32>
    %357 = arith.mulf %353, %356 : vector<8x256xf32>
    %358 = math.absf %357 : vector<8x256xf32>
    %cst_212 = arith.constant 0.327591091 : f32
    %359 = vector.broadcast %cst_212 : f32 to vector<8x256xf32>
    %360 = arith.mulf %359, %358 : vector<8x256xf32>
    %cst_213 = arith.constant 1.000000e+00 : f32
    %361 = vector.broadcast %cst_213 : f32 to vector<8x256xf32>
    %362 = arith.addf %361, %360 : vector<8x256xf32>
    %cst_214 = arith.constant 1.000000e+00 : f32
    %363 = vector.broadcast %cst_214 : f32 to vector<8x256xf32>
    %364 = arith.divf %363, %362 : vector<8x256xf32>
    %cst_215 = arith.constant 1.06140542 : f32
    %365 = vector.broadcast %cst_215 : f32 to vector<8x256xf32>
    %366 = arith.mulf %365, %364 : vector<8x256xf32>
    %cst_216 = arith.constant -1.45315206 : f32
    %367 = vector.broadcast %cst_216 : f32 to vector<8x256xf32>
    %368 = arith.addf %366, %367 : vector<8x256xf32>
    %369 = arith.mulf %368, %364 : vector<8x256xf32>
    %cst_217 = arith.constant 1.42141378 : f32
    %370 = vector.broadcast %cst_217 : f32 to vector<8x256xf32>
    %371 = arith.addf %369, %370 : vector<8x256xf32>
    %372 = arith.mulf %371, %364 : vector<8x256xf32>
    %cst_218 = arith.constant -0.284496725 : f32
    %373 = vector.broadcast %cst_218 : f32 to vector<8x256xf32>
    %374 = arith.addf %372, %373 : vector<8x256xf32>
    %375 = arith.mulf %374, %364 : vector<8x256xf32>
    %cst_219 = arith.constant 0.254829586 : f32
    %376 = vector.broadcast %cst_219 : f32 to vector<8x256xf32>
    %377 = arith.addf %375, %376 : vector<8x256xf32>
    %378 = arith.mulf %377, %364 : vector<8x256xf32>
    %cst_220 = arith.constant 0.000000e+00 : f32
    %379 = vector.broadcast %cst_220 : f32 to vector<8x256xf32>
    %380 = arith.subf %379, %358 : vector<8x256xf32>
    %381 = arith.mulf %380, %358 : vector<8x256xf32>
    %382 = math.exp %381 : vector<8x256xf32>
    %383 = arith.mulf %378, %382 : vector<8x256xf32>
    %cst_221 = arith.constant 1.000000e+00 : f32
    %384 = vector.broadcast %cst_221 : f32 to vector<8x256xf32>
    %385 = arith.subf %384, %383 : vector<8x256xf32>
    %cst_222 = arith.constant 0.000000e+00 : f32
    %386 = vector.broadcast %cst_222 : f32 to vector<8x256xf32>
    %387 = arith.cmpf oge, %357, %386 : vector<8x256xf32>
    %cst_223 = arith.constant 0.000000e+00 : f32
    %388 = vector.broadcast %cst_223 : f32 to vector<8x256xf32>
    %389 = arith.subf %388, %385 : vector<8x256xf32>
    %390 = arith.select %387, %385, %389 : vector<8x256xi1>, vector<8x256xf32>
    %cst_224 = arith.constant 1.000000e+00 : f32
    %391 = vector.broadcast %cst_224 : f32 to vector<8x256xf32>
    %392 = arith.addf %391, %390 : vector<8x256xf32>
    %393 = arith.mulf %355, %392 : vector<8x256xf32>
    %c0_225 = arith.constant 0 : index
    %c128_226 = arith.constant 128 : index
    %394 = vector.load %arg19[%c0_225, %c128_226] : memref<8x512xf32, #tpu.memory_space<vmem>>, vector<8x256xf32>
    tpu.vector_store %arg19[%c0_225, %c128_226], %393 {strides = array<i32>} : memref<8x512xf32, #tpu.memory_space<vmem>>, vector<8x256xf32>,
    %395 = vector.shape_cast %21 : vector<1x256xf32> to vector<1x256xf32>
    %396 = vector.broadcast %395 : vector<1x256xf32> to vector<8x256xf32>
    %397 = vector.shape_cast %26 : vector<1x256xf32> to vector<1x256xf32>
    %398 = vector.broadcast %397 : vector<1x256xf32> to vector<8x256xf32>
    %c0_227 = arith.constant 0 : index
    %c111_228 = arith.constant 111 : index
    %399 = vector.load %arg19[%c0_227, %c111_228] : memref<8x512xf32, #tpu.memory_space<vmem>>, vector<8x256xf32>
    %400 = arith.mulf %399, %396 : vector<8x256xf32>
    %c0_229 = arith.constant 0 : index
    %c0_230 = arith.constant 0 : index
    %401 = vector.load %arg21[%c0_229, %c0_230] : memref<72x256xf32, #tpu.memory_space<vmem>>, vector<8x256xf32>
    tpu.vector_store %arg21[%c0_229, %c0_230], %400 {strides = array<i32>} : memref<72x256xf32, #tpu.memory_space<vmem>>, vector<8x256xf32>,
    %c0_231 = arith.constant 0 : index
    %c112_232 = arith.constant 112 : index
    %402 = vector.load %arg19[%c0_231, %c112_232] : memref<8x512xf32, #tpu.memory_space<vmem>>, vector<8x256xf32>
    %c8_233 = arith.constant 8 : index
    %c0_234 = arith.constant 0 : index
    %403 = vector.load %arg21[%c8_233, %c0_234] : memref<72x256xf32, #tpu.memory_space<vmem>>, vector<8x256xf32>
    tpu.vector_store %arg21[%c8_233, %c0_234], %402 {strides = array<i32>} : memref<72x256xf32, #tpu.memory_space<vmem>>, vector<8x256xf32>,
    %c0_235 = arith.constant 0 : index
    %c113_236 = arith.constant 113 : index
    %404 = vector.load %arg19[%c0_235, %c113_236] : memref<8x512xf32, #tpu.memory_space<vmem>>, vector<8x256xf32>
    %405 = arith.mulf %404, %398 : vector<8x256xf32>
    %c16_237 = arith.constant 16 : index
    %c0_238 = arith.constant 0 : index
    %406 = vector.load %arg21[%c16_237, %c0_238] : memref<72x256xf32, #tpu.memory_space<vmem>>, vector<8x256xf32>
    tpu.vector_store %arg21[%c16_237, %c0_238], %405 {strides = array<i32>} : memref<72x256xf32, #tpu.memory_space<vmem>>, vector<8x256xf32>,
    %c0_239 = arith.constant 0 : index
    %c127_240 = arith.constant 127 : index
    %407 = vector.load %arg19[%c0_239, %c127_240] : memref<8x512xf32, #tpu.memory_space<vmem>>, vector<8x256xf32>
    %408 = arith.mulf %407, %396 : vector<8x256xf32>
    %c24_241 = arith.constant 24 : index
    %c0_242 = arith.constant 0 : index
    %409 = vector.load %arg21[%c24_241, %c0_242] : memref<72x256xf32, #tpu.memory_space<vmem>>, vector<8x256xf32>
    tpu.vector_store %arg21[%c24_241, %c0_242], %408 {strides = array<i32>} : memref<72x256xf32, #tpu.memory_space<vmem>>, vector<8x256xf32>,
    %c0_243 = arith.constant 0 : index
    %c128_244 = arith.constant 128 : index
    %410 = vector.load %arg19[%c0_243, %c128_244] : memref<8x512xf32, #tpu.memory_space<vmem>>, vector<8x256xf32>
    %c32_245 = arith.constant 32 : index
    %c0_246 = arith.constant 0 : index
    %411 = vector.load %arg21[%c32_245, %c0_246] : memref<72x256xf32, #tpu.memory_space<vmem>>, vector<8x256xf32>
    tpu.vector_store %arg21[%c32_245, %c0_246], %410 {strides = array<i32>} : memref<72x256xf32, #tpu.memory_space<vmem>>, vector<8x256xf32>,
    %c0_247 = arith.constant 0 : index
    %c129_248 = arith.constant 129 : index
    %412 = vector.load %arg19[%c0_247, %c129_248] : memref<8x512xf32, #tpu.memory_space<vmem>>, vector<8x256xf32>
    %413 = arith.mulf %412, %398 : vector<8x256xf32>
    %c40_249 = arith.constant 40 : index
    %c0_250 = arith.constant 0 : index
    %414 = vector.load %arg21[%c40_249, %c0_250] : memref<72x256xf32, #tpu.memory_space<vmem>>, vector<8x256xf32>
    tpu.vector_store %arg21[%c40_249, %c0_250], %413 {strides = array<i32>} : memref<72x256xf32, #tpu.memory_space<vmem>>, vector<8x256xf32>,
    %c0_251 = arith.constant 0 : index
    %c143_252 = arith.constant 143 : index
    %415 = vector.load %arg19[%c0_251, %c143_252] : memref<8x512xf32, #tpu.memory_space<vmem>>, vector<8x256xf32>
    %416 = arith.mulf %415, %396 : vector<8x256xf32>
    %c48_253 = arith.constant 48 : index
    %c0_254 = arith.constant 0 : index
    %417 = vector.load %arg21[%c48_253, %c0_254] : memref<72x256xf32, #tpu.memory_space<vmem>>, vector<8x256xf32>
    tpu.vector_store %arg21[%c48_253, %c0_254], %416 {strides = array<i32>} : memref<72x256xf32, #tpu.memory_space<vmem>>, vector<8x256xf32>,
    %c0_255 = arith.constant 0 : index
    %c144_256 = arith.constant 144 : index
    %418 = vector.load %arg19[%c0_255, %c144_256] : memref<8x512xf32, #tpu.memory_space<vmem>>, vector<8x256xf32>
    %c56_257 = arith.constant 56 : index
    %c0_258 = arith.constant 0 : index
    %419 = vector.load %arg21[%c56_257, %c0_258] : memref<72x256xf32, #tpu.memory_space<vmem>>, vector<8x256xf32>
    tpu.vector_store %arg21[%c56_257, %c0_258], %418 {strides = array<i32>} : memref<72x256xf32, #tpu.memory_space<vmem>>, vector<8x256xf32>,
    %c0_259 = arith.constant 0 : index
    %c145_260 = arith.constant 145 : index
    %420 = vector.load %arg19[%c0_259, %c145_260] : memref<8x512xf32, #tpu.memory_space<vmem>>, vector<8x256xf32>
    %421 = arith.mulf %420, %398 : vector<8x256xf32>
    %c64_261 = arith.constant 64 : index
    %c0_262 = arith.constant 0 : index
    %422 = vector.load %arg21[%c64_261, %c0_262] : memref<72x256xf32, #tpu.memory_space<vmem>>, vector<8x256xf32>
    tpu.vector_store %arg21[%c64_261, %c0_262], %421 {strides = array<i32>} : memref<72x256xf32, #tpu.memory_space<vmem>>, vector<8x256xf32>,
    %c0_263 = arith.constant 0 : index
    %c0_264 = arith.constant 0 : index
    %423 = vector.load %arg21[%c0_263, %c0_264] : memref<72x256xf32, #tpu.memory_space<vmem>>, vector<72x256xf32>
    %424 = arith.truncf %423 : vector<72x256xf32> to vector<72x256xbf16>
    %c0_265 = arith.constant 0 : index
    %c0_266 = arith.constant 0 : index
    %425 = vector.load %arg10[%c0_265, %c0_266] : memref<4x72xbf16, #tpu.memory_space<vmem>>, vector<4x72xbf16>
    %cst_267 = arith.constant dense<0.000000e+00> : vector<4x256xf32>
    %426 = tpu.matmul %425, %424, %cst_267 {dimension_numbers = #tpu.dot_dimension_numbers<[1], [0], [0], [1], [0, 0, 1, 1], [], []>} : vector<4x72xbf16>, vector<72x256xbf16>, vector<4x256xf32> -> vector<4x256xf32>
    %427 = vector.shape_cast %426 : vector<4x256xf32> to vector<1x4x256xf32>
    %cst_268 = arith.constant dense<0.000000e+00> : vector<1xf32>
    %428 = vector.multi_reduction <add>, %427, %cst_268 [1, 2] : vector<1x4x256xf32> to vector<1xf32>
    %429 = vector.shape_cast %428 : vector<1xf32> to vector<1x1x1xf32>
    %430 = vector.extract %429[0, 0, 0] : f32 from vector<1x1x1xf32>
    %cst_269 = arith.constant 1.024000e+03 : f32
    %431 = arith.divf %430, %cst_269 : f32
    %432 = arith.mulf %426, %426 : vector<4x256xf32>
    %433 = vector.shape_cast %432 : vector<4x256xf32> to vector<1x4x256xf32>
    %cst_270 = arith.constant dense<0.000000e+00> : vector<1xf32>
    %434 = vector.multi_reduction <add>, %433, %cst_270 [1, 2] : vector<1x4x256xf32> to vector<1xf32>
    %435 = vector.shape_cast %434 : vector<1xf32> to vector<1x1x1xf32>
    %436 = vector.extract %435[0, 0, 0] : f32 from vector<1x1x1xf32>
    %cst_271 = arith.constant 1.024000e+03 : f32
    %437 = arith.divf %436, %cst_271 : f32
    %438 = arith.mulf %431, %431 : f32
    %439 = arith.subf %437, %438 : f32
    %cst_272 = arith.constant 0.000000e+00 : f32
    %440 = arith.maximumf %439, %cst_272 : f32
    %441 = vector.broadcast %431 : f32 to vector<4x256xf32>
    %442 = arith.subf %426, %441 : vector<4x256xf32>
    %cst_273 = arith.constant 9.99999974E-6 : f32
    %443 = arith.addf %440, %cst_273 : f32
    %444 = math.rsqrt %443 : f32
    %445 = vector.broadcast %444 : f32 to vector<4x256xf32>
    %446 = arith.mulf %442, %445 : vector<4x256xf32>
    %c0_274 = arith.constant 0 : index
    %c0_275 = arith.constant 0 : index
    %447 = vector.load %arg11[%c0_274, %c0_275] : memref<4x1xf32, #tpu.memory_space<vmem>>, vector<4x1xf32>
    %448 = vector.broadcast %447 : vector<4x1xf32> to vector<4x256xf32>
    %449 = arith.mulf %446, %448 : vector<4x256xf32>
    %c0_276 = arith.constant 0 : index
    %c0_277 = arith.constant 0 : index
    %450 = vector.load %arg12[%c0_276, %c0_277] : memref<4x1xf32, #tpu.memory_space<vmem>>, vector<4x1xf32>
    %451 = vector.broadcast %450 : vector<4x1xf32> to vector<4x256xf32>
    %452 = arith.addf %449, %451 : vector<4x256xf32>
    %cst_278 = arith.constant 5.000000e-01 : f32
    %453 = vector.broadcast %cst_278 : f32 to vector<4x256xf32>
    %454 = arith.mulf %453, %452 : vector<4x256xf32>
    %cst_279 = arith.constant 0.707106769 : f32
    %455 = vector.broadcast %cst_279 : f32 to vector<4x256xf32>
    %456 = arith.mulf %452, %455 : vector<4x256xf32>
    %457 = math.absf %456 : vector<4x256xf32>
    %cst_280 = arith.constant 0.327591091 : f32
    %458 = vector.broadcast %cst_280 : f32 to vector<4x256xf32>
    %459 = arith.mulf %458, %457 : vector<4x256xf32>
    %cst_281 = arith.constant 1.000000e+00 : f32
    %460 = vector.broadcast %cst_281 : f32 to vector<4x256xf32>
    %461 = arith.addf %460, %459 : vector<4x256xf32>
    %cst_282 = arith.constant 1.000000e+00 : f32
    %462 = vector.broadcast %cst_282 : f32 to vector<4x256xf32>
    %463 = arith.divf %462, %461 : vector<4x256xf32>
    %cst_283 = arith.constant 1.06140542 : f32
    %464 = vector.broadcast %cst_283 : f32 to vector<4x256xf32>
    %465 = arith.mulf %464, %463 : vector<4x256xf32>
    %cst_284 = arith.constant -1.45315206 : f32
    %466 = vector.broadcast %cst_284 : f32 to vector<4x256xf32>
    %467 = arith.addf %465, %466 : vector<4x256xf32>
    %468 = arith.mulf %467, %463 : vector<4x256xf32>
    %cst_285 = arith.constant 1.42141378 : f32
    %469 = vector.broadcast %cst_285 : f32 to vector<4x256xf32>
    %470 = arith.addf %468, %469 : vector<4x256xf32>
    %471 = arith.mulf %470, %463 : vector<4x256xf32>
    %cst_286 = arith.constant -0.284496725 : f32
    %472 = vector.broadcast %cst_286 : f32 to vector<4x256xf32>
    %473 = arith.addf %471, %472 : vector<4x256xf32>
    %474 = arith.mulf %473, %463 : vector<4x256xf32>
    %cst_287 = arith.constant 0.254829586 : f32
    %475 = vector.broadcast %cst_287 : f32 to vector<4x256xf32>
    %476 = arith.addf %474, %475 : vector<4x256xf32>
    %477 = arith.mulf %476, %463 : vector<4x256xf32>
    %cst_288 = arith.constant 0.000000e+00 : f32
    %478 = vector.broadcast %cst_288 : f32 to vector<4x256xf32>
    %479 = arith.subf %478, %457 : vector<4x256xf32>
    %480 = arith.mulf %479, %457 : vector<4x256xf32>
    %481 = math.exp %480 : vector<4x256xf32>
    %482 = arith.mulf %477, %481 : vector<4x256xf32>
    %cst_289 = arith.constant 1.000000e+00 : f32
    %483 = vector.broadcast %cst_289 : f32 to vector<4x256xf32>
    %484 = arith.subf %483, %482 : vector<4x256xf32>
    %cst_290 = arith.constant 0.000000e+00 : f32
    %485 = vector.broadcast %cst_290 : f32 to vector<4x256xf32>
    %486 = arith.cmpf oge, %456, %485 : vector<4x256xf32>
    %cst_291 = arith.constant 0.000000e+00 : f32
    %487 = vector.broadcast %cst_291 : f32 to vector<4x256xf32>
    %488 = arith.subf %487, %484 : vector<4x256xf32>
    %489 = arith.select %486, %484, %488 : vector<4x256xi1>, vector<4x256xf32>
    %cst_292 = arith.constant 1.000000e+00 : f32
    %490 = vector.broadcast %cst_292 : f32 to vector<4x256xf32>
    %491 = arith.addf %490, %489 : vector<4x256xf32>
    %492 = arith.mulf %454, %491 : vector<4x256xf32>
    %c0_293 = arith.constant 0 : index
    %c128_294 = arith.constant 128 : index
    %493 = vector.load %arg20[%c0_293, %c128_294] : memref<4x512xf32, #tpu.memory_space<vmem>>, vector<4x256xf32>
    tpu.vector_store %arg20[%c0_293, %c128_294], %492 {strides = array<i32>} : memref<4x512xf32, #tpu.memory_space<vmem>>, vector<4x256xf32>,
    %494 = vector.shape_cast %21 : vector<1x256xf32> to vector<1x256xf32>
    %495 = vector.broadcast %494 : vector<1x256xf32> to vector<4x256xf32>
    %496 = vector.shape_cast %26 : vector<1x256xf32> to vector<1x256xf32>
    %497 = vector.broadcast %496 : vector<1x256xf32> to vector<4x256xf32>
    %c0_295 = arith.constant 0 : index
    %c111_296 = arith.constant 111 : index
    %498 = vector.load %arg20[%c0_295, %c111_296] : memref<4x512xf32, #tpu.memory_space<vmem>>, vector<4x256xf32>
    %499 = arith.mulf %498, %495 : vector<4x256xf32>
    %c0_297 = arith.constant 0 : index
    %c0_298 = arith.constant 0 : index
    %500 = vector.load %arg21[%c0_297, %c0_298] : memref<72x256xf32, #tpu.memory_space<vmem>>, vector<4x256xf32>
    tpu.vector_store %arg21[%c0_297, %c0_298], %499 {strides = array<i32>} : memref<72x256xf32, #tpu.memory_space<vmem>>, vector<4x256xf32>,
    %c0_299 = arith.constant 0 : index
    %c112_300 = arith.constant 112 : index
    %501 = vector.load %arg20[%c0_299, %c112_300] : memref<4x512xf32, #tpu.memory_space<vmem>>, vector<4x256xf32>
    %c4_301 = arith.constant 4 : index
    %c0_302 = arith.constant 0 : index
    %502 = vector.load %arg21[%c4_301, %c0_302] : memref<72x256xf32, #tpu.memory_space<vmem>>, vector<4x256xf32>
    tpu.vector_store %arg21[%c4_301, %c0_302], %501 {strides = array<i32>} : memref<72x256xf32, #tpu.memory_space<vmem>>, vector<4x256xf32>,
    %c0_303 = arith.constant 0 : index
    %c113_304 = arith.constant 113 : index
    %503 = vector.load %arg20[%c0_303, %c113_304] : memref<4x512xf32, #tpu.memory_space<vmem>>, vector<4x256xf32>
    %504 = arith.mulf %503, %497 : vector<4x256xf32>
    %c8_305 = arith.constant 8 : index
    %c0_306 = arith.constant 0 : index
    %505 = vector.load %arg21[%c8_305, %c0_306] : memref<72x256xf32, #tpu.memory_space<vmem>>, vector<4x256xf32>
    tpu.vector_store %arg21[%c8_305, %c0_306], %504 {strides = array<i32>} : memref<72x256xf32, #tpu.memory_space<vmem>>, vector<4x256xf32>,
    %c0_307 = arith.constant 0 : index
    %c127_308 = arith.constant 127 : index
    %506 = vector.load %arg20[%c0_307, %c127_308] : memref<4x512xf32, #tpu.memory_space<vmem>>, vector<4x256xf32>
    %507 = arith.mulf %506, %495 : vector<4x256xf32>
    %c12_309 = arith.constant 12 : index
    %c0_310 = arith.constant 0 : index
    %508 = vector.load %arg21[%c12_309, %c0_310] : memref<72x256xf32, #tpu.memory_space<vmem>>, vector<4x256xf32>
    tpu.vector_store %arg21[%c12_309, %c0_310], %507 {strides = array<i32>} : memref<72x256xf32, #tpu.memory_space<vmem>>, vector<4x256xf32>,
    %c0_311 = arith.constant 0 : index
    %c128_312 = arith.constant 128 : index
    %509 = vector.load %arg20[%c0_311, %c128_312] : memref<4x512xf32, #tpu.memory_space<vmem>>, vector<4x256xf32>
    %c16_313 = arith.constant 16 : index
    %c0_314 = arith.constant 0 : index
    %510 = vector.load %arg21[%c16_313, %c0_314] : memref<72x256xf32, #tpu.memory_space<vmem>>, vector<4x256xf32>
    tpu.vector_store %arg21[%c16_313, %c0_314], %509 {strides = array<i32>} : memref<72x256xf32, #tpu.memory_space<vmem>>, vector<4x256xf32>,
    %c0_315 = arith.constant 0 : index
    %c129_316 = arith.constant 129 : index
    %511 = vector.load %arg20[%c0_315, %c129_316] : memref<4x512xf32, #tpu.memory_space<vmem>>, vector<4x256xf32>
    %512 = arith.mulf %511, %497 : vector<4x256xf32>
    %c20_317 = arith.constant 20 : index
    %c0_318 = arith.constant 0 : index
    %513 = vector.load %arg21[%c20_317, %c0_318] : memref<72x256xf32, #tpu.memory_space<vmem>>, vector<4x256xf32>
    tpu.vector_store %arg21[%c20_317, %c0_318], %512 {strides = array<i32>} : memref<72x256xf32, #tpu.memory_space<vmem>>, vector<4x256xf32>,
    %c0_319 = arith.constant 0 : index
    %c143_320 = arith.constant 143 : index
    %514 = vector.load %arg20[%c0_319, %c143_320] : memref<4x512xf32, #tpu.memory_space<vmem>>, vector<4x256xf32>
    %515 = arith.mulf %514, %495 : vector<4x256xf32>
    %c24_321 = arith.constant 24 : index
    %c0_322 = arith.constant 0 : index
    %516 = vector.load %arg21[%c24_321, %c0_322] : memref<72x256xf32, #tpu.memory_space<vmem>>, vector<4x256xf32>
    tpu.vector_store %arg21[%c24_321, %c0_322], %515 {strides = array<i32>} : memref<72x256xf32, #tpu.memory_space<vmem>>, vector<4x256xf32>,
    %c0_323 = arith.constant 0 : index
    %c144_324 = arith.constant 144 : index
    %517 = vector.load %arg20[%c0_323, %c144_324] : memref<4x512xf32, #tpu.memory_space<vmem>>, vector<4x256xf32>
    %c28_325 = arith.constant 28 : index
    %c0_326 = arith.constant 0 : index
    %518 = vector.load %arg21[%c28_325, %c0_326] : memref<72x256xf32, #tpu.memory_space<vmem>>, vector<4x256xf32>
    tpu.vector_store %arg21[%c28_325, %c0_326], %517 {strides = array<i32>} : memref<72x256xf32, #tpu.memory_space<vmem>>, vector<4x256xf32>,
    %c0_327 = arith.constant 0 : index
    %c145_328 = arith.constant 145 : index
    %519 = vector.load %arg20[%c0_327, %c145_328] : memref<4x512xf32, #tpu.memory_space<vmem>>, vector<4x256xf32>
    %520 = arith.mulf %519, %497 : vector<4x256xf32>
    %c32_329 = arith.constant 32 : index
    %c0_330 = arith.constant 0 : index
    %521 = vector.load %arg21[%c32_329, %c0_330] : memref<72x256xf32, #tpu.memory_space<vmem>>, vector<4x256xf32>
    tpu.vector_store %arg21[%c32_329, %c0_330], %520 {strides = array<i32>} : memref<72x256xf32, #tpu.memory_space<vmem>>, vector<4x256xf32>,
    %c0_331 = arith.constant 0 : index
    %c0_332 = arith.constant 0 : index
    %522 = vector.load %arg21[%c0_331, %c0_332] : memref<72x256xf32, #tpu.memory_space<vmem>>, vector<36x256xf32>
    %523 = arith.truncf %522 : vector<36x256xf32> to vector<36x256xbf16>
    %c0_333 = arith.constant 0 : index
    %c0_334 = arith.constant 0 : index
    %524 = vector.load %arg13[%c0_333, %c0_334] : memref<4x36xbf16, #tpu.memory_space<vmem>>, vector<4x36xbf16>
    %cst_335 = arith.constant dense<0.000000e+00> : vector<4x256xf32>
    %525 = tpu.matmul %524, %523, %cst_335 {dimension_numbers = #tpu.dot_dimension_numbers<[1], [0], [0], [1], [0, 0, 1, 1], [], []>} : vector<4x36xbf16>, vector<36x256xbf16>, vector<4x256xf32> -> vector<4x256xf32>
    %526 = vector.shape_cast %525 : vector<4x256xf32> to vector<1x4x256xf32>
    %cst_336 = arith.constant dense<0.000000e+00> : vector<1xf32>
    %527 = vector.multi_reduction <add>, %526, %cst_336 [1, 2] : vector<1x4x256xf32> to vector<1xf32>
    %528 = vector.shape_cast %527 : vector<1xf32> to vector<1x1x1xf32>
    %529 = vector.extract %528[0, 0, 0] : f32 from vector<1x1x1xf32>
    %cst_337 = arith.constant 1.024000e+03 : f32
    %530 = arith.divf %529, %cst_337 : f32
    %531 = arith.mulf %525, %525 : vector<4x256xf32>
    %532 = vector.shape_cast %531 : vector<4x256xf32> to vector<1x4x256xf32>
    %cst_338 = arith.constant dense<0.000000e+00> : vector<1xf32>
    %533 = vector.multi_reduction <add>, %532, %cst_338 [1, 2] : vector<1x4x256xf32> to vector<1xf32>
    %534 = vector.shape_cast %533 : vector<1xf32> to vector<1x1x1xf32>
    %535 = vector.extract %534[0, 0, 0] : f32 from vector<1x1x1xf32>
    %cst_339 = arith.constant 1.024000e+03 : f32
    %536 = arith.divf %535, %cst_339 : f32
    %537 = arith.mulf %530, %530 : f32
    %538 = arith.subf %536, %537 : f32
    %cst_340 = arith.constant 0.000000e+00 : f32
    %539 = arith.maximumf %538, %cst_340 : f32
    %540 = vector.broadcast %530 : f32 to vector<4x256xf32>
    %541 = arith.subf %525, %540 : vector<4x256xf32>
    %cst_341 = arith.constant 9.99999974E-6 : f32
    %542 = arith.addf %539, %cst_341 : f32
    %543 = math.rsqrt %542 : f32
    %544 = vector.broadcast %543 : f32 to vector<4x256xf32>
    %545 = arith.mulf %541, %544 : vector<4x256xf32>
    %c0_342 = arith.constant 0 : index
    %c0_343 = arith.constant 0 : index
    %546 = vector.load %arg14[%c0_342, %c0_343] : memref<4x1xf32, #tpu.memory_space<vmem>>, vector<4x1xf32>
    %547 = vector.broadcast %546 : vector<4x1xf32> to vector<4x256xf32>
    %548 = arith.mulf %545, %547 : vector<4x256xf32>
    %c0_344 = arith.constant 0 : index
    %c0_345 = arith.constant 0 : index
    %549 = vector.load %arg15[%c0_344, %c0_345] : memref<4x1xf32, #tpu.memory_space<vmem>>, vector<4x1xf32>
    %550 = vector.broadcast %549 : vector<4x1xf32> to vector<4x256xf32>
    %551 = arith.addf %548, %550 : vector<4x256xf32>
    %c0_346 = arith.constant 0 : index
    %c0_347 = arith.constant 0 : index
    %c0_348 = arith.constant 0 : index
    %552 = vector.load %arg16[%c0_346, %c0_347, %c0_348] : memref<1x4x1xf32, #tpu.memory_space<vmem>>, vector<1x4x1xf32>
    %553 = vector.shape_cast %552 : vector<1x4x1xf32> to vector<4x1xf32>
    %554 = vector.broadcast %553 : vector<4x1xf32> to vector<4x256xf32>
    %555 = arith.addf %551, %554 : vector<4x256xf32>
    %c0_349 = arith.constant 0 : index
    %c0_350 = arith.constant 0 : index
    %c0_351 = arith.constant 0 : index
    %556 = vector.load %arg17[%c0_349, %c0_350, %c0_351] : memref<1x4x256xf32, #tpu.memory_space<vmem>>, vector<1x4x256xf32>
    %557 = vector.shape_cast %556 : vector<1x4x256xf32> to vector<4x256xf32>
    %558 = vector.shape_cast %555 : vector<4x256xf32> to vector<1x4x256xf32>
    tpu.vector_store %arg17[%c0_349, %c0_350, %c0_351], %558 {strides = array<i32>} : memref<1x4x256xf32, #tpu.memory_space<vmem>>, vector<1x4x256xf32>,
    return
  }
  func.func @transform_0(%arg0: i32) -> (i32, i32, i32) {
    %c0_i32 = arith.constant 0 : i32
    %c0_i32_0 = arith.constant 0 : i32
    %c0_i32_1 = arith.constant 0 : i32
    return %arg0, %c0_i32, %c0_i32_0 : i32, i32, i32
  }
  func.func @transform_1(%arg0: i32) -> (i32, i32, i32) {
    %c0_i32 = arith.constant 0 : i32
    %c0_i32_0 = arith.constant 0 : i32
    %c0_i32_1 = arith.constant 0 : i32
    return %arg0, %c0_i32, %c0_i32_0 : i32, i32, i32
  }
  func.func @transform_2(%arg0: i32) -> (i32, i32) {
    %c0_i32 = arith.constant 0 : i32
    %c0_i32_0 = arith.constant 0 : i32
    %c0_i32_1 = arith.constant 0 : i32
    return %c0_i32, %c0_i32_0 : i32, i32
  }
  func.func @transform_3(%arg0: i32) -> (i32, i32) {
    %c0_i32 = arith.constant 0 : i32
    %c0_i32_0 = arith.constant 0 : i32
    %c0_i32_1 = arith.constant 0 : i32
    return %c0_i32, %c0_i32_0 : i32, i32
  }
  func.func @transform_4(%arg0: i32) -> (i32, i32) {
    %c0_i32 = arith.constant 0 : i32
    %c0_i32_0 = arith.constant 0 : i32
    %c0_i32_1 = arith.constant 0 : i32
    return %c0_i32, %c0_i32_0 : i32, i32
  }
  func.func @transform_5(%arg0: i32) -> (i32, i32) {
    %c0_i32 = arith.constant 0 : i32
    %c0_i32_0 = arith.constant 0 : i32
    %c0_i32_1 = arith.constant 0 : i32
    return %c0_i32, %c0_i32_0 : i32, i32
  }
  func.func @transform_6(%arg0: i32) -> (i32, i32) {
    %c0_i32 = arith.constant 0 : i32
    %c0_i32_0 = arith.constant 0 : i32
    %c0_i32_1 = arith.constant 0 : i32
    return %c0_i32, %c0_i32_0 : i32, i32
  }
  func.func @transform_7(%arg0: i32) -> (i32, i32) {
    %c0_i32 = arith.constant 0 : i32
    %c0_i32_0 = arith.constant 0 : i32
    %c0_i32_1 = arith.constant 0 : i32
    return %c0_i32, %c0_i32_0 : i32, i32
  }
  func.func @transform_8(%arg0: i32) -> (i32, i32) {
    %c0_i32 = arith.constant 0 : i32
    %c0_i32_0 = arith.constant 0 : i32
    %c0_i32_1 = arith.constant 0 : i32
    return %c0_i32, %c0_i32_0 : i32, i32
  }
  func.func @transform_9(%arg0: i32) -> (i32, i32) {
    %c0_i32 = arith.constant 0 : i32
    %c0_i32_0 = arith.constant 0 : i32
    %c0_i32_1 = arith.constant 0 : i32
    return %c0_i32, %c0_i32_0 : i32, i32
  }
  func.func @transform_10(%arg0: i32) -> (i32, i32) {
    %c0_i32 = arith.constant 0 : i32
    %c0_i32_0 = arith.constant 0 : i32
    %c0_i32_1 = arith.constant 0 : i32
    return %c0_i32, %c0_i32_0 : i32, i32
  }
  func.func @transform_11(%arg0: i32) -> (i32, i32) {
    %c0_i32 = arith.constant 0 : i32
    %c0_i32_0 = arith.constant 0 : i32
    %c0_i32_1 = arith.constant 0 : i32
    return %c0_i32, %c0_i32_0 : i32, i32
  }
  func.func @transform_12(%arg0: i32) -> (i32, i32) {
    %c0_i32 = arith.constant 0 : i32
    %c0_i32_0 = arith.constant 0 : i32
    %c0_i32_1 = arith.constant 0 : i32
    return %c0_i32, %c0_i32_0 : i32, i32
  }
  func.func @transform_13(%arg0: i32) -> (i32, i32) {
    %c0_i32 = arith.constant 0 : i32
    %c0_i32_0 = arith.constant 0 : i32
    %c0_i32_1 = arith.constant 0 : i32
    return %c0_i32, %c0_i32_0 : i32, i32
  }
  func.func @transform_14(%arg0: i32) -> (i32, i32) {
    %c0_i32 = arith.constant 0 : i32
    %c0_i32_0 = arith.constant 0 : i32
    %c0_i32_1 = arith.constant 0 : i32
    return %c0_i32, %c0_i32_0 : i32, i32
  }
  func.func @transform_15(%arg0: i32) -> (i32, i32, i32) {
    %c0_i32 = arith.constant 0 : i32
    %c0_i32_0 = arith.constant 0 : i32
    %c0_i32_1 = arith.constant 0 : i32
    return %arg0, %c0_i32, %c0_i32_0 : i32, i32, i32
  }
  func.func @transform_16(%arg0: i32) -> (i32, i32, i32) {
    %c0_i32 = arith.constant 0 : i32
    %c0_i32_0 = arith.constant 0 : i32
    %c0_i32_1 = arith.constant 0 : i32
    return %arg0, %c0_i32, %c0_i32_0 : i32, i32, i32
  }
}

</mosaic_0001>

<bundles_post_ra>
// kernel: up_forward.1
= control target key start
LH: loop header
LB: loop body
LE: loop exit
PB: predicated region body
PF: predicated region fallthrough
CT: control target
= control target key end

     0   :  { %s2835_s21 = smov 0   ;;  %s3426_s0 = inlined_call_operand.vmem [shape: f32[2,4,64], index: 0, kind: input, shape index: {}]   ;;  %s3427_s1 = inlined_call_operand.vmem [shape: f32[2,4,256], index: 1, kind: input, shape index: {}]   ;;  %s3428_s2 = inlined_call_operand.vmem [shape: f32[8,16], index: 2, kind: input, shape index: {}]   ;;  %s3429_s3 = inlined_call_operand.vmem [shape: bf16[8,72], index: 3, kind: input, shape index: {}]   ;;  %s3430_s4 = inlined_call_operand.vmem [shape: f32[8,1], index: 4, kind: input, shape index: {}]   ;;  %s3431_s5 = inlined_call_operand.vmem [shape: f32[8,1], index: 5, kind: input, shape index: {}]   ;;  %s3432_s6 = inlined_call_operand.vmem [shape: bf16[8,72], index: 6, kind: input, shape index: {}]   ;;  %s3433_s7 = inlined_call_operand.vmem [shape: f32[8,1], index: 7, kind: input, shape index: {}]   ;;  %s3434_s8 = inlined_call_operand.vmem [shape: f32[8,1], index: 8, kind: input, shape index: {}]   ;;  %s3435_s9 = inlined_call_operand.vmem [shape: bf16[4,72], index: 9, kind: input, shape index: {}]   ;;  %s3436_s10 = inlined_call_operand.vmem [shape: f32[4,1], index: 10, kind: input, shape index: {}]   ;;  %s3437_s11 = inlined_call_operand.vmem [shape: f32[4,1], index: 11, kind: input, shape index: {}]   ;;  %s3438_s12 = inlined_call_operand.vmem [shape: bf16[4,36], index: 12, kind: input, shape index: {}]   ;;  %s3439_s13 = inlined_call_operand.vmem [shape: f32[4,1], index: 13, kind: input, shape index: {}]   ;;  %s3440_s14 = inlined_call_operand.vmem [shape: f32[4,1], index: 14, kind: input, shape index: {}]   ;;  %s3441_s15 = inlined_call_operand.vmem [shape: f32[2,4,1], index: 15, kind: input, shape index: {}]   ;;  %s3442_s16 = inlined_call_operand.vmem [shape: f32[2,4,256], index: 16, kind: output, shape index: {}]  }
   0x1   :  { %3461 = sst [smem:[#allocation7_spill]] %s3426_s0 }
   0x2   :  { %3462 = sst [smem:[#allocation8_spill]] %s3427_s1 }
   0x3   :  { %3463 = sst [smem:[#allocation9_spill]] %s3428_s2 }
   0x4   :  { %3464 = sst [smem:[#allocation10_spill]] %s3429_s3 }
   0x5 LB: > { %s2546_s22 = sadd.s32 4294967295, %s2728_s21   ;;  %p2550_p0 = scmp.ge.s32.totalorder %s2728_s21, 1  ;;  %s2728_s21 = sphi %s2835_s21, %s26_s21  }
   0x6   : > { %p480_p1 = scmp.lt.s32.totalorder %s2728_s21, 3 }
   0x8   : > { %p481_p2 = pnand %p2550_p0, %p480_p1 }
   0x9   : > { %p538_p3 = scmp.lt.s32.totalorder (!%p481_p2), %s2546_s22, 1  ;;  %s3465_s26 = sld [smem:[#allocation7_spill]] (!%p481_p2) }
   0xa   : > { %484 = sbr.rel (%p481_p2) target bundleno = 3352 (0xd18), region = 84  ;;  %s2730_s28 = smov (!%p481_p2), 120  }
   0xb   : > { %s3466_s2 = sld [smem:[#allocation9_spill]] (!%p481_p2)  ;;  %s3459_s0 = smov (!%p481_p2), 112  }
   0xc   : > { %s2732_s17 = smov (!%p481_p2), 104   ;;  %s2733_s18 = smov (!%p481_p2), 96  }
   0xd   : > { %s2734_s19 = smov (!%p481_p2), 88   ;;  %s2735_s20 = smov (!%p481_p2), 80  }
   0xe   : > { %s2736_s24 = smov (!%p481_p2), 72   ;;  %s2738_s25 = smov (!%p481_p2), 48  }
   0xf   : > { %s3480_s22 = smov (!%p538_p3, %s2546_s22), 1  ;;  %vm605_vm0 = vcmask 60416   ;;  %vm767_vm1 = vcmask 64512   ;;  %vm900_vm2 = vcmask 130052   ;;  %s3467_s1 = sld [smem:[#allocation8_spill]]  ;;  %vm905_vm7 = vcmask 261252  }
  0x10   : > { %s3444_s23 = sshll.u32 %s3480_s22, 2  ;;  %s3455_s29 = smov 113   ;;  %vm912_vm8 = vcmask 392452   ;;  %vm917_vm9 = vcmask 523652   ;;  %vm924_vm10 = vcmask 654852   ;;  %vm929_vm11 = vcmask 786052  }
  0x11   : > { %s541_s27 = scalar_lea.vmem %s3465_s26, %s3444_s23  ;;  %v766_v15 = vld [vmem:[%s3466_s2] sm:$0xff]  ;;  %s3457_s26 = smov 16   ;;  %vm936_vm12 = vcmask 917252   ;;  %vm941_vm13 = vcmask 1048452   ;;  %vm1007_vm14 = vcmask 138240   ;;  %vm1059_vm15 = vcmask 121856  }
  0x12   : > { %v2851_v0 = vld [vmem:[%s541_s27] sm:$0xf]  ;;  %2586 = vmatprep.subr.mxu0 %v766_v15  ;;  %s2740_s27 = smov 32   ;;  %s3451_s30 = smov 111  }
  0x13   : > { %v2854_v1 = vmul.f32 0.4, %v2851_v0  ;;  %v648_v2 = vmul.f32 0.33333334, %v2851_v0  ;;  %v636_v3 = vmul.f32 0.8666667, %v2851_v0  ;;  %2587 = vmatpush3.msra.mxu0 %v766_v15 }
  0x14   : > { %v660_v4 = vmul.f32 0.8, %v2851_v0  ;;  %v672_v5 = vmul.f32 0.26666668, %v2851_v0  ;;  %v671_v6 = vmul.f32 0.73333335, %v2851_v0 }
  0x15   : > { %626 = vrot.lane.b32.xlu0 %v2854_v1, %s2730_s28  ;;  %650 = vrot.lane.b32.xlu1 %v648_v2, %s2730_s28  ;;  %v659_v7 = vmul.f32 0.2, %v2851_v0  ;;  %v647_v8 = vmul.f32 0.6666667, %v2851_v0  ;;  %v635_v9 = vmul.f32 0.13333334, %v2851_v0 }
  0x16   : > { %v623_v10 = vmul.f32 0.6, %v2851_v0  ;;  %606 = vst.msk [vmem:[#allocation6] sm:$0xf] %vm605_vm0, %v2851_v0  ;;  %v615_v11 = vmul.f32 0.06666667, %v2851_v0 }
  0x17   : > { %v607_v12 = vmul.f32 0.53333336, %v2851_v0  ;;  %v608_v13 = vmul.f32 0.46666667, %v2851_v0  ;;  %v616_v14 = vmul.f32 0.93333334, %v2851_v0 }
  0x18   : > { %s3468_s3 = sld [smem:[#allocation10_spill]] }
  0x19   : > { %638 = vrot.lane.b32.xlu0 %v636_v3, %s2730_s28  ;;  %662 = vrot.lane.b32.xlu1 %v660_v4, %s2730_s28 }
  0x1d   : > { %674 = vrot.lane.b32.xlu0 %v672_v5, %s2730_s28  ;;  %684 = vrot.lane.b32.xlu1 %v671_v6, %s2730_s28 }
  0x21   : > { %694 = vrot.lane.b32.xlu0 %v659_v7, %s2730_s28  ;;  %704 = vrot.lane.b32.xlu1 %v647_v8, %s2730_s28 }
  0x25   : > { %714 = vrot.lane.b32.xlu0 %v635_v9, %s2730_s28  ;;  %724 = vrot.lane.b32.xlu1 %v623_v10, %s2730_s28 }
  0x29   : > { %734 = vrot.lane.b32.xlu0 %v615_v11, %s2730_s28  ;;  %744 = vrot.lane.b32.xlu1 %v607_v12, %s2730_s28 }
  0x2d   : > { %610 = vrot.lane.b32.xlu0 %v608_v13, %s2730_s28  ;;  %618 = vrot.lane.b32.xlu1 %v616_v14, %s2730_s28 }
  0x87   : > { %v627_v16 = vpop.permute.xlu0 %626  ;;  %v651_v17 = vpop.permute.xlu1 %650 }
  0x88   : > { %v629_v18 = vadd.f32 %v627_v16, %v623_v10  ;;  %v653_v19 = vadd.f32 %v651_v17, %v647_v8 }
  0x8a   : > { %631 = vrot.lane.b32.xlu0 %v629_v18, %s2730_s28 }
  0x8b   : > { %v639_v20 = vpop.permute.xlu0 %638  ;;  %v663_v21 = vpop.permute.xlu1 %662 }
  0x8c   : > { %v641_v22 = vadd.f32 %v639_v20, %v635_v9  ;;  %v665_v23 = vadd.f32 %v663_v21, %v659_v7 }
  0x8e   : > { %655 = vrot.lane.b32.xlu0 %v653_v19, %s3459_s0  ;;  %643 = vrot.lane.b32.xlu1 %v641_v22, %s2730_s28  ;;  %s3443_s28 = sshll.u32 %s3480_s22, 3 }
  0x8f   : > { %v675_v24 = vpop.permute.xlu0 %674  ;;  %v685_v25 = vpop.permute.xlu1 %684 }
  0x90   : > { %v677_v26 = vadd.f32 %v675_v24, %v671_v6  ;;  %v687_v27 = vadd.f32 %v685_v25, %v672_v5  ;;  %v557_v5 = vlaneseq }
  0x92   : > { %679 = vrot.lane.b32.xlu0 %v677_v26, %s2732_s17  ;;  %667 = vrot.lane.b32.xlu1 %v665_v23, %s3459_s0  ;;  %v558_v7 = vand.u32 127, %v557_v5 }
  0x93   : > { %v695_v28 = vpop.permute.xlu0 %694  ;;  %v705_v29 = vpop.permute.xlu1 %704 }
  0x94   : > { %v697_v30 = vadd.f32 %v695_v28, %v660_v4  ;;  %v707_v31 = vadd.f32 %v705_v29, %v648_v2  ;;  %v559_v9 = vadd.s32 128, %v558_v7 }
  0x96   : > { %699 = vrot.lane.b32.xlu0 %v697_v30, %s2733_s18  ;;  %689 = vrot.lane.b32.xlu1 %v687_v27, %s2732_s17  ;;  %s546_s17 = scalar_lea.vmem %s3467_s1, %s3443_s28 }
  0x97   : > { %v715_v32 = vpop.permute.xlu0 %714  ;;  %v725_v33 = vpop.permute.xlu1 %724  ;;  %v598_v10 = vld [vmem:[%s546_s17] sm:$0xff] }
  0x98   : > { %v717_v34 = vadd.f32 %v715_v32, %v636_v3  ;;  %v727_v35 = vadd.f32 %v725_v33, %v2854_v1  ;;  %v2737_v1 = vmov 0.0   ;;  %602 = vst [vmem:[#allocation2 + $0x8] sm:$0xf] %v598_v10  ;;  %v600_v24 = vcombine.high %v598_v10, %v598_v10 }
  0x99   : > { %592 = vst [vmem:[#allocation2] sm:$0xff] %v2737_v1  ;;  %596 = vst [vmem:[#allocation4] sm:$0xf] %v2737_v1 }
  0x9a   : > { %719 = vrot.lane.b32.xlu0 %v717_v34, %s2734_s19  ;;  %709 = vrot.lane.b32.xlu1 %v707_v31, %s2733_s18  ;;  %597 = vst [vmem:[#allocation4 + $0xc] sm:$0xf] %v2737_v1  ;;  %603 = vst [vmem:[#allocation2 + $0x10] sm:$0xf] %v600_v24 }
  0x9b   : > { %v735_v36 = vpop.permute.xlu0 %734  ;;  %v745_v37 = vpop.permute.xlu1 %744 }
  0x9c   : > { %v737_v38 = vadd.f32 %v735_v36, %v616_v14  ;;  %v747_v39 = vadd.f32 %v745_v37, %v608_v13  ;;  %v564_v13 = vand.u32 15, %v558_v7  ;;  %v571_v14 = vand.u32 15, %v559_v9 }
  0x9e   : > { %739 = vrot.lane.b32.xlu0 %v737_v38, %s2735_s20  ;;  %729 = vrot.lane.b32.xlu1 %v727_v35, %s2734_s19  ;;  %vm588_vm3 = vcmp.ne.s32.totalorder %v564_v13, 15  ;;  %vm589_vm4 = vcmp.ne.s32.totalorder %v571_v14, 15  ;;  %s2741_s19 = smov 64   ;;  %vm584_vm5 = vcmp.ne.s32.totalorder %v564_v13, 0  ;;  %vm585_vm6 = vcmp.ne.s32.totalorder %v571_v14, 0 }
  0x9f   : > { %v611_v40 = vpop.permute.xlu0 %610  ;;  %v619_v41 = vpop.permute.xlu1 %618  ;;  %v2938_v19 = vsel %vm588_vm3, 1.0, %v2737_v1  ;;  %v2941_v20 = vsel %vm589_vm4, 1.0, %v2737_v1  ;;  %v2949_v26 = vsel %vm584_vm5, 1.0, %v2737_v1  ;;  %v2952_v27 = vsel %vm585_vm6, 1.0, %v2737_v1 }
  0xa0   : > { %v613_v42 = vadd.f32 %v611_v40, %v607_v12  ;;  %v621_v43 = vadd.f32 %v619_v41, %v615_v11  ;;  %v2652_v23 = vpack.i.bf16 %v2941_v20, %v2938_v19  ;;  %v2672_v29 = vpack.i.bf16 %v2952_v27, %v2949_v26 }
  0xa1   : > { %vm990_vm3 = vcmask 908288   ;;  %vm1240_vm4 = vcmask 1043456   ;;  %vm1171_vm5 = vcmask 916480   ;;  %vm1026_vm6 = vcmask 130048  }
  0xa2   : > { %754 = vrot.lane.b32.xlu0 %v2851_v0, %s2736_s24  ;;  %749 = vrot.lane.b32.xlu1 %v747_v39, %s2735_s20  ;;  %614 = vst.msk [vmem:[#allocation6 + $0x4] sm:$0xf] %vm605_vm0, %v613_v42  ;;  %622 = vst.msk [vmem:[#allocation6 + $0x8] sm:$0xf] %vm605_vm0, %v621_v43  ;;  %s3445_s24 = smov 17  }
  0xa9   : > { %v758_v44 = vld [vmem:[#allocation6] sm:$0xff] }
  0xaa   : > { %2588 = vmatprep.mubr.msk.f32.mxu0 %vm767_vm1, %v758_v44 }
  0xfc   : > { %v632_v45 = vpop.permute.xlu0 %631 }
  0xfd   : > { %634 = vst.msk [vmem:[#allocation6 + $0xc] sm:$0xf] %vm605_vm0, %v632_v45 }
 0x100   : > { %v656_v46 = vpop.permute.xlu0 %655  ;;  %v644_v47 = vpop.permute.xlu1 %643 }
 0x101   : > { %658 = vst.msk [vmem:[#allocation6 + $0x14] sm:$0xf] %vm605_vm0, %v656_v46  ;;  %646 = vst.msk [vmem:[#allocation6 + $0x10] sm:$0xf] %vm605_vm0, %v644_v47 }
 0x104   : > { %v680_v48 = vpop.permute.xlu0 %679  ;;  %v668_v49 = vpop.permute.xlu1 %667  ;;  %v759_v50 = vld [vmem:[#allocation6 + $0x8] sm:$0xff] }
 0x105   : > { %682 = vst.msk [vmem:[#allocation6 + $0x1c] sm:$0xf] %vm605_vm0, %v680_v48  ;;  %670 = vst.msk [vmem:[#allocation6 + $0x18] sm:$0xf] %vm605_vm0, %v668_v49  ;;  %2589 = vmatmul.mubr.msk.f32.vlgmr.msra.gmra.mxu0 %vm767_vm1, %v759_v50 }
 0x108   : > { %v700_v51 = vpop.permute.xlu0 %699  ;;  %v690_v52 = vpop.permute.xlu1 %689  ;;  %v760_v53 = vld [vmem:[#allocation6 + $0x10] sm:$0xff] }
 0x109   : > { %702 = vst.msk [vmem:[#allocation6 + $0x24] sm:$0xf] %vm605_vm0, %v700_v51  ;;  %692 = vst.msk [vmem:[#allocation6 + $0x20] sm:$0xf] %vm605_vm0, %v690_v52  ;;  %2591 = vmatprep.mubr.msk.f32.mxu0 %vm767_vm1, %v760_v53 }
 0x10c   : > { %v720_v54 = vpop.permute.xlu0 %719  ;;  %v710_v55 = vpop.permute.xlu1 %709  ;;  %v761_v56 = vld [vmem:[#allocation6 + $0x18] sm:$0xff] }
 0x10d   : > { %722 = vst.msk [vmem:[#allocation6 + $0x2c] sm:$0xf] %vm605_vm0, %v720_v54  ;;  %712 = vst.msk [vmem:[#allocation6 + $0x28] sm:$0xf] %vm605_vm0, %v710_v55  ;;  %2592 = vmatmul.mubr.msk.f32.gmra.mxu0 %vm767_vm1, %v761_v56 }
 0x110   : > { %v740_v57 = vpop.permute.xlu0 %739  ;;  %v730_v58 = vpop.permute.xlu1 %729  ;;  %v762_v59 = vld [vmem:[#allocation6 + $0x20] sm:$0xff] }
 0x111   : > { %742 = vst.msk [vmem:[#allocation6 + $0x34] sm:$0xf] %vm605_vm0, %v740_v57  ;;  %732 = vst.msk [vmem:[#allocation6 + $0x30] sm:$0xf] %vm605_vm0, %v730_v58  ;;  %2594 = vmatprep.mubr.msk.f32.mxu0 %vm767_vm1, %v762_v59 }
 0x114   : > { %v755_v60 = vpop.permute.xlu0 %754  ;;  %v750_v61 = vpop.permute.xlu1 %749  ;;  %v763_v62 = vld [vmem:[#allocation6 + $0x28] sm:$0xff] }
 0x115   : > { %757 = vst.msk [vmem:[#allocation6 + $0x3c] sm:$0xf] %vm605_vm0, %v755_v60  ;;  %752 = vst.msk [vmem:[#allocation6 + $0x38] sm:$0xf] %vm605_vm0, %v750_v61  ;;  %2595 = vmatmul.mubr.msk.f32.gmra.mxu0 %vm767_vm1, %v763_v62  ;;  %vm1090_vm0 = vcmask 7168  }
 0x118   : > { %v764_v63 = vld [vmem:[#allocation6 + $0x30] sm:$0xff] }
 0x119   : > { %2597 = vmatprep.mubr.msk.f32.mxu0 %vm767_vm1, %v764_v63 }
 0x11c   : > { %v765_v0 = vld [vmem:[#allocation6 + $0x38] sm:$0xff] }
 0x11d   : > { %2598 = vmatmul.mubr.msk.f32.gmra.mxu0 %vm767_vm1, %v765_v0  ;;  %vm1042_vm1 = vcmask 924672  }
 0x1c5   : > { %v2590_v2 = vpop.f32.mrf.mxu0 }
 0x1c6   : > { %914 = vrot.lane.b32.xlu1 %v2590_v2, %s2738_s25  ;;  %v908_v6 = vrot.slane %v2590_v2, 4 }
 0x1c7   : > { %v858_v3 = vpop.f32.mrf.mxu0 }
 0x1c8   : > { %v898_v4 = vrot.slane %v858_v3, 4 }
 0x1ca   : > { %901 = vst.msk [vmem:[#allocation2 + $0x8] sm:$0xf0] %vm900_vm2, %v898_v4  ;;  %902 = vrot.lane.b32.xlu1 %v858_v3, %s3457_s26 }
 0x1cd   : > { %v2593_v8 = vpop.f32.mrf.mxu0 }
 0x1ce   : > { %909 = vrot.lane.b32.xlu1 %v908_v6, %s2740_s27  ;;  %v932_v12 = vrot.slane %v2593_v8, 4 }
 0x1cf   : > { %v868_v11 = vpop.f32.mrf.mxu0 }
 0x1d0   : > { %v920_v17 = vrot.slane %v868_v11, 4 }
 0x1d2   : > { %926 = vrot.lane.b32.xlu1 %v868_v11, %s2735_s20 }
 0x1d5   : > { %v2596_v15 = vpop.f32.mrf.mxu0 }
 0x1d6   : > { %933 = vrot.lane.b32.xlu1 %v932_v12, %s2733_s18  ;;  %957 = vrot.lane.b32.xlu0 %v2596_v15, %s2738_s25  ;;  %v952_v21 = vrot.slane %v2596_v15, 4  ;;  %s3447_s25 = smov 1  }
 0x1d7   : > { %v878_v16 = vpop.f32.mrf.mxu0 }
 0x1d8   : > { %v944_v18 = vrot.slane %v878_v16, 4 }
 0x1da   : > { %946 = vst.msk [vmem:[#allocation2 + $0x10] sm:$0xf0] %vm900_vm2, %v944_v18  ;;  %921 = vrot.lane.b32.xlu1 %v920_v17, %s2741_s19  ;;  %947 = vrot.lane.b32.xlu0 %v878_v16, %s3457_s26  ;;  %vm1073_vm2 = vcmask 1039360  }
 0x1dd   : > { %v2599_v22 = vpop.f32.mrf.mxu0 }
 0x1de   : > { %938 = vrot.lane.b32.xlu1 %v2593_v8, %s3459_s0  ;;  %953 = vrot.lane.b32.xlu0 %v952_v21, %s2740_s27  ;;  %v972_v28 = vrot.slane %v2599_v22, 4  ;;  %s3453_s27 = smov 127  }
 0x1df   : > { %v888_v25 = vpop.f32.mrf.mxu0 }
 0x1e0   : > { %v962_v30 = vrot.slane %v888_v25, 4 }
 0x1e2   : > { %2653 = vrot.lane.b32.xlu1 %v2652_v23, %s3445_s24  ;;  %967 = vrot.lane.b32.xlu0 %v888_v25, %s2735_s20  ;;  %s3449_s20 = smov 15   ;;  %v2748_v25 = vmov 0  }
 0x1e3   : > { %1279 = vmatprep.mubr.bf16.mxu1 %v2748_v25  ;;  %2683 = vset.pattern.permute.xlu1 %v2748_v25 }
 0x1e4   : > { %2682 = vset.pattern.permute.xlu0 %v2748_v25  ;;  %1637 = vmatprep.mubr.bf16.mxu0 %v2748_v25 }
 0x1e6   : > { %2663 = vrot.lane.b32.xlu1 %v2652_v23, %s3447_s25  ;;  %973 = vrot.lane.b32.xlu0 %v972_v28, %s2733_s18 }
 0x1ea   : > { %2673 = vrot.lane.b32.xlu1 %v2672_v29, %s3453_s27  ;;  %963 = vrot.lane.b32.xlu0 %v962_v30, %s2741_s19 }
 0x1ee   : > { %977 = vrot.lane.b32.xlu0 %v2599_v22, %s3459_s0 }
 0x1f2   : > { %2658 = vrot.lane.b32.xlu0 %v2672_v29, %s3449_s20 }
 0x1f6   : > { %2668 = vrot.lane.b32.xlu0 %v2652_v23, %s3455_s29 }
 0x1fa   : > { %2678 = vrot.lane.b32.xlu0 %v2672_v29, %s3451_s30 }
 0x238   : > { %v915_v31 = vpop.permute.xlu1 %914 }
 0x23c   : > { %v903_v32 = vpop.permute.xlu1 %902 }
 0x23d   : > { %906 = vst.msk [vmem:[#allocation2 + $0x8] sm:$0xf0] %vm905_vm7, %v903_v32 }
 0x240   : > { %v910_v33 = vpop.permute.xlu1 %909 }
 0x241   : > { %913 = vst.msk [vmem:[#allocation2 + $0x8] sm:$0xf0] %vm912_vm8, %v910_v33 }
 0x242   : > { %918 = vst.msk [vmem:[#allocation2 + $0x8] sm:$0xf0] %vm917_vm9, %v915_v31 }
 0x244   : > { %v927_v34 = vpop.permute.xlu1 %926 }
 0x248   : > { %v934_v35 = vpop.permute.xlu1 %933  ;;  %v958_v36 = vpop.permute.xlu0 %957 }
 0x24c   : > { %v922_v37 = vpop.permute.xlu1 %921  ;;  %v948_v38 = vpop.permute.xlu0 %947 }
 0x24d   : > { %925 = vst.msk [vmem:[#allocation2 + $0x8] sm:$0xf0] %vm924_vm10, %v922_v37 }
 0x24e   : > { %950 = vst.msk [vmem:[#allocation2 + $0x10] sm:$0xf0] %vm905_vm7, %v948_v38  ;;  %vm1236_vm7 = vcmask 588800  }
 0x24f   : > { %930 = vst.msk [vmem:[#allocation2 + $0x8] sm:$0xf0] %vm929_vm11, %v927_v34 }
 0x250   : > { %937 = vst.msk [vmem:[#allocation2 + $0x8] sm:$0xf0] %vm936_vm12, %v934_v35  ;;  %v939_v39 = vpop.permute.xlu1 %938  ;;  %v954_v40 = vpop.permute.xlu0 %953 }
 0x251   : > { %942 = vst.msk [vmem:[#allocation2 + $0x8] sm:$0xf0] %vm941_vm13, %v939_v39 }
 0x252   : > { %956 = vst.msk [vmem:[#allocation2 + $0x10] sm:$0xf0] %vm912_vm8, %v954_v40 }
 0x253   : > { %960 = vst.msk [vmem:[#allocation2 + $0x10] sm:$0xf0] %vm917_vm9, %v958_v36 }
 0x254   : > { %v2654_v41 = vpop.permute.xlu1 %2653  ;;  %v968_v42 = vpop.permute.xlu0 %967 }
 0x255   : > { %v2656_v43 = vunpack.i.h.bf16 %v2654_v41  ;;  %v3013_v3 = vunpack.i.l.bf16 %v2654_v41 }
 0x257   : > { %v2973_v44 = vmul.f32 0.0, %v2656_v43  ;;  %v3021_v4 = vsel %vm1007_vm14, %v3013_v3, %v2656_v43 }
 0x258   : > { %v2664_v45 = vpop.permute.xlu1 %2663  ;;  %v974_v46 = vpop.permute.xlu0 %973  ;;  %v2987_v55 = vld [vmem:[#allocation2 + $0x8] sm:$0xff] }
 0x259   : > { %1199 = vrot.lane.b32.xlu1 %v2973_v44, %s3451_s30  ;;  %v2989_v56 = vunpack.i.l.bf16 %v2664_v45  ;;  %v2666_v59 = vunpack.i.h.bf16 %v2664_v45  ;;  %v1189_v7 = vmul.f32 %v3013_v3, %v2987_v55 }
 0x25b   : > { %v1112_v60 = vmul.f32 %v2989_v56, %v2987_v55  ;;  %v3003_v63 = vmul.f32 0.0, %v2666_v59  ;;  %v3042_v10 = vsel %vm1090_vm0, %v2989_v56, %v2666_v59 }
 0x25c   : > { %v2674_v47 = vpop.permute.xlu1 %2673  ;;  %v964_v48 = vpop.permute.xlu0 %963 }
 0x25d   : > { %v2675_v49 = vunpack.i.l.bf16 %v2674_v47  ;;  %966 = vst.msk [vmem:[#allocation2 + $0x10] sm:$0xf0] %vm924_vm10, %v964_v48  ;;  %v3046_v12 = vunpack.i.h.bf16 %v2674_v47 }
 0x25e   : > { %970 = vst.msk [vmem:[#allocation2 + $0x10] sm:$0xf0] %vm929_vm11, %v968_v42 }
 0x25f   : > { %976 = vst.msk [vmem:[#allocation2 + $0x10] sm:$0xf0] %vm936_vm12, %v974_v46  ;;  %v2980_v50 = vmul.f32 0.0, %v2675_v49  ;;  %v3063_v21 = vsel %vm1073_vm2, %v2675_v49, %v3046_v12 }
 0x260   : > { %v978_v51 = vpop.permute.xlu0 %977  ;;  %v1079_v22 = vmul.f32 %v2987_v55, %v3063_v21 }
 0x261   : > { %980 = vst.msk [vmem:[#allocation2 + $0x10] sm:$0xf0] %vm941_vm13, %v978_v51  ;;  %1084 = vrot.lane.b32.xlu0 %v2980_v50, %s3447_s25 }
 0x264   : > { %v2659_v52 = vpop.permute.xlu0 %2658 }
 0x265   : > { %v2661_v53 = vunpack.i.h.bf16 %v2659_v52  ;;  %v2985_v54 = vunpack.i.l.bf16 %v2659_v52 }
 0x267   : > { %v2991_v57 = vmul.f32 0.0, %v2661_v53  ;;  %v1141_v58 = vmul.f32 %v2985_v54, %v2987_v55  ;;  %v3027_v6 = vsel %vm1059_vm15, %v2985_v54, %v2661_v53 }
 0x268   : > { %v2669_v61 = vpop.permute.xlu0 %2668  ;;  %v3005_v0 = vld [vmem:[#allocation2 + $0x10] sm:$0xff] }
 0x269   : > { %1151 = vrot.lane.b32.xlu1 %v2991_v57, %s3455_s29  ;;  %1147 = vrot.lane.b32.xlu0 %v1141_v58, %s3455_s29  ;;  %v2670_v62 = vunpack.i.l.bf16 %v2669_v61  ;;  %v1190_v5 = vmul.f32 %v3021_v4, %v3005_v0  ;;  %v1142_v8 = vmul.f32 %v3027_v6, %v3005_v0  ;;  %v3036_v9 = vunpack.i.h.bf16 %v2669_v61 }
 0x26a   : > { %v1113_v11 = vmul.f32 %v3042_v10, %v3005_v0  ;;  %v1080_v23 = vmul.f32 %v3046_v12, %v3005_v0 }
 0x26b   : > { %v3011_v2 = vmul.f32 0.0, %v2670_v62  ;;  %v3050_v13 = vsel %vm1042_vm1, %v2670_v62, %v3036_v9  ;;  %v1049_v16 = vmul.f32 %v3036_v9, %v3005_v0 }
 0x26c   : > { %v2679_v14 = vpop.permute.xlu0 %2678  ;;  %v1048_v15 = vmul.f32 %v2987_v55, %v3050_v13 }
 0x26d   : > { %1169 = vrot.lane.b32.xlu1 %v2737_v1, %s3459_s0  ;;  %1118 = vrot.lane.b32.xlu0 %v1112_v60, %s3453_s27  ;;  %v3059_v17 = vunpack.i.h.bf16 %v2679_v14  ;;  %v2680_v18 = vunpack.i.l.bf16 %v2679_v14 }
 0x26f   : > { %v3073_v24 = vsel %vm990_vm3, %v2680_v18, %v3059_v17  ;;  %v997_v29 = vmul.f32 %v3059_v17, %v3005_v0  ;;  %v3087_v30 = vmul.f32 0.0, %v2680_v18 }
 0x270   : > { %v996_v28 = vmul.f32 %v2987_v55, %v3073_v24 }
 0x271   : > { %1122 = vrot.lane.b32.xlu1 %v3003_v63, %s3453_s27  ;;  %1167 = vrot.lane.b32.xlu0 %v3005_v0, %s3459_s0 }
 0x275   : > { %1053 = vrot.lane.b32.xlu1 %v3011_v2, %s3449_s20  ;;  %1024 = vrot.lane.b32.xlu0 %v3005_v0, %s3457_s26 }
 0x279   : > { %1165 = vrot.lane.b32.xlu1 %v2987_v55, %s3459_s0  ;;  %1197 = vrot.lane.b32.xlu0 %v1190_v5, %s3451_s30 }
 0x27d   : > { %1195 = vrot.lane.b32.xlu1 %v1189_v7, %s3451_s30  ;;  %1149 = vrot.lane.b32.xlu0 %v1142_v8, %s3455_s29 }
 0x281   : > { %1022 = vrot.lane.b32.xlu1 %v2987_v55, %s3457_s26  ;;  %1120 = vrot.lane.b32.xlu0 %v1113_v11, %s3453_s27 }
 0x285   : > { %1055 = vrot.lane.b32.xlu1 %v1048_v15, %s3449_s20  ;;  %1057 = vrot.lane.b32.xlu0 %v1049_v16, %s3449_s20 }
 0x289   : > { %1086 = vrot.lane.b32.xlu1 %v1079_v22, %s3447_s25  ;;  %1088 = vrot.lane.b32.xlu0 %v1080_v23, %s3447_s25 }
 0x28d   : > { %1003 = vrot.lane.b32.xlu1 %v996_v28, %s3445_s24  ;;  %1005 = vrot.lane.b32.xlu0 %v997_v29, %s3445_s24 }
 0x291   : > { %1001 = vrot.lane.b32.xlu1 %v3087_v30, %s3445_s24  ;;  %1020 = vrot.lane.b32.xlu0 %v2737_v1, %s3457_s26 }
 0x2cb   : > { %v1200_v32 = vpop.permute.xlu1 %1199 }
 0x2d3   : > { %v1085_v31 = vpop.permute.xlu0 %1084 }
 0x2db   : > { %v1152_v33 = vpop.permute.xlu1 %1151  ;;  %v1148_v34 = vpop.permute.xlu0 %1147 }
 0x2df   : > { %v1170_v35 = vpop.permute.xlu1 %1169  ;;  %v1119_v36 = vpop.permute.xlu0 %1118 }
 0x2e3   : > { %v1123_v37 = vpop.permute.xlu1 %1122  ;;  %v1168_v38 = vpop.permute.xlu0 %1167 }
 0x2e4   : > { %v1173_v52 = vsel %vm1171_vm5, %v1168_v38, %v1170_v35 }
 0x2e7   : > { %v1054_v39 = vpop.permute.xlu1 %1053  ;;  %v1025_v40 = vpop.permute.xlu0 %1024 }
 0x2eb   : > { %v1166_v41 = vpop.permute.xlu1 %1165  ;;  %v1198_v42 = vpop.permute.xlu0 %1197 }
 0x2ec   : > { %v1202_v43 = vsel %vm990_vm3, %v1198_v42, %v1200_v32  ;;  %v1172_v5 = vsel %vm1171_vm5, %v1166_v41, %v1168_v38 }
 0x2ed   : > { %v1234_v45 = vpack.c.bf16 %v1202_v43, %v1202_v43 }
 0x2ef   : > { %v1196_v46 = vpop.permute.xlu1 %1195  ;;  %v1150_v47 = vpop.permute.xlu0 %1149  ;;  %2565 = vmatprep.subr.msk.bf16.mxu1 %vm1240_vm4, %v1234_v45  ;;  %v1235_v45 = vld [vmem:[%s3468_s3] sm:$0xf] }
 0x2f0   : > { %v1201_v48 = vsel %vm990_vm3, %v1196_v46, %v1198_v42  ;;  %v1154_v49 = vsel %vm1042_vm1, %v1150_v47, %v1152_v33  ;;  %v1153_v53 = vsel %vm1042_vm1, %v1148_v34, %v1150_v47 }
 0x2f1   : > { %v1233_v51 = vpack.c.bf16 %v1201_v48, %v1201_v48  ;;  %v1232_v61 = vpack.c.bf16 %v1173_v52, %v1154_v49  ;;  %v1231_v7 = vpack.c.bf16 %v1172_v5, %v1153_v53 }
 0x2f3   : > { %v1023_v58 = vpop.permute.xlu1 %1022  ;;  %v1121_v59 = vpop.permute.xlu0 %1120  ;;  %v1242_v60 = vsel %vm1240_vm4, %v1233_v51, 0 }
 0x2f4   : > { %v1125_v62 = vsel %vm1073_vm2, %v1121_v59, %v1123_v37  ;;  %1254 = vmatpush1.bf16.msra.mxu1 %v1242_v60  ;;  %v1124_v8 = vsel %vm1073_vm2, %v1119_v36, %v1121_v59  ;;  %v1028_v37 = vsel %vm1026_vm6, %v1023_v58, %v1025_v40  ;;  %v1329_v59 = vld [vmem:[%s3430_s4] sm:$0xff] }
 0x2f5   : > { %1255 = vmatprep.subr.bf16.mxu1 %v1232_v61  ;;  %v1230_v15 = vpack.c.bf16 %v1125_v62, %v3005_v0  ;;  %v1229_v16 = vpack.c.bf16 %v1124_v8, %v2987_v55 }
 0x2f7   : > { %v1056_v11 = vpop.permute.xlu1 %1055  ;;  %v1058_v14 = vpop.permute.xlu0 %1057 }
 0x2f8   : > { %1256 = vmatpush1.bf16.msra.mxu1 %v1231_v7  ;;  %v1060_v23 = vsel %vm1059_vm15, %v1054_v39, %v1056_v11  ;;  %v1061_v28 = vsel %vm1059_vm15, %v1056_v11, %v1058_v14 }
 0x2f9   : > { %1257 = vmatprep.subr.bf16.mxu1 %v1230_v15 }
 0x2fb   : > { %v1087_v18 = vpop.permute.xlu1 %1086  ;;  %v1089_v22 = vpop.permute.xlu0 %1088 }
 0x2fc   : > { %v1091_v29 = vsel %vm1090_vm0, %v1085_v31, %v1087_v18  ;;  %v1092_v32 = vsel %vm1090_vm0, %v1087_v18, %v1089_v22  ;;  %1258 = vmatpush1.bf16.msra.mxu1 %v1229_v16 }
 0x2fd   : > { %v1228_v33 = vpack.c.bf16 %v1092_v32, %v1061_v28  ;;  %v1227_v34 = vpack.c.bf16 %v1091_v29, %v1060_v23 }
 0x2ff   : > { %v1004_v35 = vpop.permute.xlu1 %1003  ;;  %v1006_v36 = vpop.permute.xlu0 %1005  ;;  %1259 = vmatprep.subr.bf16.mxu1 %v1228_v33 }
 0x300   : > { %v1009_v55 = vsel %vm1007_vm14, %v1004_v35, %v1006_v36  ;;  %1260 = vmatpush1.bf16.msra.mxu1 %v1227_v34 }
 0x301   : > { %v1226_v38 = vpack.c.bf16 %v1028_v37, %v1009_v55 }
 0x303   : > { %v1002_v39 = vpop.permute.xlu1 %1001  ;;  %v1021_v41 = vpop.permute.xlu0 %1020  ;;  %1261 = vmatprep.subr.bf16.mxu1 %v1226_v38 }
 0x304   : > { %v1008_v31 = vsel %vm1007_vm14, %v1002_v39, %v1004_v35  ;;  %v1027_v42 = vsel %vm1026_vm6, %v1021_v41, %v1023_v58  ;;  %v1337_v58 = vld [vmem:[%s3431_s5] sm:$0xff] }
 0x305   : > { %v1225_v43 = vpack.c.bf16 %v1027_v42, %v1008_v31 }
 0x307   : > { %1262 = vmatpush1.bf16.msra.mxu1 %v1225_v43 }
 0x30a   : > { %2566 = vmatmul.mubr.msk.bf16.vlgmr.msra.gmra.mxu1 %vm1236_vm7, %v1235_v45 }
 0x30b   : > { %1999 = vmatprep.mubr.bf16.mxu1 %v2748_v25 }
 0x3ca   : > { %v1281_v40 = vpop.f32.mrf.mxu1 }
 0x3cb   : > { %v1301_v48 = vmul.f32 %v1281_v40, %v1281_v40 }
 0x3cc   : > { %v1283_v46 = vpop.f32.mrf.mxu1 }
 0x3cd   : > { %v1288_v47 = vadd.f32 %v1283_v46, %v1281_v40  ;;  %v1302_v49 = vmul.f32 %v1283_v46, %v1283_v46 }
 0x3ce   : > { %v1285_v51 = vpop.f32.mrf.mxu1 }
 0x3cf   : > { %1289 = vadd.xlane.f32.xlu1 %v1288_v47  ;;  %v1303_v52 = vadd.f32 %v1302_v49, %v1301_v48 }
 0x3d0   : > { %v1286_v53 = vpop.f32.mrf.mxu1 }
 0x3d1   : > { %1304 = vadd.xlane.f32.xlu0 %v1303_v52 }
 0x3e0   : > { %1340 = vperm.xlu1 %2683, %v1337_v58  }
 0x3e4   : > { %1559 = vrot.lane.b32.xlu1 %v2973_v44, %s3451_s30 }
 0x3e7   : > { %1332 = vperm.xlu0 %2682, %v1329_v59  }
 0x3e8   : > { %1520 = vrot.lane.b32.xlu1 %v2991_v57, %s3455_s29 }
 0x3eb   : > { %1470 = vrot.lane.b32.xlu0 %v2980_v50, %s3447_s25  ;;  %s2749_s25 = smov 0.0  }
 0x3ec   : > { %1538 = vrot.lane.b32.xlu1 %v2737_v1, %s3459_s0 }
 0x3f0   : > { %1499 = vrot.lane.b32.xlu1 %v3003_v63, %s3453_s27 }
 0x3f4   : > { %1449 = vrot.lane.b32.xlu1 %v3011_v2, %s3449_s20 }
 0x458   : > { %v1290_v60 = vpop.xlane.xlu1 %1289 }
 0x459   : > { %v1291_v61 = vrot.slane %v1290_v60, 4 }
 0x45a   : > { %v1305_v62 = vpop.xlane.xlu0 %1304 }
 0x45b   : > { %v1292_v5 = vadd.f32 %v1291_v61, %v1290_v60  ;;  %v1306_v7 = vrot.slane %v1305_v62, 4 }
 0x45c   : > { %v1341_v31 = vpop.permute.xlu1 %1340 }
 0x45d   : > { %v1307_v8 = vadd.f32 %v1306_v7, %v1305_v62  ;;  %v1293_v11 = vrot.slane %v1292_v5, 2 }
 0x45f   : > { %v1308_v14 = vrot.slane %v1307_v8, 2  ;;  %v1294_v15 = vadd.f32 %v1293_v11, %v1292_v5 }
 0x461   : > { %v1295_v16 = vrot.slane %v1294_v15, 1  ;;  %v1309_v18 = vadd.f32 %v1308_v14, %v1307_v8 }
 0x462   : > { %v1333_v38 = vpop.permute.xlu0 %1332 }
 0x463   : > { %v1296_v22 = vadd.f32 %v1295_v16, %v1294_v15  ;;  %v1310_v23 = vrot.slane %v1309_v18, 1 }
 0x465   : > { %2600 = vpush %v1296_v22  ;;  %v1311_v28 = vadd.f32 %v1310_v23, %v1309_v18 }
 0x467   : > { %2602 = vpush %v1311_v28 }
 0x496   : > { %s2601_s28 = spop %2600 }
 0x497   : > { %s1300_s19 = smul.f32 0.00048828125, %s2601_s28 }
 0x498   : > { %s2603_s18 = spop %2602 }
 0x499   : > { %s1316_s17 = smul.f32 %s1300_s19, %s1300_s19  ;;  %v1319_v33 = vstv %s1300_s19 }
 0x49a   : > { %s1315_s23 = smul.f32 0.00048828125, %s2603_s18  ;;  %v1320_v34 = vsub.f32 %v1281_v40, %v1319_v33  ;;  %v1321_v35 = vsub.f32 %v1283_v46, %v1319_v33 }
 0x49c   : > { %s1317_s24 = ssub.f32 %s1315_s23, %s1316_s17  ;;  %s3469_s23 = smov 127  }
 0x49e   : > { %s1318_s20 = smax.f32 %s2749_s25, %s1317_s24  ;;  %s3470_s24 = smov 111  }
 0x49f   : > { %s1322_s30 = sadd.f32 1e-05, %s1318_s20  ;;  %s3472_s20 = smov 1  }
 0x4a1   : > { %v1323_v29 = vstv %s1322_s30  ;;  %s3473_s30 = smov 17  }
 0x4a2   : > { %2687 = vrsqrt.f32 %v1323_v29 }
 0x4af   : > { %v2688_v32 = vpop.eup %2687 }
 0x4b0   : > { %2604 = vpush %v2688_v32 }
 0x4e1   : > { %s2605_s27 = spop %2604 }
 0x4e2   : > { %v1326_v36 = vstv %s2605_s27  ;;  %s3471_s27 = smov 15  }
 0x4e3   : > { %v1327_v37 = vmul.f32 %v1326_v36, %v1320_v34  ;;  %v1328_v55 = vmul.f32 %v1326_v36, %v1321_v35 }
 0x4e5   : > { %v1335_v39 = vmul.f32 %v1333_v38, %v1327_v37  ;;  %v1336_v41 = vmul.f32 %v1333_v38, %v1328_v55 }
 0x4e7   : > { %v1343_v42 = vadd.f32 %v1341_v31, %v1335_v39  ;;  %v1344_v43 = vadd.f32 %v1341_v31, %v1336_v41 }
 0x4e9   : > { %v1347_v45 = vmul.f32 0.70710677, %v1343_v42  ;;  %v1348_v47 = vmul.f32 0.70710677, %v1344_v43 }
 0x4eb   : > { %v1349_v48 = vand.u32 2147483647, %v1347_v45  ;;  %v1350_v49 = vand.u32 2147483647, %v1348_v47  ;;  %vm1389_vm8 = vcmp.ge.f32.partialorder %v1347_v45, 0.0  ;;  %vm1390_vm9 = vcmp.ge.f32.partialorder %v1348_v47, 0.0 }
 0x4ed   : > { %v1351_v51 = vmul.f32 0.3275911, %v1349_v48  ;;  %v1352_v52 = vmul.f32 0.3275911, %v1350_v49  ;;  %v1377_v40 = vsub.f32 0.0, %v1349_v48  ;;  %v1378_v46 = vsub.f32 0.0, %v1350_v49 }
 0x4ef   : > { %v1353_v53 = vadd.f32 1.0, %v1351_v51  ;;  %v1354_v58 = vadd.f32 1.0, %v1352_v52  ;;  %v1379_v59 = vmul.f32 %v1377_v40, %v1349_v48  ;;  %v1380_v60 = vmul.f32 %v1378_v46, %v1350_v49 }
 0x4f1   : > { %2689 = vrcp.f32 %v1353_v53  ;;  %v1381_v7 = vmul.f32 1.442695, %v1379_v59  ;;  %v1383_v11 = vmul.f32 1.442695, %v1380_v60  ;;  %v1345_v59 = vmul.f32 0.5, %v1343_v42 }
 0x4f2   : > { %2691 = vrcp.f32 %v1354_v58  ;;  %v1346_v60 = vmul.f32 0.5, %v1344_v43 }
 0x4f3   : > { %2693 = vpow2.f32 %v1381_v7 }
 0x4f4   : > { %2695 = vpow2.f32 %v1383_v11 }
 0x4fe   : > { %v2690_v61 = vpop.eup %2689 }
 0x4ff   : > { %v2692_v62 = vpop.eup %2691  ;;  %v1359_v5 = vmul.f32 1.0614054, %v2690_v61 }
 0x500   : > { %v1360_v8 = vmul.f32 1.0614054, %v2692_v62  ;;  %v2694_v38 = vpop.eup %2693 }
 0x501   : > { %v1361_v14 = vadd.f32 -1.4531521, %v1359_v5  ;;  %v2696_v41 = vpop.eup %2695 }
 0x502   : > { %v1362_v15 = vadd.f32 -1.4531521, %v1360_v8 }
 0x503   : > { %v1363_v16 = vmul.f32 %v2690_v61, %v1361_v14 }
 0x504   : > { %v1364_v18 = vmul.f32 %v2692_v62, %v1362_v15 }
 0x505   : > { %v1365_v22 = vadd.f32 1.4214138, %v1363_v16 }
 0x506   : > { %v1366_v23 = vadd.f32 1.4214138, %v1364_v18 }
 0x507   : > { %v1367_v28 = vmul.f32 %v2690_v61, %v1365_v22 }
 0x508   : > { %v1368_v29 = vmul.f32 %v2692_v62, %v1366_v23  ;;  %v1560_v23 = vpop.permute.xlu1 %1559 }
 0x509   : > { %v1369_v32 = vadd.f32 -0.28449672, %v1367_v28 }
 0x50a   : > { %v1370_v33 = vadd.f32 -0.28449672, %v1368_v29 }
 0x50b   : > { %v1371_v34 = vmul.f32 %v2690_v61, %v1369_v32 }
 0x50c   : > { %v1372_v35 = vmul.f32 %v2692_v62, %v1370_v33  ;;  %v1521_v28 = vpop.permute.xlu1 %1520  ;;  %v1471_v33 = vpop.permute.xlu0 %1470 }
 0x50d   : > { %v1373_v36 = vadd.f32 0.2548296, %v1371_v34 }
 0x50e   : > { %v1374_v37 = vadd.f32 0.2548296, %v1372_v35 }
 0x50f   : > { %v1375_v55 = vmul.f32 %v2690_v61, %v1373_v36 }
 0x510   : > { %v1376_v39 = vmul.f32 %v2692_v62, %v1374_v37  ;;  %v1539_v29 = vpop.permute.xlu1 %1538 }
 0x511   : > { %v1385_v31 = vmul.f32 %v2694_v38, %v1375_v55 }
 0x512   : > { %v1386_v48 = vmul.f32 %v2696_v41, %v1376_v39 }
 0x513   : > { %v1387_v49 = vsub.f32 1.0, %v1385_v31 }
 0x514   : > { %v1388_v51 = vsub.f32 1.0, %v1386_v48  ;;  %v1500_v32 = vpop.permute.xlu1 %1499 }
 0x515   : > { %v1391_v52 = vsub.f32 0.0, %v1387_v49 }
 0x516   : > { %v1392_v53 = vsub.f32 0.0, %v1388_v51 }
 0x517   : > { %v1393_v58 = vsel %vm1389_vm8, %v1387_v49, %v1391_v52 }
 0x518   : > { %v1394_v40 = vsel %vm1390_vm9, %v1388_v51, %v1392_v53  ;;  %v1395_v46 = vadd.f32 1.0, %v1393_v58  ;;  %v1450_v34 = vpop.permute.xlu1 %1449 }
 0x519   : > { %v1396_v5 = vadd.f32 1.0, %v1394_v40 }
 0x51a   : > { %v3137_v7 = vmul.f32 %v1395_v46, %v1345_v59 }
 0x51b   : > { %v3139_v61 = vmul.f32 %v1396_v5, %v1346_v60 }
 0x51c   : > { %v1510_v45 = vmul.f32 %v2985_v54, %v3137_v7  ;;  %v1549_v43 = vmul.f32 %v3013_v3, %v3137_v7  ;;  %v1489_v47 = vmul.f32 %v2989_v56, %v3137_v7  ;;  %v1444_v16 = vmul.f32 %v3137_v7, %v3050_v13 }
 0x51d   : > { %1432 = vrot.lane.b32.xlu0 %v3139_v61, %s3457_s26  ;;  %1536 = vrot.lane.b32.xlu1 %v3139_v61, %s3459_s0  ;;  %v1490_v42 = vmul.f32 %v3139_v61, %v3042_v10  ;;  %v1550_v62 = vmul.f32 %v3139_v61, %v3021_v4  ;;  %v1445_v8 = vmul.f32 %v3036_v9, %v3139_v61 }
 0x51e   : > { %v1511_v11 = vmul.f32 %v3139_v61, %v3027_v6  ;;  %v1466_v14 = vmul.f32 %v3046_v12, %v3139_v61  ;;  %v1406_v15 = vmul.f32 %v3059_v17, %v3139_v61  ;;  %v1465_v18 = vmul.f32 %v3137_v7, %v3063_v21 }
 0x51f   : > { %v1405_v22 = vmul.f32 %v3137_v7, %v3073_v24 }
 0x521   : > { %1534 = vrot.lane.b32.xlu1 %v3137_v7, %s3459_s0  ;;  %1516 = vrot.lane.b32.xlu0 %v1510_v45, %s3455_s29 }
 0x525   : > { %1430 = vrot.lane.b32.xlu1 %v3137_v7, %s3457_s26  ;;  %1497 = vrot.lane.b32.xlu0 %v1490_v42, %s3469_s23 }
 0x529   : > { %1555 = vrot.lane.b32.xlu1 %v1549_v43, %s3470_s24  ;;  %1495 = vrot.lane.b32.xlu0 %v1489_v47, %s3469_s23 }
 0x52d   : > { %1557 = vrot.lane.b32.xlu1 %v1550_v62, %s3470_s24  ;;  %1453 = vrot.lane.b32.xlu0 %v1445_v8, %s3471_s27 }
 0x531   : > { %1518 = vrot.lane.b32.xlu1 %v1511_v11, %s3455_s29  ;;  %1474 = vrot.lane.b32.xlu0 %v1466_v14, %s3472_s20 }
 0x535   : > { %1414 = vrot.lane.b32.xlu0 %v1406_v15, %s3473_s30  ;;  %1451 = vrot.lane.b32.xlu1 %v1444_v16, %s3471_s27 }
 0x539   : > { %1428 = vrot.lane.b32.xlu0 %v2737_v1, %s3457_s26  ;;  %1472 = vrot.lane.b32.xlu1 %v1465_v18, %s3472_s20 }
 0x53d   : > { %1412 = vrot.lane.b32.xlu1 %v1405_v22, %s3473_s30 }
 0x541   : > { %1410 = vrot.lane.b32.xlu1 %v3087_v30, %s3473_s30 }
 0x58f   : > { %v1433_v35 = vpop.permute.xlu0 %1432  ;;  %v1537_v36 = vpop.permute.xlu1 %1536 }
 0x590   : > { %v1541_v40 = vsel %vm1171_vm5, %v1537_v36, %v1539_v29 }
 0x593   : > { %v1517_v37 = vpop.permute.xlu0 %1516  ;;  %v1535_v55 = vpop.permute.xlu1 %1534 }
 0x594   : > { %v1540_v60 = vsel %vm1171_vm5, %v1535_v55, %v1537_v36 }
 0x597   : > { %v1498_v38 = vpop.permute.xlu0 %1497  ;;  %v1431_v39 = vpop.permute.xlu1 %1430 }
 0x598   : > { %v1502_v5 = vsel %vm1073_vm2, %v1498_v38, %v1500_v32 }
 0x599   : > { %v1590_v14 = vpack.c.bf16 %v1502_v5, %v3139_v61  ;;  %v1435_v61 = vsel %vm1026_vm6, %v1431_v39, %v1433_v35 }
 0x59b   : > { %v1496_v41 = vpop.permute.xlu0 %1495  ;;  %v1556_v31 = vpop.permute.xlu1 %1555 }
 0x59c   : > { %v1501_v8 = vsel %vm1073_vm2, %v1496_v41, %v1498_v38 }
 0x59d   : > { %v1589_v15 = vpack.c.bf16 %v1501_v8, %v3137_v7 }
 0x59f   : > { %v1454_v48 = vpop.permute.xlu0 %1453  ;;  %v1558_v49 = vpop.permute.xlu1 %1557 }
 0x5a0   : > { %v1561_v51 = vsel %vm990_vm3, %v1556_v31, %v1558_v49  ;;  %v1562_v52 = vsel %vm990_vm3, %v1558_v49, %v1560_v23 }
 0x5a1   : > { %v1594_v53 = vpack.c.bf16 %v1562_v52, %v1562_v52  ;;  %v1593_v58 = vpack.c.bf16 %v1561_v51, %v1561_v51 }
 0x5a3   : > { %v1519_v46 = vpop.permute.xlu1 %1518  ;;  %2567 = vmatprep.subr.msk.bf16.mxu0 %vm1240_vm4, %v1594_v53  ;;  %v1600_v59 = vsel %vm1240_vm4, %v1593_v58, 0  ;;  %v1475_v43 = vpop.permute.xlu0 %1474 }
 0x5a4   : > { %v1522_v45 = vsel %vm1042_vm1, %v1517_v37, %v1519_v46  ;;  %v1523_v42 = vsel %vm1042_vm1, %v1519_v46, %v1521_v28  ;;  %1612 = vmatpush1.bf16.msra.mxu0 %v1600_v59  ;;  %v1695_v46 = vld [vmem:[%s3434_s8] sm:$0xff] }
 0x5a5   : > { %v1592_v47 = vpack.c.bf16 %v1541_v40, %v1523_v42  ;;  %v1591_v62 = vpack.c.bf16 %v1540_v60, %v1522_v45 }
 0x5a7   : > { %v1452_v11 = vpop.permute.xlu1 %1451  ;;  %1613 = vmatprep.subr.bf16.mxu0 %v1592_v47  ;;  %v1415_v16 = vpop.permute.xlu0 %1414 }
 0x5a8   : > { %1614 = vmatpush1.bf16.msra.mxu0 %v1591_v62  ;;  %v1455_v22 = vsel %vm1059_vm15, %v1450_v34, %v1452_v11  ;;  %v1456_v23 = vsel %vm1059_vm15, %v1452_v11, %v1454_v48  ;;  %v1595_v48 = vld [vmem:[%s3432_s6] sm:$0xf] }
 0x5a9   : > { %1615 = vmatprep.subr.bf16.mxu0 %v1590_v14 }
 0x5ab   : > { %v1473_v18 = vpop.permute.xlu1 %1472  ;;  %v1429_v7 = vpop.permute.xlu0 %1428 }
 0x5ac   : > { %v1476_v28 = vsel %vm1090_vm0, %v1471_v33, %v1473_v18  ;;  %v1477_v29 = vsel %vm1090_vm0, %v1473_v18, %v1475_v43  ;;  %1616 = vmatpush1.bf16.msra.mxu0 %v1589_v15  ;;  %v1434_v34 = vsel %vm1026_vm6, %v1429_v7, %v1431_v39 }
 0x5ad   : > { %v1588_v32 = vpack.c.bf16 %v1477_v29, %v1456_v23  ;;  %v1587_v36 = vpack.c.bf16 %v1476_v28, %v1455_v22 }
 0x5af   : > { %v1413_v37 = vpop.permute.xlu1 %1412  ;;  %1617 = vmatprep.subr.bf16.mxu0 %v1588_v32 }
 0x5b0   : > { %v1417_v55 = vsel %vm1007_vm14, %v1413_v37, %v1415_v16  ;;  %1618 = vmatpush1.bf16.msra.mxu0 %v1587_v36 }
 0x5b1   : > { %v1586_v38 = vpack.c.bf16 %v1435_v61, %v1417_v55  ;;  %v1703_v55 = vld [vmem:[#allocation2 + $0x8] sm:$0xff] }
 0x5b3   : > { %v1411_v41 = vpop.permute.xlu1 %1410  ;;  %1619 = vmatprep.subr.bf16.mxu0 %v1586_v38 }
 0x5b4   : > { %v1416_v33 = vsel %vm1007_vm14, %v1411_v41, %v1413_v37 }
 0x5b5   : > { %v1585_v31 = vpack.c.bf16 %v1434_v34, %v1416_v33 }
 0x5b7   : > { %1620 = vmatpush1.bf16.msra.mxu0 %v1585_v31 }
 0x5ba   : > { %2568 = vmatmul.mubr.msk.bf16.vlgmr.msra.gmra.mxu0 %vm1236_vm7, %v1595_v48 }
 0x5bb   : > { %2384 = vmatprep.mubr.bf16.mxu0 %v2748_v25  ;;  %v1687_v25 = vld [vmem:[%s3433_s7] sm:$0xff] }
 0x67a   : > { %v1639_v35 = vpop.f32.mrf.mxu0 }
 0x67b   : > { %v1659_v52 = vmul.f32 %v1639_v35, %v1639_v35 }
 0x67c   : > { %v1641_v49 = vpop.f32.mrf.mxu0 }
 0x67d   : > { %v1646_v51 = vadd.f32 %v1641_v49, %v1639_v35  ;;  %v1660_v53 = vmul.f32 %v1641_v49, %v1641_v49 }
 0x67e   : > { %v1643_v58 = vpop.f32.mrf.mxu0 }
 0x67f   : > { %1647 = vadd.xlane.f32.xlu1 %v1646_v51  ;;  %v1661_v39 = vadd.f32 %v1660_v53, %v1659_v52 }
 0x680   : > { %v1644_v40 = vpop.f32.mrf.mxu0 }
 0x681   : > { %1662 = vadd.xlane.f32.xlu0 %v1661_v39 }
 0x690   : > { %1698 = vperm.xlu1 %2683, %v1695_v46  }
 0x694   : > { %1921 = vrot.lane.b32.xlu1 %v2973_v44, %s3470_s24 }
 0x697   : > { %1690 = vperm.xlu0 %2682, %v1687_v25  }
 0x698   : > { %1882 = vrot.lane.b32.xlu1 %v2991_v57, %s3455_s29 }
 0x69b   : > { %1832 = vrot.lane.b32.xlu0 %v2980_v50, %s3472_s20 }
 0x69c   : > { %1900 = vrot.lane.b32.xlu1 %v2737_v1, %s3459_s0 }
 0x6a0   : > { %1861 = vrot.lane.b32.xlu1 %v3003_v63, %s3469_s23 }
 0x6a4   : > { %1811 = vrot.lane.b32.xlu1 %v3011_v2, %s3471_s27 }
 0x708   : > { %v1648_v44 = vpop.xlane.xlu1 %1647 }
 0x709   : > { %v1649_v59 = vrot.slane %v1648_v44, 4 }
 0x70a   : > { %v1663_v60 = vpop.xlane.xlu0 %1662 }
 0x70b   : > { %v1650_v5 = vadd.f32 %v1649_v59, %v1648_v44  ;;  %v1664_v45 = vrot.slane %v1663_v60, 4 }
 0x70c   : > { %v1699_v36 = vpop.permute.xlu1 %1698 }
 0x70d   : > { %v1651_v42 = vrot.slane %v1650_v5, 2  ;;  %v1665_v43 = vadd.f32 %v1664_v45, %v1663_v60 }
 0x70f   : > { %v1666_v57 = vrot.slane %v1665_v43, 2  ;;  %v1652_v47 = vadd.f32 %v1651_v42, %v1650_v5 }
 0x711   : > { %v1653_v62 = vrot.slane %v1652_v47, 1  ;;  %v1667_v50 = vadd.f32 %v1666_v57, %v1665_v43 }
 0x712   : > { %v1691_v28 = vpop.permute.xlu0 %1690 }
 0x713   : > { %v1654_v8 = vadd.f32 %v1653_v62, %v1652_v47  ;;  %v1668_v11 = vrot.slane %v1667_v50, 1 }
 0x715   : > { %2606 = vpush %v1654_v8  ;;  %v1669_v1 = vadd.f32 %v1668_v11, %v1667_v50 }
 0x717   : > { %2608 = vpush %v1669_v1 }
 0x746   : > { %s2607_s18 = spop %2606 }
 0x747   : > { %s1658_s17 = smul.f32 0.00048828125, %s2607_s18 }
 0x748   : > { %s2609_s28 = spop %2608 }
 0x749   : > { %s1674_s19 = smul.f32 %s1658_s17, %s1658_s17  ;;  %v1677_v14 = vstv %s1658_s17 }
 0x74a   : > { %s1673_s29 = smul.f32 0.00048828125, %s2609_s28  ;;  %v1678_v15 = vsub.f32 %v1639_v35, %v1677_v14  ;;  %v1679_v16 = vsub.f32 %v1641_v49, %v1677_v14 }
 0x74c   : > { %s1675_s26 = ssub.f32 %s1673_s29, %s1674_s19 }
 0x74e   : > { %s1676_s0 = smax.f32 %s2749_s25, %s1675_s26 }
 0x74f   : > { %s1680_s1 = sadd.f32 1e-05, %s1676_s0  ;;  %s3476_s0 = smov 113  }
 0x751   : > { %v1681_v63 = vstv %s1680_s1  ;;  %s3474_s1 = smov 112  }
 0x752   : > { %2697 = vrsqrt.f32 %v1681_v63 }
 0x75f   : > { %v2698_v2 = vpop.eup %2697 }
 0x760   : > { %2610 = vpush %v2698_v2 }
 0x791   : > { %s2611_s2 = spop %2610 }
 0x792   : > { %v1684_v18 = vstv %s2611_s2  ;;  %s3475_s2 = smov 16  }
 0x793   : > { %v1685_v22 = vmul.f32 %v1684_v18, %v1678_v15  ;;  %v1686_v23 = vmul.f32 %v1684_v18, %v1679_v16 }
 0x795   : > { %v1693_v29 = vmul.f32 %v1691_v28, %v1685_v22  ;;  %v1694_v32 = vmul.f32 %v1691_v28, %v1686_v23 }
 0x797   : > { %v1701_v37 = vadd.f32 %v1699_v36, %v1693_v29  ;;  %v1702_v61 = vadd.f32 %v1699_v36, %v1694_v32 }
 0x799   : > { %v1705_v7 = vadd.f32 %v1703_v55, %v1701_v37  ;;  %v1706_v38 = vadd.f32 %v1702_v61, %v3005_v0 }
 0x79b   : > { %v1709_v41 = vmul.f32 0.70710677, %v1705_v7  ;;  %v1710_v34 = vmul.f32 0.70710677, %v1706_v38  ;;  %v1707_v61 = vmul.f32 0.5, %v1705_v7 }
 0x79d   : > { %v1711_v33 = vand.u32 2147483647, %v1709_v41  ;;  %v1712_v31 = vand.u32 2147483647, %v1710_v34  ;;  %vm1751_vm10 = vcmp.ge.f32.partialorder %v1709_v41, 0.0  ;;  %vm1752_vm11 = vcmp.ge.f32.partialorder %v1710_v34, 0.0 }
 0x79f   : > { %v1713_v48 = vmul.f32 0.3275911, %v1711_v33  ;;  %v1714_v35 = vmul.f32 0.3275911, %v1712_v31  ;;  %v1739_v52 = vsub.f32 0.0, %v1711_v33  ;;  %v1740_v53 = vsub.f32 0.0, %v1712_v31 }
 0x7a1   : > { %v1715_v49 = vadd.f32 1.0, %v1713_v48  ;;  %v1716_v51 = vadd.f32 1.0, %v1714_v35  ;;  %v1741_v58 = vmul.f32 %v1739_v52, %v1711_v33  ;;  %v1742_v39 = vmul.f32 %v1740_v53, %v1712_v31 }
 0x7a2   : > { %v1708_v31 = vmul.f32 0.5, %v1706_v38 }
 0x7a3   : > { %2699 = vrcp.f32 %v1715_v49  ;;  %v1743_v44 = vmul.f32 1.442695, %v1741_v58  ;;  %v1745_v0 = vmul.f32 1.442695, %v1742_v39  ;;  %v1833_v58 = vpop.permute.xlu0 %1832 }
 0x7a4   : > { %2701 = vrcp.f32 %v1716_v51 }
 0x7a5   : > { %2703 = vpow2.f32 %v1743_v44 }
 0x7a6   : > { %2705 = vpow2.f32 %v1745_v0 }
 0x7b0   : > { %v2700_v40 = vpop.eup %2699 }
 0x7b1   : > { %v2702_v46 = vpop.eup %2701  ;;  %v1721_v25 = vmul.f32 1.0614054, %v2700_v40 }
 0x7b2   : > { %v1722_v59 = vmul.f32 1.0614054, %v2702_v46  ;;  %v2704_v15 = vpop.eup %2703 }
 0x7b3   : > { %v1723_v60 = vadd.f32 -1.4531521, %v1721_v25  ;;  %v2706_v18 = vpop.eup %2705 }
 0x7b4   : > { %v1724_v5 = vadd.f32 -1.4531521, %v1722_v59 }
 0x7b5   : > { %v1725_v45 = vmul.f32 %v2700_v40, %v1723_v60 }
 0x7b6   : > { %v1726_v42 = vmul.f32 %v2702_v46, %v1724_v5 }
 0x7b7   : > { %v1727_v43 = vadd.f32 1.4214138, %v1725_v45 }
 0x7b8   : > { %v1728_v57 = vadd.f32 1.4214138, %v1726_v42 }
 0x7b9   : > { %v1729_v47 = vmul.f32 %v2700_v40, %v1727_v43 }
 0x7ba   : > { %v1730_v62 = vmul.f32 %v2702_v46, %v1728_v57 }
 0x7bb   : > { %v1731_v50 = vadd.f32 -0.28449672, %v1729_v47 }
 0x7bc   : > { %v1732_v8 = vadd.f32 -0.28449672, %v1730_v62 }
 0x7bd   : > { %v1733_v11 = vmul.f32 %v2700_v40, %v1731_v50 }
 0x7be   : > { %v1734_v1 = vmul.f32 %v2702_v46, %v1732_v8 }
 0x7bf   : > { %v1735_v63 = vadd.f32 0.2548296, %v1733_v11 }
 0x7c0   : > { %v1736_v2 = vadd.f32 0.2548296, %v1734_v1 }
 0x7c1   : > { %v1737_v14 = vmul.f32 %v2700_v40, %v1735_v63 }
 0x7c2   : > { %v1738_v16 = vmul.f32 %v2702_v46, %v1736_v2 }
 0x7c3   : > { %v1747_v22 = vmul.f32 %v2704_v15, %v1737_v14 }
 0x7c4   : > { %v1748_v23 = vmul.f32 %v2706_v18, %v1738_v16 }
 0x7c5   : > { %v1749_v28 = vsub.f32 1.0, %v1747_v22 }
 0x7c6   : > { %v1750_v29 = vsub.f32 1.0, %v1748_v23 }
 0x7c7   : > { %v1753_v32 = vsub.f32 0.0, %v1749_v28 }
 0x7c8   : > { %v1754_v36 = vsub.f32 0.0, %v1750_v29 }
 0x7c9   : > { %v1755_v37 = vsel %vm1751_vm10, %v1749_v28, %v1753_v32 }
 0x7ca   : > { %v1756_v55 = vsel %vm1752_vm11, %v1750_v29, %v1754_v36  ;;  %v1757_v33 = vadd.f32 1.0, %v1755_v37 }
 0x7cb   : > { %v1758_v48 = vadd.f32 1.0, %v1756_v55 }
 0x7cc   : > { %v3234_v35 = vmul.f32 %v1757_v33, %v1707_v61 }
 0x7cd   : > { %v3236_v49 = vmul.f32 %v1758_v48, %v1708_v31 }
 0x7ce   : > { %1846 = vst [vmem:[#allocation5 + $0x88] sm:$0xff] %v3234_v35  ;;  %1896 = vrot.lane.b32.xlu1 %v3234_v35, %s3474_s1  ;;  %v1911_v7 = vmul.f32 %v3013_v3, %v3234_v35  ;;  %v1806_v41 = vmul.f32 %v3234_v35, %v3050_v13  ;;  %v1827_v3 = vmul.f32 %v3234_v35, %v3063_v21 }
 0x7cf   : > { %1847 = vst [vmem:[#allocation5 + $0x40] sm:$0xff] %v3236_v49  ;;  %1898 = vrot.lane.b32.xlu0 %v3236_v49, %s3474_s1  ;;  %v1912_v38 = vmul.f32 %v3236_v49, %v3021_v4  ;;  %v1873_v34 = vmul.f32 %v3236_v49, %v3027_v6  ;;  %v1872_v4 = vmul.f32 %v2985_v54, %v3234_v35 }
 0x7d0   : > { %v1767_v13 = vmul.f32 %v3234_v35, %v3073_v24  ;;  %v1852_v6 = vmul.f32 %v3236_v49, %v3042_v10  ;;  %v1851_v21 = vmul.f32 %v2989_v56, %v3234_v35  ;;  %v1807_v54 = vmul.f32 %v3036_v9, %v3236_v49  ;;  %v2719_v56 = vld [vmem:[#allocation2] sm:$0xff] }
 0x7d1   : > { %v1828_v10 = vmul.f32 %v3046_v12, %v3236_v49  ;;  %v1768_v24 = vmul.f32 %v3059_v17, %v3236_v49 }
 0x7d2   : > { %1917 = vrot.lane.b32.xlu1 %v1911_v7, %s3470_s24 }
 0x7d3   : > { %1794 = vrot.lane.b32.xlu0 %v3236_v49, %s3475_s2 }
 0x7d6   : > { %1792 = vrot.lane.b32.xlu1 %v3234_v35, %s3475_s2 }
 0x7d7   : > { %1919 = vrot.lane.b32.xlu0 %v1912_v38, %s3470_s24 }
 0x7da   : > { %1813 = vrot.lane.b32.xlu1 %v1806_v41, %s3471_s27 }
 0x7db   : > { %1880 = vrot.lane.b32.xlu0 %v1873_v34, %s3476_s0 }
 0x7de   : > { %1834 = vrot.lane.b32.xlu1 %v1827_v3, %s3472_s20  ;;  %v1957_v3 = vld [vmem:[%s3435_s9] sm:$0x3] }
 0x7df   : > { %1878 = vrot.lane.b32.xlu0 %v1872_v4, %s3476_s0 }
 0x7e2   : > { %1774 = vrot.lane.b32.xlu1 %v1767_v13, %s3473_s30 }
 0x7e3   : > { %1859 = vrot.lane.b32.xlu0 %v1852_v6, %s3469_s23 }
 0x7e6   : > { %1772 = vrot.lane.b32.xlu1 %v3087_v30, %s3473_s30  ;;  %v1922_v30 = vpop.permute.xlu1 %1921 }
 0x7e7   : > { %1857 = vrot.lane.b32.xlu0 %v1851_v21, %s3469_s23 }
 0x7ea   : > { %v1883_v51 = vpop.permute.xlu1 %1882 }
 0x7eb   : > { %1815 = vrot.lane.b32.xlu0 %v1807_v54, %s3471_s27 }
 0x7ee   : > { %v1901_v52 = vpop.permute.xlu1 %1900 }
 0x7ef   : > { %1836 = vrot.lane.b32.xlu0 %v1828_v10, %s3472_s20 }
 0x7f2   : > { %v1862_v53 = vpop.permute.xlu1 %1861 }
 0x7f3   : > { %1776 = vrot.lane.b32.xlu0 %v1768_v24, %s3473_s30 }
 0x7f6   : > { %v1812_v9 = vpop.permute.xlu1 %1811 }
 0x7f7   : > { %1790 = vrot.lane.b32.xlu0 %v2719_v56, %s3475_s2 }
 0x840   : > { %v1897_v39 = vpop.permute.xlu1 %1896 }
 0x841   : > { %v1899_v40 = vpop.permute.xlu0 %1898 }
 0x842   : > { %v1903_v12 = vsel %vm1171_vm5, %v1899_v40, %v1901_v52  ;;  %v1902_v46 = vsel %vm1171_vm5, %v1897_v39, %v1899_v40  ;;  %v2174_v39 = vcombine.low %v2938_v19, %v2941_v20  ;;  %v2130_v40 = vcombine.low %v2949_v26, %v2952_v27 }
 0x844   : > { %v1918_v25 = vpop.permute.xlu1 %1917 }
 0x845   : > { %v1795_v44 = vpop.permute.xlu0 %1794 }
 0x848   : > { %v1793_v17 = vpop.permute.xlu1 %1792 }
 0x849   : > { %v1920_v59 = vpop.permute.xlu0 %1919  ;;  %v1797_v0 = vsel %vm1026_vm6, %v1793_v17, %v1795_v44 }
 0x84a   : > { %v1923_v60 = vsel %vm990_vm3, %v1918_v25, %v1920_v59  ;;  %v1924_v5 = vsel %vm990_vm3, %v1920_v59, %v1922_v30  ;;  %1801 = vst [vmem:[#allocation5 + $0x58] sm:$0xff] %v1797_v0 }
 0x84b   : > { %v1956_v45 = vpack.c.bf16 %v1924_v5, %v1924_v5  ;;  %v1955_v42 = vpack.c.bf16 %v1923_v60, %v1923_v60 }
 0x84c   : > { %v1814_v43 = vpop.permute.xlu1 %1813 }
 0x84d   : > { %v1881_v57 = vpop.permute.xlu0 %1880  ;;  %v1817_v47 = vsel %vm1059_vm15, %v1812_v9, %v1814_v43  ;;  %2569 = vmatprep.subr.msk.bf16.mxu1 %vm1240_vm4, %v1956_v45  ;;  %v1962_v62 = vsel %vm1240_vm4, %v1955_v42, 0  ;;  %v2061_v9 = vld [vmem:[%s3437_s11] sm:$0xf] }
 0x84e   : > { %v1885_v50 = vsel %vm1042_vm1, %v1881_v57, %v1883_v51  ;;  %1821 = vst [vmem:[#allocation5 + $0x20] sm:$0xff] %v1817_v47  ;;  %1974 = vmatpush1.bf16.msra.mxu1 %v1962_v62 }
 0x84f   : > { %v1954_v8 = vpack.c.bf16 %v1903_v12, %v1885_v50 }
 0x850   : > { %v1835_v11 = vpop.permute.xlu1 %1834 }
 0x851   : > { %v1879_v1 = vpop.permute.xlu0 %1878  ;;  %v1838_v63 = vsel %vm1090_vm0, %v1833_v58, %v1835_v11  ;;  %1975 = vmatprep.subr.bf16.mxu1 %v1954_v8  ;;  %v2053_v58 = vld [vmem:[%s3436_s10] sm:$0xf] }
 0x852   : > { %v1884_v2 = vsel %vm1042_vm1, %v1879_v1, %v1881_v57  ;;  %1842 = vst [vmem:[#allocation5 + $0x70] sm:$0xff] %v1838_v63  ;;  %v1949_v48 = vpack.c.bf16 %v1838_v63, %v1817_v47  ;;  %v2300_v47 = vld [vmem:[#allocation4 + $0xc] sm:$0xf] }
 0x853   : > { %v1953_v14 = vpack.c.bf16 %v1902_v46, %v1884_v2  ;;  %v2231_v1 = vld [vmem:[#allocation4 + $0xc] sm:$0xf] }
 0x854   : > { %v1775_v15 = vpop.permute.xlu1 %1774 }
 0x855   : > { %v1860_v16 = vpop.permute.xlu0 %1859  ;;  %1976 = vmatpush1.bf16.msra.mxu1 %v1953_v14 }
 0x856   : > { %v1864_v18 = vsel %vm1073_vm2, %v1860_v16, %v1862_v53 }
 0x857   : > { %v1952_v22 = vpack.c.bf16 %v1864_v18, %v3236_v49 }
 0x858   : > { %v1773_v23 = vpop.permute.xlu1 %1772 }
 0x859   : > { %v1858_v28 = vpop.permute.xlu0 %1857  ;;  %v1778_v29 = vsel %vm1007_vm14, %v1773_v23, %v1775_v15  ;;  %1977 = vmatprep.subr.bf16.mxu1 %v1952_v22 }
 0x85a   : > { %v1863_v32 = vsel %vm1073_vm2, %v1858_v28, %v1860_v16  ;;  %1782 = vst [vmem:[#allocation5] sm:$0xff] %v1778_v29  ;;  %v2257_v16 = vld [vmem:[#allocation4 + $0xc] sm:$0xf] }
 0x85b   : > { %v1951_v36 = vpack.c.bf16 %v1863_v32, %v3234_v35  ;;  %v2684_v28 = vld [vmem:[#allocation4 + $0xc] ss:$0 sps:$4 sm:$0xff]  }
 0x85d   : > { %v1816_v37 = vpop.permute.xlu0 %1815  ;;  %1978 = vmatpush1.bf16.msra.mxu1 %v1951_v36 }
 0x85e   : > { %v1818_v61 = vsel %vm1059_vm15, %v1814_v43, %v1816_v37 }
 0x85f   : > { %1822 = vst [vmem:[#allocation5 + $0x8] sm:$0xff] %v1818_v61 }
 0x861   : > { %v1837_v55 = vpop.permute.xlu0 %1836 }
 0x862   : > { %v1839_v33 = vsel %vm1090_vm0, %v1835_v11, %v1837_v55 }
 0x863   : > { %1843 = vst [vmem:[#allocation5 + $0x80] sm:$0xff] %v1839_v33  ;;  %v1950_v31 = vpack.c.bf16 %v1839_v33, %v1818_v61 }
 0x865   : > { %v1777_v49 = vpop.permute.xlu0 %1776  ;;  %1979 = vmatprep.subr.bf16.mxu1 %v1950_v31 }
 0x866   : > { %v1779_v7 = vsel %vm1007_vm14, %v1775_v15, %v1777_v49  ;;  %1980 = vmatpush1.bf16.msra.mxu1 %v1949_v48 }
 0x867   : > { %1783 = vst [vmem:[#allocation5 + $0x38] sm:$0xff] %v1779_v7  ;;  %v1948_v38 = vpack.c.bf16 %v1797_v0, %v1779_v7 }
 0x869   : > { %v1791_v41 = vpop.permute.xlu0 %1790  ;;  %1981 = vmatprep.subr.bf16.mxu1 %v1948_v38 }
 0x86a   : > { %v1796_v35 = vsel %vm1026_vm6, %v1791_v41, %v1793_v17 }
 0x86b   : > { %1800 = vst [vmem:[#allocation5 + $0x78] sm:$0xff] %v1796_v35  ;;  %v1947_v34 = vpack.c.bf16 %v1796_v35, %v1778_v29 }
 0x86d   : > { %1982 = vmatpush1.bf16.msra.mxu1 %v1947_v34 }
 0x870   : > { %2570 = vmatmul.mubr.msk.bf16.vlgmr.msra.gmra.mxu1 %vm1236_vm7, %v1957_v3 }
 0x930   : > { %v3311_v4 = vpop.f32.mrf.mxu1 }
 0x931   : > { %v2023_v13 = vmul.f32 %v3311_v4, %v3311_v4  ;;  %v2008_v21 = vsel %vm1240_vm4, %v3311_v4, 0.0 }
 0x932   : > { %v3315_v6 = vpop.f32.mrf.mxu1 }
 0x933   : > { %v2009_v54 = vsel %vm1240_vm4, %v3315_v6, 0.0  ;;  %v2024_v10 = vmul.f32 %v3315_v6, %v3315_v6  ;;  %v2025_v30 = vsel %vm1240_vm4, %v2023_v13, 0.0 }
 0x934   : > { %v2005_v24 = vpop.f32.mrf.mxu1  ;;  %v2010_v56 = vadd.f32 %v2009_v54, %v2008_v21 }
 0x935   : > { %v2026_v51 = vsel %vm1240_vm4, %v2024_v10, 0.0 }
 0x936   : > { %2011 = vadd.xlane.f32.xlu1 %v2010_v56  ;;  %v2006_v52 = vpop.f32.mrf.mxu1  ;;  %v2027_v53 = vadd.f32 %v2026_v51, %v2025_v30 }
 0x938   : > { %2028 = vadd.xlane.f32.xlu0 %v2027_v53 }
 0x947   : > { %2064 = vperm.xlu1 %2683, %v2061_v9  }
 0x94b   : > { %2301 = vrot.lane.b32.xlu1 %v2174_v39, %s3473_s30 }
 0x94e   : > { %2056 = vperm.xlu0 %2682, %v2053_v58  }
 0x94f   : > { %2232 = vrot.lane.b32.xlu1 %v2174_v39, %s3472_s20 }
 0x952   : > { %2258 = vrot.lane.b32.xlu0 %v2130_v40, %s3471_s27 }
 0x953   : > { %2175 = vrot.lane.b32.xlu1 %v2174_v39, %s3476_s0 }
 0x956   : > { %2131 = vrot.lane.b32.xlu0 %v2130_v40, %s3470_s24 }
 0x95a   : > { %2200 = vrot.lane.b32.xlu0 %v2130_v40, %s3469_s23 }
 0x9bf   : > { %v2012_v12 = vpop.xlane.xlu1 %2011 }
 0x9c0   : > { %v2013_v46 = vrot.slane %v2012_v12, 4 }
 0x9c1   : > { %v2029_v25 = vpop.xlane.xlu0 %2028 }
 0x9c2   : > { %v2014_v44 = vadd.f32 %v2013_v46, %v2012_v12  ;;  %v2030_v19 = vrot.slane %v2029_v25, 4 }
 0x9c3   : > { %v2065_v42 = vpop.permute.xlu1 %2064 }
 0x9c4   : > { %v2015_v20 = vrot.slane %v2014_v44, 2  ;;  %v2031_v17 = vadd.f32 %v2030_v19, %v2029_v25 }
 0x9c6   : > { %v2032_v59 = vrot.slane %v2031_v17, 2  ;;  %v2016_v0 = vadd.f32 %v2015_v20, %v2014_v44 }
 0x9c7   : > { %v2302_v43 = vpop.permute.xlu1 %2301 }
 0x9c8   : > { %v2017_v60 = vrot.slane %v2016_v0, 1  ;;  %v2033_v5 = vadd.f32 %v2032_v59, %v2031_v17  ;;  %v2303_v57 = vrot.slane %v2302_v43, 4 }
 0x9c9   : > { %v2057_v11 = vpop.permute.xlu0 %2056 }
 0x9ca   : > { %v2018_v26 = vadd.f32 %v2017_v60, %v2016_v0  ;;  %v2034_v27 = vrot.slane %v2033_v5, 1  ;;  %v2308_v50 = vmul.f32 %v2303_v57, %v2300_v47  ;;  %v3344_v18 = vsel %vm1007_vm14, %v2303_v57, %v2302_v43 }
 0x9cb   : > { %v2233_v62 = vpop.permute.xlu1 %2232 }
 0x9cc   : > { %2612 = vpush %v2018_v26  ;;  %v2035_v45 = vadd.f32 %v2034_v27, %v2033_v5  ;;  %v2234_v8 = vrot.slane %v2233_v62, 4  ;;  %2316 = vrot.lane.b32.xlu1 %v2308_v50, %s3470_s24 }
 0x9cd   : > { %v2259_v14 = vpop.permute.xlu0 %2258 }
 0x9ce   : > { %2614 = vpush %v2035_v45  ;;  %v2239_v63 = vmul.f32 %v2234_v8, %v2231_v1  ;;  %v2260_v15 = vrot.slane %v2259_v14, 4  ;;  %v3348_v23 = vsel %vm1090_vm0, %v2234_v8, %v2233_v62 }
 0x9d0   : > { %v2243_v2 = vcombine.low %v2239_v63, %v2239_v63  ;;  %v2265_v22 = vmul.f32 %v2260_v15, %v2257_v16  ;;  %v3352_v29 = vsel %vm1059_vm15, %v2260_v15, %v2259_v14 }
 0x9d2   : > { %2248 = vrot.lane.b32.xlu1 %v2243_v2, %s3469_s23 }
 0x9d6   : > { %2273 = vrot.lane.b32.xlu1 %v2265_v22, %s3476_s0 }
 0x9da   : > { %2291 = vrot.lane.b32.xlu1 %v2684_v28, %s3474_s1 }
 0x9fd   : > { %s2613_s26 = spop %2612 }
 0x9fe   : > { %s2022_s29 = smul.f32 0.0009765625, %s2613_s26 }
 0x9ff   : > { %s2615_s18 = spop %2614 }
 0xa00   : > { %s2040_s17 = smul.f32 %s2022_s29, %s2022_s29  ;;  %v2043_v37 = vstv %s2022_s29 }
 0xa01   : > { %s2039_s28 = smul.f32 0.0009765625, %s2615_s18  ;;  %v2044_v61 = vsub.f32 %v3311_v4, %v2043_v37  ;;  %v2045_v55 = vsub.f32 %v3315_v6, %v2043_v37 }
 0xa03   : > { %s2041_s19 = ssub.f32 %s2039_s28, %s2040_s17 }
 0xa05   : > { %s2042_s26 = smax.f32 %s2749_s25, %s2041_s19 }
 0xa06   : > { %s2046_s3 = sadd.f32 1e-05, %s2042_s26 }
 0xa08   : > { %v2047_v32 = vstv %s2046_s3 }
 0xa09   : > { %2707 = vrsqrt.f32 %v2047_v32 }
 0xa16   : > { %v2708_v36 = vpop.eup %2707 }
 0xa17   : > { %2616 = vpush %v2708_v36 }
 0xa48   : > { %s2617_s18 = spop %2616 }
 0xa49   : > { %v2050_v33 = vstv %s2617_s18 }
 0xa4a   : > { %v2051_v31 = vmul.f32 %v2050_v33, %v2044_v61  ;;  %v2052_v48 = vmul.f32 %v2050_v33, %v2045_v55 }
 0xa4c   : > { %v2059_v49 = vmul.f32 %v2057_v11, %v2051_v31  ;;  %v2060_v7 = vmul.f32 %v2057_v11, %v2052_v48  ;;  %v2132_v31 = vpop.permute.xlu0 %2131 }
 0xa4e   : > { %v2067_v38 = vadd.f32 %v2065_v42, %v2059_v49  ;;  %v2068_v41 = vadd.f32 %v2065_v42, %v2060_v7  ;;  %v2133_v49 = vrot.slane %v2132_v31, 4 }
 0xa50   : > { %v2071_v35 = vmul.f32 0.70710677, %v2067_v38  ;;  %v2072_v34 = vmul.f32 0.70710677, %v2068_v41  ;;  %v2069_v2 = vmul.f32 0.5, %v2067_v38  ;;  %v2070_v16 = vmul.f32 0.5, %v2068_v41  ;;  %v2201_v41 = vpop.permute.xlu0 %2200 }
 0xa52   : > { %v2073_v3 = vand.u32 2147483647, %v2071_v35  ;;  %v2074_v13 = vand.u32 2147483647, %v2072_v34  ;;  %vm2113_vm12 = vcmp.ge.f32.partialorder %v2071_v35, 0.0  ;;  %vm2114_vm13 = vcmp.ge.f32.partialorder %v2072_v34, 0.0 }
 0xa54   : > { %v2075_v21 = vmul.f32 0.3275911, %v2073_v3  ;;  %v2076_v54 = vmul.f32 0.3275911, %v2074_v13  ;;  %v2101_v4 = vsub.f32 0.0, %v2073_v3  ;;  %v2102_v6 = vsub.f32 0.0, %v2074_v13 }
 0xa56   : > { %v2077_v10 = vadd.f32 1.0, %v2075_v21  ;;  %v2078_v24 = vadd.f32 1.0, %v2076_v54  ;;  %v2103_v56 = vmul.f32 %v2101_v4, %v2073_v3  ;;  %v2104_v30 = vmul.f32 %v2102_v6, %v2074_v13 }
 0xa57   : > { %v2134_v54 = vsel %vm990_vm3, %v2133_v49, %v2132_v31 }
 0xa58   : > { %2709 = vrcp.f32 %v2077_v10  ;;  %v2105_v9 = vmul.f32 1.442695, %v2103_v56  ;;  %v2107_v39 = vmul.f32 1.442695, %v2104_v30 }
 0xa59   : > { %2711 = vrcp.f32 %v2078_v24 }
 0xa5a   : > { %2713 = vpow2.f32 %v2105_v9 }
 0xa5b   : > { %2715 = vpow2.f32 %v2107_v39 }
 0xa65   : > { %v2710_v51 = vpop.eup %2709 }
 0xa66   : > { %v2712_v52 = vpop.eup %2711  ;;  %v2083_v53 = vmul.f32 1.0614054, %v2710_v51 }
 0xa67   : > { %v2084_v58 = vmul.f32 1.0614054, %v2712_v52  ;;  %v2714_v42 = vpop.eup %2713 }
 0xa68   : > { %v2085_v40 = vadd.f32 -1.4531521, %v2083_v53  ;;  %v2716_v57 = vpop.eup %2715 }
 0xa69   : > { %v2086_v12 = vadd.f32 -1.4531521, %v2084_v58 }
 0xa6a   : > { %v2087_v46 = vmul.f32 %v2710_v51, %v2085_v40 }
 0xa6b   : > { %v2088_v25 = vmul.f32 %v2712_v52, %v2086_v12 }
 0xa6c   : > { %v2089_v44 = vadd.f32 1.4214138, %v2087_v46 }
 0xa6d   : > { %v2090_v19 = vadd.f32 1.4214138, %v2088_v25 }
 0xa6e   : > { %v2091_v20 = vmul.f32 %v2710_v51, %v2089_v44 }
 0xa6f   : > { %v2092_v17 = vmul.f32 %v2712_v52, %v2090_v19 }
 0xa70   : > { %v2093_v59 = vadd.f32 -0.28449672, %v2091_v20 }
 0xa71   : > { %v2094_v0 = vadd.f32 -0.28449672, %v2092_v17 }
 0xa72   : > { %v2095_v60 = vmul.f32 %v2710_v51, %v2093_v59 }
 0xa73   : > { %v2096_v5 = vmul.f32 %v2712_v52, %v2094_v0 }
 0xa74   : > { %v2097_v26 = vadd.f32 0.2548296, %v2095_v60 }
 0xa75   : > { %v2098_v27 = vadd.f32 0.2548296, %v2096_v5 }
 0xa76   : > { %v2099_v45 = vmul.f32 %v2710_v51, %v2097_v26 }
 0xa77   : > { %v2100_v43 = vmul.f32 %v2712_v52, %v2098_v27 }
 0xa78   : > { %v2109_v47 = vmul.f32 %v2714_v42, %v2099_v45 }
 0xa79   : > { %v2110_v62 = vmul.f32 %v2716_v57, %v2100_v43 }
 0xa7a   : > { %v2111_v50 = vsub.f32 1.0, %v2109_v47 }
 0xa7b   : > { %v2112_v8 = vsub.f32 1.0, %v2110_v62 }
 0xa7c   : > { %v2115_v11 = vsub.f32 0.0, %v2111_v50 }
 0xa7d   : > { %v2116_v1 = vsub.f32 0.0, %v2112_v8 }
 0xa7e   : > { %v2117_v63 = vsel %vm2113_vm12, %v2111_v50, %v2115_v11 }
 0xa7f   : > { %v2118_v14 = vsel %vm2114_vm13, %v2112_v8, %v2116_v1  ;;  %v2119_v15 = vadd.f32 1.0, %v2117_v63 }
 0xa80   : > { %v2120_v22 = vadd.f32 1.0, %v2118_v14 }
 0xa81   : > { %v2121_v28 = vmul.f32 %v2119_v15, %v2069_v2 }
 0xa82   : > { %v2122_v32 = vmul.f32 %v2120_v22, %v2070_v16 }
 0xa83   : > { %v2721_v7 = vcombine.low %v2121_v28, %v2121_v28 }
 0xa84   : > { %v2125_v36 = vcombine.low %v2121_v28, %v2122_v32  ;;  %v2720_v33 = vcombine.low %v2122_v32, %v2122_v32 }
 0xa86   : > { %2127 = vst [vmem:[#allocation4 + $0x4] sm:$0xff] %v2125_v36  ;;  %v2307_v37 = vmul.f32 %v3344_v18, %v2125_v36  ;;  %v2238_v61 = vmul.f32 %v3348_v23, %v2125_v36  ;;  %v2264_v55 = vmul.f32 %v3352_v29, %v2125_v36  ;;  %2289 = vrot.lane.b32.xlu0 %v2125_v36, %s3474_s1  ;;  %2228 = vst [vmem:[#allocation5 + $0x20] sm:$0xf] %v2125_v36  ;;  %v2176_v29 = vpop.permute.xlu1 %2175 }
 0xa87   : > { %2229 = vst [vmem:[#allocation5 + $0x8] sm:$0xf] %v2720_v33  ;;  %v2202_v23 = vrot.slane %v2201_v41, 4  ;;  %v2177_v34 = vrot.slane %v2176_v29, 4 }
 0xa88   : > { %v2311_v51 = vcombine.high %v2307_v37, %v2307_v37  ;;  %v2268_v53 = vcombine.high %v2264_v55, %v2264_v55  ;;  %v2242_v58 = vcombine.low %v2238_v61, %v2238_v61 }
 0xa89   : > { %v2203_v35 = vsel %vm1073_vm2, %v2202_v23, %v2201_v41  ;;  %v2178_v4 = vsel %vm1042_vm1, %v2177_v34, %v2176_v29 }
 0xa8a   : > { %2246 = vrot.lane.b32.xlu0 %v2238_v61, %s3469_s23  ;;  %v2317_v46 = vpop.permute.xlu1 %2316 }
 0xa8d   : > { %v2128_v48 = vld [vmem:[#allocation4] sm:$0xff]  ;;  %v2129_v38 = vld [vmem:[#allocation4 + $0x8] sm:$0xf] }
 0xa8e   : > { %2162 = vrot.lane.b32.xlu1 %v2128_v48, %s3475_s2  ;;  %2287 = vrot.lane.b32.xlu0 %v2721_v7, %s3474_s1  ;;  %v2138_v18 = vmul.f32 %v2133_v49, %v2129_v38  ;;  %v2686_v3 = vld [vmem:[#allocation4 + $0x8] ss:$0 sps:$4 sm:$0xff]   ;;  %v2206_v21 = vmul.f32 %v2203_v35, %v2128_v48  ;;  %v2137_v24 = vmul.f32 %v2134_v54, %v2128_v48  ;;  %v2249_v25 = vpop.permute.xlu1 %2248 }
 0xa8f   : > { %v2173_v13 = vld [vmem:[#allocation4 + $0x8] sm:$0xf]  ;;  %v2158_v6 = vcombine.low %v2128_v48, %v2128_v48  ;;  %v2181_v30 = vmul.f32 %v2178_v4, %v2128_v48 }
 0xa90   : > { %v2182_v10 = vmul.f32 %v2177_v34, %v2173_v13  ;;  %v2141_v56 = vcombine.high %v2137_v24, %v2137_v24  ;;  %v2199_v9 = vld [vmem:[#allocation4 + $0x8] sm:$0xf]  ;;  %v2210_v12 = vcombine.low %v2206_v21, %v2206_v21 }
 0xa91   : > { %v2185_v52 = vcombine.high %v2181_v30, %v2181_v30  ;;  %v2207_v39 = vmul.f32 %v2202_v23, %v2199_v9 }
 0xa92   : > { %2312 = vrot.lane.b32.xlu1 %v2307_v37, %s3470_s24  ;;  %2146 = vrot.lane.b32.xlu0 %v2138_v18, %s3473_s30  ;;  %v2274_v44 = vpop.permute.xlu1 %2273 }
 0xa93   : > { %v2211_v40 = vcombine.low %v2207_v39, %v2207_v39 }
 0xa96   : > { %2269 = vrot.lane.b32.xlu1 %v2264_v55, %s3476_s0  ;;  %2164 = vrot.lane.b32.xlu0 %v2686_v3, %s3475_s2  ;;  %v2292_v19 = vpop.permute.xlu1 %2291 }
 0xa9a   : > { %2214 = vrot.lane.b32.xlu1 %v2206_v21, %s3472_s20  ;;  %2190 = vrot.lane.b32.xlu0 %v2182_v10, %s3471_s27 }
 0xa9e   : > { %2142 = vrot.lane.b32.xlu1 %v2137_v24, %s3473_s30  ;;  %2160 = vrot.lane.b32.xlu0 %v2158_v6, %s3475_s2 }
 0xaa2   : > { %2144 = vrot.lane.b32.xlu1 %v2141_v56, %s3473_s30  ;;  %2314 = vrot.lane.b32.xlu0 %v2311_v51, %s3470_s24 }
 0xaa6   : > { %2188 = vrot.lane.b32.xlu1 %v2185_v52, %s3471_s27  ;;  %2271 = vrot.lane.b32.xlu0 %v2268_v53, %s3476_s0  ;;  %v2340_v52 = vld [vmem:[%s3438_s12] sm:$0x3] }
 0xaaa   : > { %2186 = vrot.lane.b32.xlu1 %v2181_v30, %s3471_s27  ;;  %2244 = vrot.lane.b32.xlu0 %v2242_v58, %s3469_s23 }
 0xaae   : > { %2216 = vrot.lane.b32.xlu0 %v2211_v40, %s3472_s20 }
 0xab2   : > { %2212 = vrot.lane.b32.xlu0 %v2210_v12, %s3472_s20  ;;  %s3477_s20 = sshll.u32 %s3480_s22, 2 }
 0xab3   : > { %s550_s2 = scalar_lea.vmem %s3441_s15, %s3477_s20 }
 0xaf8   : > { %v2290_v20 = vpop.permute.xlu0 %2289 }
 0xaf9   : > { %v2294_v17 = vsel %vm1171_vm5, %v2290_v20, %v2292_v19 }
 0xafa   : > { %2298 = vst [vmem:[#allocation5 + $0x80] sm:$0xf0] %v2294_v17 }
 0xafc   : > { %v2247_v59 = vpop.permute.xlu0 %2246 }
 0xafd   : > { %v2251_v0 = vsel %vm1073_vm2, %v2247_v59, %v2249_v25 }
 0xafe   : > { %2255 = vst [vmem:[#allocation5 + $0x8] sm:$0xf0] %v2251_v0  ;;  %v2454_v0 = vld [vmem:[%s550_s2] sm:$0xf] }
 0xb00   : > { %v2163_v60 = vpop.permute.xlu1 %2162  ;;  %v2288_v5 = vpop.permute.xlu0 %2287 }
 0xb01   : > { %v2293_v26 = vsel %vm1171_vm5, %v2288_v5, %v2290_v20 }
 0xb02   : > { %2297 = vst [vmem:[#allocation5 + $0x70] sm:$0xf0] %v2293_v26 }
 0xb04   : > { %v2313_v27 = vpop.permute.xlu1 %2312  ;;  %v2147_v45 = vpop.permute.xlu0 %2146 }
 0xb05   : > { %v2329_v29 = vld [vmem:[#allocation5 + $0x8] sm:$0xff] }
 0xb08   : > { %v2270_v42 = vpop.permute.xlu1 %2269  ;;  %v2165_v43 = vpop.permute.xlu0 %2164 }
 0xb09   : > { %v2167_v57 = vsel %vm1026_vm6, %v2163_v60, %v2165_v43 }
 0xb0a   : > { %2171 = vst [vmem:[#allocation5 + $0x38] sm:$0xf0] %v2167_v57 }
 0xb0c   : > { %v2215_v47 = vpop.permute.xlu1 %2214  ;;  %v2191_v62 = vpop.permute.xlu0 %2190 }
 0xb10   : > { %v2143_v50 = vpop.permute.xlu1 %2142  ;;  %v2161_v8 = vpop.permute.xlu0 %2160 }
 0xb11   : > { %v2166_v11 = vsel %vm1026_vm6, %v2161_v8, %v2163_v60  ;;  %v2438_v60 = vld [vmem:[%s3439_s13] sm:$0xf] }
 0xb12   : > { %2170 = vst [vmem:[#allocation5] sm:$0xf0] %v2166_v11 }
 0xb14   : > { %v2145_v1 = vpop.permute.xlu1 %2144  ;;  %v2315_v14 = vpop.permute.xlu0 %2314 }
 0xb15   : > { %v2148_v63 = vsel %vm1007_vm14, %v2143_v50, %v2145_v1  ;;  %v2149_v2 = vsel %vm1007_vm14, %v2145_v1, %v2147_v45  ;;  %v2318_v15 = vsel %vm990_vm3, %v2313_v27, %v2315_v14  ;;  %v2319_v16 = vsel %vm990_vm3, %v2315_v14, %v2317_v46 }
 0xb16   : > { %2152 = vst [vmem:[#allocation5] sm:$0xf] %v2148_v63  ;;  %2153 = vst [vmem:[#allocation5 + $0x38] sm:$0xf] %v2149_v2  ;;  %vm2345_vm14 = vcmask 1041408  }
 0xb17   : > { %2322 = vst [vmem:[#allocation5 + $0x88] sm:$0xf] %v2318_v15  ;;  %2323 = vst [vmem:[#allocation5 + $0x40] sm:$0xf] %v2319_v16 }
 0xb18   : > { %v2189_v22 = vpop.permute.xlu1 %2188  ;;  %v2272_v32 = vpop.permute.xlu0 %2271 }
 0xb19   : > { %v2193_v28 = vsel %vm1059_vm15, %v2189_v22, %v2191_v62  ;;  %v2275_v36 = vsel %vm1042_vm1, %v2270_v42, %v2272_v32  ;;  %v2276_v37 = vsel %vm1042_vm1, %v2272_v32, %v2274_v44 }
 0xb1a   : > { %2197 = vst [vmem:[#allocation5 + $0x58] sm:$0xf] %v2193_v28  ;;  %2279 = vst [vmem:[#allocation5 + $0x70] sm:$0xf] %v2275_v36 }
 0xb1b   : > { %2280 = vst [vmem:[#allocation5 + $0x80] sm:$0xf] %v2276_v37 }
 0xb1c   : > { %v2187_v61 = vpop.permute.xlu1 %2186  ;;  %v2245_v33 = vpop.permute.xlu0 %2244 }
 0xb1d   : > { %v2192_v55 = vsel %vm1059_vm15, %v2187_v61, %v2189_v22  ;;  %v2250_v31 = vsel %vm1073_vm2, %v2245_v33, %v2247_v59  ;;  %v2325_v24 = vld [vmem:[#allocation5 + $0x38] sm:$0xff]  ;;  %v2324_v56 = vld [vmem:[#allocation5] sm:$0xff]  ;;  %vm2341_vm15 = vcmask 293888   ;;  %v2446_v59 = vld [vmem:[%s3440_s14] sm:$0xf] }
 0xb1e   : > { %2196 = vst [vmem:[#allocation5 + $0x78] sm:$0xf] %v2192_v55  ;;  %v2333_v48 = vld [vmem:[#allocation5 + $0x40] sm:$0xf]  ;;  %v2332_v49 = vld [vmem:[#allocation5 + $0x88] sm:$0xf] }
 0xb1f   : > { %2254 = vst [vmem:[#allocation5 + $0x20] sm:$0xf0] %v2250_v31  ;;  %v2339_v7 = vpack.c.bf16 %v2333_v48, %v2333_v48  ;;  %v2338_v38 = vpack.c.bf16 %v2332_v49, %v2332_v49 }
 0xb20   : > { %v2217_v41 = vpop.permute.xlu0 %2216 }
 0xb21   : > { %2571 = vmatprep.subr.msk.bf16.mxu0 %vm2345_vm14, %v2339_v7  ;;  %v2347_v18 = vsel %vm2345_vm14, %v2338_v38, 0  ;;  %v2219_v23 = vsel %vm1090_vm0, %v2215_v47, %v2217_v41  ;;  %v2330_v54 = vld [vmem:[#allocation5 + $0x70] sm:$0xff] }
 0xb22   : > { %2363 = vmatpush1.bf16.msra.mxu0 %v2347_v18  ;;  %v2331_v35 = vld [vmem:[#allocation5 + $0x80] sm:$0xff]  ;;  %2223 = vst [vmem:[#allocation5 + $0x58] sm:$0xf0] %v2219_v23 }
 0xb23   : > { %v2337_v34 = vpack.c.bf16 %v2331_v35, %v2329_v29 }
 0xb24   : > { %v2213_v3 = vpop.permute.xlu0 %2212 }
 0xb25   : > { %2364 = vmatprep.subr.bf16.mxu0 %v2337_v34  ;;  %v2218_v13 = vsel %vm1090_vm0, %v2213_v3, %v2215_v47 }
 0xb26   : > { %v2328_v21 = vld [vmem:[#allocation5 + $0x20] sm:$0xff]  ;;  %2222 = vst [vmem:[#allocation5 + $0x78] sm:$0xf0] %v2218_v13 }
 0xb27   : > { %v2336_v10 = vpack.c.bf16 %v2330_v54, %v2328_v21 }
 0xb29   : > { %2365 = vmatpush1.bf16.msra.mxu0 %v2336_v10  ;;  %v2327_v4 = vld [vmem:[#allocation5 + $0x58] sm:$0xff] }
 0xb2a   : > { %v2335_v6 = vpack.c.bf16 %v2327_v4, %v2325_v24 }
 0xb2c   : > { %2366 = vmatprep.subr.bf16.mxu0 %v2335_v6 }
 0xb2d   : > { %v2326_v30 = vld [vmem:[#allocation5 + $0x78] sm:$0xff] }
 0xb2e   : > { %v2334_v51 = vpack.c.bf16 %v2326_v30, %v2324_v56 }
 0xb30   : > { %2367 = vmatpush1.bf16.msra.mxu0 %v2334_v51 }
 0xb33   : > { %2572 = vmatmul.mubr.msk.bf16.vlgmr.msra.gmra.mxu0 %vm2341_vm15, %v2340_v52 }
 0xbf3   : > { %v2386_v53 = vpop.f32.mrf.mxu0 }
 0xbf4   : > { %v2408_v9 = vmul.f32 %v2386_v53, %v2386_v53  ;;  %v2393_v39 = vsel %vm1240_vm4, %v2386_v53, 0.0 }
 0xbf5   : > { %v2388_v58 = vpop.f32.mrf.mxu0 }
 0xbf6   : > { %v2394_v40 = vsel %vm1240_vm4, %v2388_v58, 0.0  ;;  %v2409_v12 = vmul.f32 %v2388_v58, %v2388_v58  ;;  %v2410_v44 = vsel %vm1240_vm4, %v2408_v9, 0.0 }
 0xbf7   : > { %v2390_v46 = vpop.f32.mrf.mxu0  ;;  %v2395_v25 = vadd.f32 %v2394_v40, %v2393_v39 }
 0xbf8   : > { %v2411_v19 = vsel %vm1240_vm4, %v2409_v12, 0.0 }
 0xbf9   : > { %2396 = vadd.xlane.f32.xlu1 %v2395_v25  ;;  %v2391_v20 = vpop.f32.mrf.mxu0  ;;  %v2412_v17 = vadd.f32 %v2411_v19, %v2410_v44 }
 0xbfb   : > { %2413 = vadd.xlane.f32.xlu0 %v2412_v17 }
 0xc0a   : > { %2449 = vperm.xlu1 %2683, %v2446_v59  }
 0xc0e   : > { %2457 = vperm.xlu1 %2683, %v2454_v0  }
 0xc11   : > { %2441 = vperm.xlu0 %2682, %v2438_v60  }
 0xc82   : > { %v2397_v5 = vpop.xlane.xlu1 %2396 }
 0xc83   : > { %v2398_v26 = vrot.slane %v2397_v5, 4 }
 0xc84   : > { %v2414_v27 = vpop.xlane.xlu0 %2413 }
 0xc85   : > { %v2399_v45 = vadd.f32 %v2398_v26, %v2397_v5  ;;  %v2415_v42 = vrot.slane %v2414_v27, 4 }
 0xc86   : > { %v2450_v28 = vpop.permute.xlu1 %2449 }
 0xc87   : > { %v2400_v43 = vrot.slane %v2399_v45, 2  ;;  %v2416_v57 = vadd.f32 %v2415_v42, %v2414_v27 }
 0xc89   : > { %v2417_v47 = vrot.slane %v2416_v57, 2  ;;  %v2401_v62 = vadd.f32 %v2400_v43, %v2399_v45 }
 0xc8a   : > { %v2458_v49 = vpop.permute.xlu1 %2457 }
 0xc8b   : > { %v2402_v50 = vrot.slane %v2401_v62, 1  ;;  %v2418_v8 = vadd.f32 %v2417_v47, %v2416_v57 }
 0xc8c   : > { %v2442_v61 = vpop.permute.xlu0 %2441 }
 0xc8d   : > { %v2403_v11 = vadd.f32 %v2402_v50, %v2401_v62  ;;  %v2419_v1 = vrot.slane %v2418_v8, 1 }
 0xc8f   : > { %2618 = vpush %v2403_v11  ;;  %v2420_v63 = vadd.f32 %v2419_v1, %v2418_v8 }
 0xc91   : > { %2620 = vpush %v2420_v63 }
 0xcc0   : > { %s2619_s17 = spop %2618 }
 0xcc1   : > { %s2407_s28 = smul.f32 0.0009765625, %s2619_s17 }
 0xcc2   : > { %s2621_s19 = spop %2620 }
 0xcc3   : > { %s2425_s26 = smul.f32 %s2407_s28, %s2407_s28  ;;  %v2428_v15 = vstv %s2407_s28 }
 0xcc4   : > { %s2424_s18 = smul.f32 0.0009765625, %s2621_s19  ;;  %v2429_v16 = vsub.f32 %v2386_v53, %v2428_v15  ;;  %v2430_v22 = vsub.f32 %v2388_v58, %v2428_v15 }
 0xcc6   : > { %s2426_s3 = ssub.f32 %s2424_s18, %s2425_s26 }
 0xcc8   : > { %s2427_s23 = smax.f32 %s2749_s25, %s2426_s3  ;;  %s3478_s25 = sshll.u32 %s3480_s22, 3 }
 0xcc9   : > { %s2431_s24 = sadd.f32 1e-05, %s2427_s23  ;;  %s555_s1 = scalar_lea.vmem %s3442_s16, %s3478_s25 }
 0xccb   : > { %v2432_v2 = vstv %s2431_s24 }
 0xccc   : > { %2717 = vrsqrt.f32 %v2432_v2 }
 0xcd9   : > { %v2718_v14 = vpop.eup %2717 }
 0xcda   : > { %2622 = vpush %v2718_v14 }
 0xd0b   : > { %s2623_s27 = spop %2622 }
 0xd0c   : > { %v2435_v32 = vstv %s2623_s27 }
 0xd0d   : > { %v2436_v36 = vmul.f32 %v2435_v32, %v2429_v16  ;;  %v2437_v37 = vmul.f32 %v2435_v32, %v2430_v22 }
 0xd0f   : > { %v2444_v55 = vmul.f32 %v2442_v61, %v2436_v36  ;;  %v2445_v33 = vmul.f32 %v2442_v61, %v2437_v37 }
 0xd11   : > { %v2452_v31 = vadd.f32 %v2450_v28, %v2444_v55  ;;  %v2453_v48 = vadd.f32 %v2450_v28, %v2445_v33 }
 0xd13   : > { %v2460_v7 = vadd.f32 %v2458_v49, %v2452_v31  ;;  %v2461_v38 = vadd.f32 %v2458_v49, %v2453_v48 }
 0xd15   : > { %v2464_v41 = vcombine.low %v2460_v7, %v2461_v38 }
 0xd17   : > { %2466 = vst [vmem:[%s555_s1] sm:$0xff] %v2464_v41 }
 0xd18 PF: > { %s26_s21 = sadd.s32 1, %s2728_s21  }
 0xd19   : > { %p23_p4 = scmp.ge.s32.totalorder %s26_s21, 4  }
 0xd1b   :  { %25 = sbr.rel (!%p23_p4) target bundleno = 5 (0x5), region = 120 }

</bundles_post_ra>
